<compile_context>
chip_gen: v5e
topology: v5e:2x2
jax: 0.10.0
libtpu: 0.0.40
codegen_flags: <defaults>
</compile_context>

<pallas_src>
import numpy as np
import jax
import jax.numpy as jnp
from jax.experimental import pallas as pl
from jax.experimental.pallas import tpu as pltpu

# ----------------------------- model dimensions -----------------------------
D         = 32                     # ctx_dim == visual width == embed dim
HEADS     = 4
HEAD_DIM  = D // HEADS
VOCAB     = 64
SEQ       = 8                      # tokenized prompt length (instead of CLIP's 77)
N_CTX     = 4
N_CLS     = 4
N_SUF     = SEQ - 1 - N_CTX        # 3
IMG       = 16
PATCH     = 4
IN_CH     = 3
PATCH_DIM = IN_CH * PATCH * PATCH  # 48
N_PATCH   = (IMG // PATCH) ** 2    # 16
N_TOK     = N_PATCH + 1            # 17 (cls + patches)
TOPK      = 5

SLAB_W    = 4 * D                  # 128: every packed slab row is a full lane group
NEG_INF   = -1e9

# ------------------------------ parameter slabs ------------------------------
# All per-block weights go into one bf16 matrix slab and one f32 vector slab per encoder
# (review item: pack the ~22 tiny constant inputs into 1-2 contiguous slabs).

_BLOCK_MAT = [('w_qkv', (D, 3 * D)), ('w_out', (D, D)),
              ('w_fc', (D, 4 * D)), ('w_proj', (4 * D, D))]
_BLOCK_VEC = [('ln1_g', (1, D)), ('ln1_b', (1, D)), ('b_qkv', (1, 3 * D)),
              ('b_out', (1, D)), ('ln2_g', (1, D)), ('ln2_b', (1, D)),
              ('b_fc', (1, 4 * D)), ('b_proj', (1, D))]


def _slab_layout(entries):
    """entries: [(name, (rows, cols))] -> ({name: (row0, rows, cols)}, total_rows)."""
    off, cur = {}, 0
    for name, (r, c) in entries:
        off[name] = (cur, r, c)
        cur += r
    return off, cur


def _pack_slab(entries, values, dtype):
    """Pack 2-D params into one (total_rows, SLAB_W) slab (lanes zero-padded)."""
    rows = []
    for name, (r, c) in entries:
        a = jnp.asarray(values[name], dtype=dtype).reshape(r, c)
        rows.append(jnp.pad(a, ((0, 0), (0, SLAB_W - c))))
    return jnp.concatenate(rows, axis=0)


def _slab_reader(ref, layout):
    def get(name):
        r0, r, c = layout[name]
        return ref[r0:r0 + r, 0:c]          # static slices: zero-cost views, then loads
    return get


# --------------------------- in-kernel building blocks ---------------------------

def _layernorm(x, g, b):
    x = x.astype(jnp.float32)
    mu = jnp.mean(x, axis=-1, keepdims=True)
    var = jnp.mean(jnp.square(x - mu), axis=-1, keepdims=True)
    return (x - mu) * jax.lax.rsqrt(var + 1e-5) * g + b


def _block_diag_mask(n_seq, seq_len, causal):
    """Additive mask keeping n_seq stacked sequences independent (optionally causal).

    Built from 2-D iotas + range comparisons (no in-kernel integer division)."""
    M = n_seq * seq_len
    row = jax.lax.broadcasted_iota(jnp.int32, (M, M), 0)
    col = jax.lax.broadcasted_iota(jnp.int32, (M, M), 1)
    valid = None
    for s in range(n_seq):                                   # static unroll, n_seq <= 4
        lo, hi = s * seq_len, (s + 1) * seq_len
        blk = (row >= lo) & (row < hi) & (col >= lo) & (col < hi)
        valid = blk if valid is None else (valid | blk)
    if causal:
        valid = valid & (col <= row)
    return jnp.where(valid, 0.0, NEG_INF)


def _attention_block(x, mget, vget, mask, n_seq, seq_len, want_cls):
    """CLIP ResidualAttentionBlock over n_seq sequences stacked along the sublane (M) axis.

    One fused QKV matmul and one fused out-projection; heads are lane-sliced and statically
    unrolled.  Returns (x_out, cls_rows) where cls_rows[b] is the head-averaged softmax row of
    token 0 of sequence b (only if want_cls)."""
    f32, bf16 = jnp.float32, jnp.bfloat16
    scale = 1.0 / float(np.sqrt(HEAD_DIM))

    h = _layernorm(x, vget('ln1_g'), vget('ln1_b'))
    qkv = jnp.dot(h.astype(bf16), mget('w_qkv'),
                  preferred_element_type=f32) + vget('b_qkv')          # (M, 3D), single MXU pass
    q_all, k_all, v_all = qkv[:, 0:D], qkv[:, D:2 * D], qkv[:, 2 * D:3 * D]

    ov_heads = []
    cls_rows = jnp.zeros((n_seq, seq_len), f32) if want_cls else None
    for hh in range(HEADS):                                            # static unroll over heads
        sl = slice(hh * HEAD_DIM, (hh + 1) * HEAD_DIM)
        q, k, v = q_all[:, sl], k_all[:, sl], v_all[:, sl]
        s = jax.lax.dot_general(q, k, (((1,), (1,)), ((), ())),
                                preferred_element_type=f32) * scale + mask
        s = s - jnp.max(s, axis=-1, keepdims=True)
        e = jnp.exp(s)
        prob = e * pl.reciprocal(jnp.sum(e, axis=-1, keepdims=True))   # exact: feeds top-k
        if want_cls:
            rows = [prob[b * seq_len:b * seq_len + 1, b * seq_len:(b + 1) * seq_len]
                    for b in range(n_seq)]
            cls_rows = cls_rows + jnp.concatenate(rows, axis=0) * (1.0 / HEADS)
        ov_heads.append(jnp.dot(prob.astype(bf16), v.astype(bf16),
                                preferred_element_type=f32))           # (M, HEAD_DIM)
    ov = jnp.concatenate(ov_heads, axis=1)                             # heads back onto lanes
    x = x + jnp.dot(ov.astype(bf16), mget('w_out'),
                    preferred_element_type=f32) + vget('b_out')        # single out-projection

    h2 = _layernorm(x, vget('ln2_g'), vget('ln2_b'))
    hfc = jnp.dot(h2.astype(bf16), mget('w_fc'), preferred_element_type=f32) + vget('b_fc')
    hfc = hfc * jax.nn.sigmoid(1.702 * hfc)                            # CLIP QuickGELU
    mlp = jnp.dot(hfc.astype(bf16), mget('w_proj'), preferred_element_type=f32) + vget('b_proj')
    return x + mlp, cls_rows


# --------------------------------- kernel wrappers ---------------------------------

def text_encoder_forward(prefix, ctx, suffix, eot_idx, vec_values, mat_values):
    """PromptLearner.forward (fused) + CLIP text transformer + projection + L2 norm.

    All N_CLS prompts run in ONE kernel body (classes stacked on sublanes, block-diag causal
    mask); grid=(1,) so there is a single pipeline step."""
    vec_entries = ([('pos', (N_CLS * SEQ, D))] + _BLOCK_VEC
                   + [('lnf_g', (1, D)), ('lnf_b', (1, D))])
    mat_entries = _BLOCK_MAT + [('head', (D, D))]
    vec_layout, _ = _slab_layout(vec_entries)
    mat_layout, _ = _slab_layout(mat_entries)
    vec_slab = _pack_slab(vec_entries, vec_values, jnp.float32)
    mat_slab = _pack_slab(mat_entries, mat_values, jnp.bfloat16)       # weights pre-cast to bf16

    M = N_CLS * SEQ

    def kernel(eot_ref, prefix_ref, ctx_ref, suffix_ref, vec_ref, mat_ref, out_ref, x_scr):
        f32, bf16 = jnp.float32, jnp.bfloat16
        vget = _slab_reader(vec_ref, vec_layout)
        mget = _slab_reader(mat_ref, mat_layout)

        # ---- PromptLearner.forward (class_token_position == 'end'), fused in-VMEM ----
        # prompts[c] = concat([prefix[c], ctx, suffix[c]], dim=1); ctx shared across classes.
        for c in range(N_CLS):
            base = c * SEQ
            x_scr[base:base + 1, :] = prefix_ref[c:c + 1, :]
            x_scr[base + 1:base + 1 + N_CTX, :] = ctx_ref[...]
            x_scr[base + 1 + N_CTX:base + SEQ, :] = suffix_ref[c * N_SUF:(c + 1) * N_SUF, :]

        x = x_scr[...] + vget('pos')                       # positional embedding (pre-tiled)
        mask = _block_diag_mask(N_CLS, SEQ, causal=True)   # CLIP text attention is causal
        x, _ = _attention_block(x, mget, vget, mask, N_CLS, SEQ, want_cls=False)
        x = _layernorm(x, vget('lnf_g'), vget('lnf_b'))
        x_scr[...] = x                                     # stage for dynamic EOT gather

        # EOT gather from SMEM scalar indices (no one-hot tensor / extra matmul)
        eot_rows = []
        for c in range(N_CLS):
            idx = c * SEQ + eot_ref[c]
            eot_rows.append(x_scr[pl.ds(idx, 1), :])
        eot_x = jnp.concatenate(eot_rows, axis=0)          # (N_CLS, D)

        feat = jnp.dot(eot_x.astype(bf16), mget('head'), preferred_element_type=f32)
        feat = feat * jax.lax.rsqrt(jnp.sum(feat * feat, axis=-1, keepdims=True) + 1e-12)
        out_ref[...] = feat

    return pl.pallas_call(
        kernel,
        out_shape=jax.ShapeDtypeStruct((N_CLS, D), jnp.float32),
        grid=(1,),
        in_specs=[pl.BlockSpec(memory_space=pltpu.MemorySpace.SMEM),   # eot indices (scalars)
                  pl.BlockSpec(prefix.shape, lambda i: (0, 0)),
                  pl.BlockSpec(ctx.shape, lambda i: (0, 0)),
                  pl.BlockSpec(suffix.shape, lambda i: (0, 0)),
                  pl.BlockSpec(vec_slab.shape, lambda i: (0, 0)),
                  pl.BlockSpec(mat_slab.shape, lambda i: (0, 0))],
        out_specs=pl.BlockSpec((N_CLS, D), lambda i: (0, 0)),
        scratch_shapes=[pltpu.VMEM((M, D), jnp.float32)],
        compiler_params=pltpu.CompilerParams(dimension_semantics=("arbitrary",)),
    )(eot_idx, prefix, ctx, suffix, vec_slab, mat_slab)


def visual_encoder_forward(tokens, vec_values, mat_values, B):
    """Patch embed + transformer block + pooled feature + fused Feature_Trans, whole batch in one
    kernel body (images stacked on sublanes, block-diagonal mask keeps them independent)."""
    vec_entries = ([('pos', (B * N_TOK, D)), ('lnpre_g', (1, D)), ('lnpre_b', (1, D))]
                   + _BLOCK_VEC
                   + [('lnpost_g', (1, D)), ('lnpost_b', (1, D)),
                      ('ft_b1', (1, D)), ('ft_bn_g', (1, D)), ('ft_bn_b', (1, D)),
                      ('ft_b2', (1, D))])
    mat_entries = _BLOCK_MAT + [('head', (D, D)), ('patch', (PATCH_DIM, D)),
                                ('ft_w1', (D, D)), ('ft_w2', (D, D))]
    vec_layout, _ = _slab_layout(vec_entries)
    mat_layout, _ = _slab_layout(mat_entries)
    vec_slab = _pack_slab(vec_entries, vec_values, jnp.float32)
    mat_slab = _pack_slab(mat_entries, mat_values, jnp.bfloat16)

    M = B * N_TOK

    def kernel(tok_ref, vec_ref, mat_ref, feat_ref, attn_ref, fine_ref):
        f32, bf16 = jnp.float32, jnp.bfloat16
        vget = _slab_reader(vec_ref, vec_layout)
        mget = _slab_reader(mat_ref, mat_layout)

        # patch embedding; cls-token embedding is folded into the cls rows of 'pos' wrapper-side
        x = jnp.dot(tok_ref[...].astype(bf16), mget('patch'),
                    preferred_element_type=f32) + vget('pos')            # (B*N_TOK, D)
        x = _layernorm(x, vget('lnpre_g'), vget('lnpre_b'))
        mask = _block_diag_mask(B, N_TOK, causal=False)
        x, cls_rows = _attention_block(x, mget, vget, mask, B, N_TOK, want_cls=True)
        attn_ref[...] = cls_rows                                         # (B, N_TOK) head-averaged

        # pooled image feature: ln_post(cls token) @ proj, fused L2-norm
        cls_tok = jnp.concatenate([x[b * N_TOK:b * N_TOK + 1, :] for b in range(B)], axis=0)
        cls_tok = _layernorm(cls_tok, vget('lnpost_g'), vget('lnpost_b'))
        feat = jnp.dot(cls_tok.astype(bf16), mget('head'), preferred_element_type=f32)
        feat = feat * jax.lax.rsqrt(jnp.sum(feat * feat, axis=-1, keepdims=True) + 1e-12)
        feat_ref[...] = feat

        # Feature_Trans_Module_two_layer fused here: 1x1 conv -> BN (stats over the FULL B*N_TOK
        # batch, matching the standalone module) -> ReLU -> 1x1 conv
        h = jnp.dot(x.astype(bf16), mget('ft_w1'), preferred_element_type=f32) + vget('ft_b1')
        mu = jnp.mean(h, axis=0, keepdims=True)
        var = jnp.mean(jnp.square(h - mu), axis=0, keepdims=True)        # biased var (torch BN fwd)
        h = (h - mu) * jax.lax.rsqrt(var + 1e-5) * vget('ft_bn_g') + vget('ft_bn_b')
        h = jnp.maximum(h, 0.0)
        fine_ref[...] = jnp.dot(h.astype(bf16), mget('ft_w2'),
                                preferred_element_type=f32) + vget('ft_b2')

    return pl.pallas_call(
        kernel,
        out_shape=(jax.ShapeDtypeStruct((B, D), jnp.float32),
                   jax.ShapeDtypeStruct((B, N_TOK), jnp.float32),
                   jax.ShapeDtypeStruct((M, D), jnp.float32)),
        grid=(1,),
        in_specs=[pl.BlockSpec(tokens.shape, lambda i: (0, 0)),
                  pl.BlockSpec(vec_slab.shape, lambda i: (0, 0)),
                  pl.BlockSpec(mat_slab.shape, lambda i: (0, 0))],
        out_specs=(pl.BlockSpec((B, D), lambda i: (0, 0)),
                   pl.BlockSpec((B, N_TOK), lambda i: (0, 0)),
                   pl.BlockSpec((M, D), lambda i: (0, 0))),
        compiler_params=pltpu.CompilerParams(dimension_semantics=("arbitrary",)),
    )(tokens, vec_slab, mat_slab)


# ------------------------------------ forward ------------------------------------

def custom_clip_forward(image, params):
    B = image.shape[0]

    # ---- wrapper-side layout plumbing (no compute) ----
    gh = gw = IMG // PATCH
    patches = image.reshape(B, IN_CH, gh, PATCH, gw, PATCH)
    patches = patches.transpose(0, 2, 4, 1, 3, 5).reshape(B, N_PATCH, PATCH_DIM)
    tokens = jnp.concatenate(
        [jnp.zeros((B, 1, PATCH_DIM), jnp.float32), patches], axis=1).reshape(B * N_TOK, PATCH_DIM)

    vb, tb = params['vis_block'], params['text_block']
    vis_pos_cls = params['vis_pos'].at[0, :].add(params['vis_cls'])    # cls emb folded into pos
    vis_vec = dict(pos=jnp.tile(vis_pos_cls, (B, 1)),
                   lnpre_g=params['vis_ln_pre_g'], lnpre_b=params['vis_ln_pre_b'],
                   ln1_g=vb['ln1_g'], ln1_b=vb['ln1_b'], b_qkv=vb['b_qkv'], b_out=vb['b_out'],
                   ln2_g=vb['ln2_g'], ln2_b=vb['ln2_b'], b_fc=vb['b_fc'], b_proj=vb['b_proj'],
                   lnpost_g=params['vis_ln_post_g'], lnpost_b=params['vis_ln_post_b'],
                   ft_b1=params['ft_b1'], ft_bn_g=params['ft_bn_g'], ft_bn_b=params['ft_bn_b'],
                   ft_b2=params['ft_b2'])
    vis_mat = dict(w_qkv=vb['w_qkv'], w_out=vb['w_out'], w_fc=vb['w_fc'], w_proj=vb['w_proj'],
                   head=params['vis_proj'], patch=params['vis_patch_w'],
                   ft_w1=params['ft_w1'], ft_w2=params['ft_w2'])

    # ---- image encoder + fused Feature_Trans: one Pallas kernel for the whole batch ----
    image_features, cls_rows, image_fine = visual_encoder_forward(tokens, vis_vec, vis_mat, B)
    cls_attn = cls_rows[:, 1:]                                          # (B, N_PATCH)

    # ---- PromptLearner buffers (prefix/suffix from frozen token embeddings, as in __init__) ----
    emb = params['token_embedding'][params['tokenized_prompts']]        # (N_CLS, SEQ, D)
    prefix = emb[:, 0, :]                                               # (N_CLS, D)
    suffix = emb[:, 1 + N_CTX:, :].reshape(N_CLS * N_SUF, D)            # (N_CLS*N_SUF, D)
    eot_idx = jnp.argmax(params['tokenized_prompts'], axis=-1).astype(jnp.int32)

    txt_vec = dict(pos=jnp.tile(params['text_pos'], (N_CLS, 1)),
                   ln1_g=tb['ln1_g'], ln1_b=tb['ln1_b'], b_qkv=tb['b_qkv'], b_out=tb['b_out'],
                   ln2_g=tb['ln2_g'], ln2_b=tb['ln2_b'], b_fc=tb['b_fc'], b_proj=tb['b_proj'],
                   lnf_g=params['ln_final_g'], lnf_b=params['ln_final_b'])
    txt_mat = dict(w_qkv=tb['w_qkv'], w_out=tb['w_out'], w_fc=tb['w_fc'], w_proj=tb['w_proj'],
                   head=params['text_projection'])

    # ---- PromptLearner.forward + text encoder: one Pallas kernel for all classes ----
    text_features = text_encoder_forward(prefix, params['ctx'], suffix, eot_idx, txt_vec, txt_mat)

    logit_scale = jnp.exp(params['logit_scale'])

    # ---- fine-grained token selection ----
    d = D
    x = image_fine.reshape(B, N_TOK, d)
    image_fine_list = [x]
    top_image_fine_list = []
    # TODO(synk): jax.lax.top_k + take_along_axis gather stays in XLA (no Pallas TPU top-k).
    _, indices = jax.lax.top_k(cls_attn, TOPK)                          # (B, k)
    indices = indices + 1
    indices = jnp.concatenate([jnp.zeros((B, 1), indices.dtype), indices], axis=1)
    gather_idx = jnp.broadcast_to(indices[:, :, None], (B, TOPK + 1, d))
    top_feat = jnp.take_along_axis(x, gather_idx, axis=1)               # (B, k+1, d)
    avg_feat = jnp.mean(x, axis=1, keepdims=True)
    top_feat = jnp.concatenate([top_feat, avg_feat], axis=1)            # (B, k+2, d)
    top_image_fine_list.append(top_feat.reshape(-1, d))

    image_fine_out = jnp.concatenate(image_fine_list, axis=0)
    top_image_fine_out = jnp.concatenate(top_image_fine_list, axis=0)
    return text_features, image_features, logit_scale, image_fine_out, top_image_fine_out


# ------------------------------- parameter init ------------------------------

def _block_params(key, Dm):
    ks = jax.random.split(key, 4)
    s = 0.02
    return dict(
        ln1_g=jnp.ones((Dm,), jnp.float32), ln1_b=jnp.zeros((Dm,), jnp.float32),
        w_qkv=(jax.random.normal(ks[0], (Dm, 3 * Dm)) * s).astype(jnp.float32),
        b_qkv=jnp.zeros((3 * Dm,), jnp.float32),
        w_out=(jax.random.normal(ks[1], (Dm, Dm)) * s).astype(jnp.float32),
        b_out=jnp.zeros((Dm,), jnp.float32),
        ln2_g=jnp.ones((Dm,), jnp.float32), ln2_b=jnp.zeros((Dm,), jnp.float32),
        w_fc=(jax.random.normal(ks[2], (Dm, 4 * Dm)) * s).astype(jnp.float32),
        b_fc=jnp.zeros((4 * Dm,), jnp.float32),
        w_proj=(jax.random.normal(ks[3], (4 * Dm, Dm)) * s).astype(jnp.float32),
        b_proj=jnp.zeros((Dm,), jnp.float32),
    )


def init_params(key):
    ks = jax.random.split(key, 12)
    s = 0.02

    # synthetic tokenized prompts: [SOT, X*4, classname, '.', EOT] -> EOT has max id
    SOT, EOT = VOCAB - 2, VOCAB - 1
    tok = np.zeros((N_CLS, SEQ), dtype=np.int32)
    for c in range(N_CLS):
        tok[c, 0] = SOT
        tok[c, 1:1 + N_CTX] = 3
        tok[c, 1 + N_CTX] = 10 + c
        tok[c, 1 + N_CTX + 1] = 5
        tok[c, SEQ - 1] = EOT

    return dict(
        token_embedding=(jax.random.normal(ks[0], (VOCAB, D)) * s).astype(jnp.float32),
        text_pos=(jax.random.normal(ks[1], (SEQ, D)) * s).astype(jnp.float32),
        text_block=_block_params(ks[2], D),
        ln_final_g=jnp.ones((D,), jnp.float32), ln_final_b=jnp.zeros((D,), jnp.float32),
        text_projection=(jax.random.normal(ks[3], (D, D)) * s).astype(jnp.float32),
        tokenized_prompts=jnp.asarray(tok),
        ctx=(jax.random.normal(ks[4], (N_CTX, D)) * 0.02).astype(jnp.float32),
        vis_patch_w=(jax.random.normal(ks[5], (PATCH_DIM, D)) * s).astype(jnp.float32),
        vis_cls=(jax.random.normal(ks[6], (D,)) * s).astype(jnp.float32),
        vis_pos=(jax.random.normal(ks[7], (N_TOK, D)) * s).astype(jnp.float32),
        vis_ln_pre_g=jnp.ones((D,), jnp.float32), vis_ln_pre_b=jnp.zeros((D,), jnp.float32),
        vis_block=_block_params(ks[8], D),
        vis_ln_post_g=jnp.ones((D,), jnp.float32), vis_ln_post_b=jnp.zeros((D,), jnp.float32),
        vis_proj=(jax.random.normal(ks[9], (D, D)) * s).astype(jnp.float32),
        logit_scale=jnp.array(np.log(1.0 / 0.07), jnp.float32),
        ft_w1=(jax.random.normal(ks[10], (D, D)) * s).astype(jnp.float32),
        ft_b1=jnp.zeros((D,), jnp.float32),
        ft_bn_g=jnp.ones((D,), jnp.float32),
        ft_bn_b=jnp.zeros((D,), jnp.float32),
        ft_w2=(jax.random.normal(ks[11], (D, D)) * s).astype(jnp.float32),
        ft_b2=jnp.zeros((D,), jnp.float32),
    )


# ------------------------------------ main ------------------------------------

if __name__ == "__main__":
    key = jax.random.PRNGKey(0)
    k_img, k_params = jax.random.split(key)
    image = jax.random.normal(k_img, (2, IN_CH, IMG, IMG), dtype=jnp.float32)  # NCHW
    params = init_params(k_params)

    fwd = jax.jit(custom_clip_forward)
    text_f, img_f, logit_scale, fine, top_fine = fwd(image, params)
    jax.block_until_ready((text_f, img_f, logit_scale, fine, top_fine))

    assert text_f.shape == (N_CLS, D)
    assert img_f.shape == (2, D)
    assert fine.shape == (2, N_TOK, D)
    assert top_fine.shape == (2 * (TOPK + 2), D)
    assert bool(jnp.all(jnp.isfinite(text_f))) and bool(jnp.all(jnp.isfinite(img_f)))
    assert bool(jnp.all(jnp.isfinite(fine))) and bool(jnp.all(jnp.isfinite(top_fine)))
    print("KERNEL_OK")
</pallas_src>

<mosaic_0001>
module attributes {stable_mosaic.version = 11 : i64} {
  func.func @kernel(%arg0: i32, %arg1: memref<4xi32, #tpu.memory_space<smem>>, %arg2: memref<4x32xf32, #tpu.memory_space<vmem>>, %arg3: memref<4x32xf32, #tpu.memory_space<vmem>>, %arg4: memref<12x32xf32, #tpu.memory_space<vmem>>, %arg5: memref<42x128xf32, #tpu.memory_space<vmem>>, %arg6: memref<256x128xbf16, #tpu.memory_space<vmem>>, %arg7: memref<4x32xf32, #tpu.memory_space<vmem>>, %arg8: memref<32x32xf32, #tpu.memory_space<vmem>>) attributes {dimension_semantics = [#tpu.dimension_semantics<arbitrary>], iteration_bounds = array<i64: 1>, scalar_prefetch = 0 : i64, scratch_operands = 1 : i64, tpu.core_type = #tpu.core_type<tc>, window_params = [{transform_indices = @transform_0, window_bounds = array<i64: 4>}, {pipeline_mode = #tpu.pipeline_mode<synchronous>, transform_indices = @transform_1, window_bounds = array<i64: 4, 32>}, {pipeline_mode = #tpu.pipeline_mode<synchronous>, transform_indices = @transform_2, window_bounds = array<i64: 4, 32>}, {pipeline_mode = #tpu.pipeline_mode<synchronous>, transform_indices = @transform_3, window_bounds = array<i64: 12, 32>}, {pipeline_mode = #tpu.pipeline_mode<synchronous>, transform_indices = @transform_4, window_bounds = array<i64: 42, 128>}, {pipeline_mode = #tpu.pipeline_mode<synchronous>, transform_indices = @transform_5, window_bounds = array<i64: 256, 128>}, {pipeline_mode = #tpu.pipeline_mode<synchronous>, transform_indices = @transform_6, window_bounds = array<i64: 4, 32>}]} {
    %c0 = arith.constant 0 : index
    %c0_0 = arith.constant 0 : index
    %0 = vector.load %arg2[%c0, %c0_0] : memref<4x32xf32, #tpu.memory_space<vmem>>, vector<1x32xf32>
    %c0_1 = arith.constant 0 : index
    %c0_2 = arith.constant 0 : index
    %1 = vector.load %arg8[%c0_1, %c0_2] : memref<32x32xf32, #tpu.memory_space<vmem>>, vector<1x32xf32>
    tpu.vector_store %arg8[%c0_1, %c0_2], %0 {strides = array<i32>} : memref<32x32xf32, #tpu.memory_space<vmem>>, vector<1x32xf32>,
    %c0_3 = arith.constant 0 : index
    %c0_4 = arith.constant 0 : index
    %2 = vector.load %arg3[%c0_3, %c0_4] : memref<4x32xf32, #tpu.memory_space<vmem>>, vector<4x32xf32>
    %c1 = arith.constant 1 : index
    %c0_5 = arith.constant 0 : index
    %3 = vector.load %arg8[%c1, %c0_5] : memref<32x32xf32, #tpu.memory_space<vmem>>, vector<4x32xf32>
    tpu.vector_store %arg8[%c1, %c0_5], %2 {strides = array<i32>} : memref<32x32xf32, #tpu.memory_space<vmem>>, vector<4x32xf32>,
    %c0_6 = arith.constant 0 : index
    %c0_7 = arith.constant 0 : index
    %4 = vector.load %arg4[%c0_6, %c0_7] : memref<12x32xf32, #tpu.memory_space<vmem>>, vector<3x32xf32>
    %c5 = arith.constant 5 : index
    %c0_8 = arith.constant 0 : index
    %5 = vector.load %arg8[%c5, %c0_8] : memref<32x32xf32, #tpu.memory_space<vmem>>, vector<3x32xf32>
    tpu.vector_store %arg8[%c5, %c0_8], %4 {strides = array<i32>} : memref<32x32xf32, #tpu.memory_space<vmem>>, vector<3x32xf32>,
    %c1_9 = arith.constant 1 : index
    %c0_10 = arith.constant 0 : index
    %6 = vector.load %arg2[%c1_9, %c0_10] : memref<4x32xf32, #tpu.memory_space<vmem>>, vector<1x32xf32>
    %c8 = arith.constant 8 : index
    %c0_11 = arith.constant 0 : index
    %7 = vector.load %arg8[%c8, %c0_11] : memref<32x32xf32, #tpu.memory_space<vmem>>, vector<1x32xf32>
    tpu.vector_store %arg8[%c8, %c0_11], %6 {strides = array<i32>} : memref<32x32xf32, #tpu.memory_space<vmem>>, vector<1x32xf32>,
    %c0_12 = arith.constant 0 : index
    %c0_13 = arith.constant 0 : index
    %8 = vector.load %arg3[%c0_12, %c0_13] : memref<4x32xf32, #tpu.memory_space<vmem>>, vector<4x32xf32>
    %c9 = arith.constant 9 : index
    %c0_14 = arith.constant 0 : index
    %9 = vector.load %arg8[%c9, %c0_14] : memref<32x32xf32, #tpu.memory_space<vmem>>, vector<4x32xf32>
    tpu.vector_store %arg8[%c9, %c0_14], %8 {strides = array<i32>} : memref<32x32xf32, #tpu.memory_space<vmem>>, vector<4x32xf32>,
    %c3 = arith.constant 3 : index
    %c0_15 = arith.constant 0 : index
    %10 = vector.load %arg4[%c3, %c0_15] : memref<12x32xf32, #tpu.memory_space<vmem>>, vector<3x32xf32>
    %c13 = arith.constant 13 : index
    %c0_16 = arith.constant 0 : index
    %11 = vector.load %arg8[%c13, %c0_16] : memref<32x32xf32, #tpu.memory_space<vmem>>, vector<3x32xf32>
    tpu.vector_store %arg8[%c13, %c0_16], %10 {strides = array<i32>} : memref<32x32xf32, #tpu.memory_space<vmem>>, vector<3x32xf32>,
    %c2 = arith.constant 2 : index
    %c0_17 = arith.constant 0 : index
    %12 = vector.load %arg2[%c2, %c0_17] : memref<4x32xf32, #tpu.memory_space<vmem>>, vector<1x32xf32>
    %c16 = arith.constant 16 : index
    %c0_18 = arith.constant 0 : index
    %13 = vector.load %arg8[%c16, %c0_18] : memref<32x32xf32, #tpu.memory_space<vmem>>, vector<1x32xf32>
    tpu.vector_store %arg8[%c16, %c0_18], %12 {strides = array<i32>} : memref<32x32xf32, #tpu.memory_space<vmem>>, vector<1x32xf32>,
    %c0_19 = arith.constant 0 : index
    %c0_20 = arith.constant 0 : index
    %14 = vector.load %arg3[%c0_19, %c0_20] : memref<4x32xf32, #tpu.memory_space<vmem>>, vector<4x32xf32>
    %c17 = arith.constant 17 : index
    %c0_21 = arith.constant 0 : index
    %15 = vector.load %arg8[%c17, %c0_21] : memref<32x32xf32, #tpu.memory_space<vmem>>, vector<4x32xf32>
    tpu.vector_store %arg8[%c17, %c0_21], %14 {strides = array<i32>} : memref<32x32xf32, #tpu.memory_space<vmem>>, vector<4x32xf32>,
    %c6 = arith.constant 6 : index
    %c0_22 = arith.constant 0 : index
    %16 = vector.load %arg4[%c6, %c0_22] : memref<12x32xf32, #tpu.memory_space<vmem>>, vector<3x32xf32>
    %c21 = arith.constant 21 : index
    %c0_23 = arith.constant 0 : index
    %17 = vector.load %arg8[%c21, %c0_23] : memref<32x32xf32, #tpu.memory_space<vmem>>, vector<3x32xf32>
    tpu.vector_store %arg8[%c21, %c0_23], %16 {strides = array<i32>} : memref<32x32xf32, #tpu.memory_space<vmem>>, vector<3x32xf32>,
    %c3_24 = arith.constant 3 : index
    %c0_25 = arith.constant 0 : index
    %18 = vector.load %arg2[%c3_24, %c0_25] : memref<4x32xf32, #tpu.memory_space<vmem>>, vector<1x32xf32>
    %c24 = arith.constant 24 : index
    %c0_26 = arith.constant 0 : index
    %19 = vector.load %arg8[%c24, %c0_26] : memref<32x32xf32, #tpu.memory_space<vmem>>, vector<1x32xf32>
    tpu.vector_store %arg8[%c24, %c0_26], %18 {strides = array<i32>} : memref<32x32xf32, #tpu.memory_space<vmem>>, vector<1x32xf32>,
    %c0_27 = arith.constant 0 : index
    %c0_28 = arith.constant 0 : index
    %20 = vector.load %arg3[%c0_27, %c0_28] : memref<4x32xf32, #tpu.memory_space<vmem>>, vector<4x32xf32>
    %c25 = arith.constant 25 : index
    %c0_29 = arith.constant 0 : index
    %21 = vector.load %arg8[%c25, %c0_29] : memref<32x32xf32, #tpu.memory_space<vmem>>, vector<4x32xf32>
    tpu.vector_store %arg8[%c25, %c0_29], %20 {strides = array<i32>} : memref<32x32xf32, #tpu.memory_space<vmem>>, vector<4x32xf32>,
    %c9_30 = arith.constant 9 : index
    %c0_31 = arith.constant 0 : index
    %22 = vector.load %arg4[%c9_30, %c0_31] : memref<12x32xf32, #tpu.memory_space<vmem>>, vector<3x32xf32>
    %c29 = arith.constant 29 : index
    %c0_32 = arith.constant 0 : index
    %23 = vector.load %arg8[%c29, %c0_32] : memref<32x32xf32, #tpu.memory_space<vmem>>, vector<3x32xf32>
    tpu.vector_store %arg8[%c29, %c0_32], %22 {strides = array<i32>} : memref<32x32xf32, #tpu.memory_space<vmem>>, vector<3x32xf32>,
    %c0_33 = arith.constant 0 : index
    %c0_34 = arith.constant 0 : index
    %24 = vector.load %arg8[%c0_33, %c0_34] : memref<32x32xf32, #tpu.memory_space<vmem>>, vector<32x32xf32>
    %c0_35 = arith.constant 0 : index
    %c0_36 = arith.constant 0 : index
    %25 = vector.load %arg5[%c0_35, %c0_36] : memref<42x128xf32, #tpu.memory_space<vmem>>, vector<32x32xf32>
    %26 = arith.addf %24, %25 : vector<32x32xf32>
    %27 = tpu.iota {dimensions = array<i32: 0>} : vector<32x32xi32>
    %28 = tpu.iota {dimensions = array<i32: 1>} : vector<32x32xi32>
    %c0_i32 = arith.constant 0 : i32
    %29 = vector.broadcast %c0_i32 : i32 to vector<32x32xi32>
    %30 = arith.cmpi sge, %27, %29 : vector<32x32xi32>
    %c8_i32 = arith.constant 8 : i32
    %31 = vector.broadcast %c8_i32 : i32 to vector<32x32xi32>
    %32 = arith.cmpi slt, %27, %31 : vector<32x32xi32>
    %33 = arith.andi %30, %32 : vector<32x32xi1>
    %c0_i32_37 = arith.constant 0 : i32
    %34 = vector.broadcast %c0_i32_37 : i32 to vector<32x32xi32>
    %35 = arith.cmpi sge, %28, %34 : vector<32x32xi32>
    %36 = arith.andi %33, %35 : vector<32x32xi1>
    %c8_i32_38 = arith.constant 8 : i32
    %37 = vector.broadcast %c8_i32_38 : i32 to vector<32x32xi32>
    %38 = arith.cmpi slt, %28, %37 : vector<32x32xi32>
    %39 = arith.andi %36, %38 : vector<32x32xi1>
    %c8_i32_39 = arith.constant 8 : i32
    %40 = vector.broadcast %c8_i32_39 : i32 to vector<32x32xi32>
    %41 = arith.cmpi sge, %27, %40 : vector<32x32xi32>
    %c16_i32 = arith.constant 16 : i32
    %42 = vector.broadcast %c16_i32 : i32 to vector<32x32xi32>
    %43 = arith.cmpi slt, %27, %42 : vector<32x32xi32>
    %44 = arith.andi %41, %43 : vector<32x32xi1>
    %c8_i32_40 = arith.constant 8 : i32
    %45 = vector.broadcast %c8_i32_40 : i32 to vector<32x32xi32>
    %46 = arith.cmpi sge, %28, %45 : vector<32x32xi32>
    %47 = arith.andi %44, %46 : vector<32x32xi1>
    %c16_i32_41 = arith.constant 16 : i32
    %48 = vector.broadcast %c16_i32_41 : i32 to vector<32x32xi32>
    %49 = arith.cmpi slt, %28, %48 : vector<32x32xi32>
    %50 = arith.andi %47, %49 : vector<32x32xi1>
    %51 = arith.ori %39, %50 : vector<32x32xi1>
    %c16_i32_42 = arith.constant 16 : i32
    %52 = vector.broadcast %c16_i32_42 : i32 to vector<32x32xi32>
    %53 = arith.cmpi sge, %27, %52 : vector<32x32xi32>
    %c24_i32 = arith.constant 24 : i32
    %54 = vector.broadcast %c24_i32 : i32 to vector<32x32xi32>
    %55 = arith.cmpi slt, %27, %54 : vector<32x32xi32>
    %56 = arith.andi %53, %55 : vector<32x32xi1>
    %c16_i32_43 = arith.constant 16 : i32
    %57 = vector.broadcast %c16_i32_43 : i32 to vector<32x32xi32>
    %58 = arith.cmpi sge, %28, %57 : vector<32x32xi32>
    %59 = arith.andi %56, %58 : vector<32x32xi1>
    %c24_i32_44 = arith.constant 24 : i32
    %60 = vector.broadcast %c24_i32_44 : i32 to vector<32x32xi32>
    %61 = arith.cmpi slt, %28, %60 : vector<32x32xi32>
    %62 = arith.andi %59, %61 : vector<32x32xi1>
    %63 = arith.ori %51, %62 : vector<32x32xi1>
    %c24_i32_45 = arith.constant 24 : i32
    %64 = vector.broadcast %c24_i32_45 : i32 to vector<32x32xi32>
    %65 = arith.cmpi sge, %27, %64 : vector<32x32xi32>
    %c32_i32 = arith.constant 32 : i32
    %66 = vector.broadcast %c32_i32 : i32 to vector<32x32xi32>
    %67 = arith.cmpi slt, %27, %66 : vector<32x32xi32>
    %68 = arith.andi %65, %67 : vector<32x32xi1>
    %c24_i32_46 = arith.constant 24 : i32
    %69 = vector.broadcast %c24_i32_46 : i32 to vector<32x32xi32>
    %70 = arith.cmpi sge, %28, %69 : vector<32x32xi32>
    %71 = arith.andi %68, %70 : vector<32x32xi1>
    %c32_i32_47 = arith.constant 32 : i32
    %72 = vector.broadcast %c32_i32_47 : i32 to vector<32x32xi32>
    %73 = arith.cmpi slt, %28, %72 : vector<32x32xi32>
    %74 = arith.andi %71, %73 : vector<32x32xi1>
    %75 = arith.ori %63, %74 : vector<32x32xi1>
    %76 = arith.cmpi sle, %28, %27 : vector<32x32xi32>
    %77 = arith.andi %75, %76 : vector<32x32xi1>
    %cst = arith.constant 0.000000e+00 : f32
    %cst_48 = arith.constant -1.000000e+09 : f32
    %78 = vector.broadcast %cst : f32 to vector<32x32xf32>
    %79 = vector.broadcast %cst_48 : f32 to vector<32x32xf32>
    %80 = arith.select %77, %78, %79 : vector<32x32xi1>, vector<32x32xf32>
    %c32 = arith.constant 32 : index
    %c0_49 = arith.constant 0 : index
    %81 = vector.load %arg5[%c32, %c0_49] : memref<42x128xf32, #tpu.memory_space<vmem>>, vector<1x32xf32>
    %c33 = arith.constant 33 : index
    %c0_50 = arith.constant 0 : index
    %82 = vector.load %arg5[%c33, %c0_50] : memref<42x128xf32, #tpu.memory_space<vmem>>, vector<1x32xf32>
    %cst_51 = arith.constant dense<0.000000e+00> : vector<32xf32>
    %83 = vector.multi_reduction <add>, %26, %cst_51 [1] : vector<32x32xf32> to vector<32xf32>
    %84 = vector.shape_cast %83 : vector<32xf32> to vector<32x1xf32>
    %cst_52 = arith.constant 3.200000e+01 : f32
    %85 = vector.broadcast %cst_52 : f32 to vector<32x1xf32>
    %86 = arith.divf %84, %85 : vector<32x1xf32>
    %87 = vector.broadcast %86 : vector<32x1xf32> to vector<32x32xf32>
    %88 = arith.subf %26, %87 : vector<32x32xf32>
    %89 = arith.mulf %88, %88 : vector<32x32xf32>
    %cst_53 = arith.constant dense<0.000000e+00> : vector<32xf32>
    %90 = vector.multi_reduction <add>, %89, %cst_53 [1] : vector<32x32xf32> to vector<32xf32>
    %91 = vector.shape_cast %90 : vector<32xf32> to vector<32x1xf32>
    %cst_54 = arith.constant 3.200000e+01 : f32
    %92 = vector.broadcast %cst_54 : f32 to vector<32x1xf32>
    %93 = arith.divf %91, %92 : vector<32x1xf32>
    %94 = vector.broadcast %86 : vector<32x1xf32> to vector<32x32xf32>
    %95 = arith.subf %26, %94 : vector<32x32xf32>
    %cst_55 = arith.constant 9.99999974E-6 : f32
    %96 = vector.broadcast %cst_55 : f32 to vector<32x1xf32>
    %97 = arith.addf %93, %96 : vector<32x1xf32>
    %98 = math.rsqrt %97 : vector<32x1xf32>
    %99 = vector.broadcast %98 : vector<32x1xf32> to vector<32x32xf32>
    %100 = arith.mulf %95, %99 : vector<32x32xf32>
    %101 = vector.broadcast %81 : vector<1x32xf32> to vector<32x32xf32>
    %102 = arith.mulf %100, %101 : vector<32x32xf32>
    %103 = vector.broadcast %82 : vector<1x32xf32> to vector<32x32xf32>
    %104 = arith.addf %102, %103 : vector<32x32xf32>
    %105 = arith.truncf %104 : vector<32x32xf32> to vector<32x32xbf16>
    %c0_56 = arith.constant 0 : index
    %c0_57 = arith.constant 0 : index
    %106 = vector.load %arg6[%c0_56, %c0_57] : memref<256x128xbf16, #tpu.memory_space<vmem>>, vector<32x96xbf16>
    %cst_58 = arith.constant dense<0.000000e+00> : vector<32x96xf32>
    %107 = tpu.matmul %105, %106, %cst_58 {dimension_numbers = #tpu.dot_dimension_numbers<[1], [0], [0], [1], [0, 0, 1, 1], [], []>} : vector<32x32xbf16>, vector<32x96xbf16>, vector<32x96xf32> -> vector<32x96xf32>
    %c34 = arith.constant 34 : index
    %c0_59 = arith.constant 0 : index
    %108 = vector.load %arg5[%c34, %c0_59] : memref<42x128xf32, #tpu.memory_space<vmem>>, vector<1x96xf32>
    %109 = vector.broadcast %108 : vector<1x96xf32> to vector<32x96xf32>
    %110 = arith.addf %107, %109 : vector<32x96xf32>
    %111 = vector.extract_strided_slice %110 {offsets = [0, 0], sizes = [32, 32], strides = [1, 1]} : vector<32x96xf32> to vector<32x32xf32>
    %112 = vector.extract_strided_slice %110 {offsets = [0, 32], sizes = [32, 32], strides = [1, 1]} : vector<32x96xf32> to vector<32x32xf32>
    %113 = vector.extract_strided_slice %110 {offsets = [0, 64], sizes = [32, 32], strides = [1, 1]} : vector<32x96xf32> to vector<32x32xf32>
    %114 = vector.extract_strided_slice %111 {offsets = [0, 0], sizes = [32, 8], strides = [1, 1]} : vector<32x32xf32> to vector<32x8xf32>
    %115 = vector.extract_strided_slice %112 {offsets = [0, 0], sizes = [32, 8], strides = [1, 1]} : vector<32x32xf32> to vector<32x8xf32>
    %116 = vector.extract_strided_slice %113 {offsets = [0, 0], sizes = [32, 8], strides = [1, 1]} : vector<32x32xf32> to vector<32x8xf32>
    %cst_60 = arith.constant dense<0.000000e+00> : vector<32x32xf32>
    %117 = tpu.matmul %114, %115, %cst_60 {dimension_numbers = #tpu.dot_dimension_numbers<[1], [1], [0], [0], [0, 0, 1, 0], [], []>} : vector<32x8xf32>, vector<32x8xf32>, vector<32x32xf32> -> vector<32x32xf32>
    %cst_61 = arith.constant 0.353553385 : f32
    %118 = vector.broadcast %cst_61 : f32 to vector<32x32xf32>
    %119 = arith.mulf %117, %118 : vector<32x32xf32>
    %120 = arith.addf %119, %80 : vector<32x32xf32>
    %cst_62 = arith.constant dense<0xFF800000> : vector<32xf32>
    %121 = vector.multi_reduction <maximumf>, %120, %cst_62 [1] : vector<32x32xf32> to vector<32xf32>
    %122 = vector.shape_cast %121 : vector<32xf32> to vector<32x1xf32>
    %123 = vector.broadcast %122 : vector<32x1xf32> to vector<32x32xf32>
    %124 = arith.subf %120, %123 : vector<32x32xf32>
    %125 = math.exp %124 : vector<32x32xf32>
    %cst_63 = arith.constant dense<0.000000e+00> : vector<32xf32>
    %126 = vector.multi_reduction <add>, %125, %cst_63 [1] : vector<32x32xf32> to vector<32xf32>
    %127 = vector.shape_cast %126 : vector<32xf32> to vector<32x1xf32>
    %128 = tpu.reciprocal %127 : vector<32x1xf32> -> vector<32x1xf32>
    %129 = vector.broadcast %128 : vector<32x1xf32> to vector<32x32xf32>
    %130 = arith.mulf %125, %129 : vector<32x32xf32>
    %131 = arith.truncf %130 : vector<32x32xf32> to vector<32x32xbf16>
    %132 = arith.truncf %116 : vector<32x8xf32> to vector<32x8xbf16>
    %cst_64 = arith.constant dense<0.000000e+00> : vector<32x8xf32>
    %133 = tpu.matmul %131, %132, %cst_64 {dimension_numbers = #tpu.dot_dimension_numbers<[1], [0], [0], [1], [0, 0, 1, 1], [], []>} : vector<32x32xbf16>, vector<32x8xbf16>, vector<32x8xf32> -> vector<32x8xf32>
    %134 = vector.extract_strided_slice %111 {offsets = [0, 8], sizes = [32, 8], strides = [1, 1]} : vector<32x32xf32> to vector<32x8xf32>
    %135 = vector.extract_strided_slice %112 {offsets = [0, 8], sizes = [32, 8], strides = [1, 1]} : vector<32x32xf32> to vector<32x8xf32>
    %136 = vector.extract_strided_slice %113 {offsets = [0, 8], sizes = [32, 8], strides = [1, 1]} : vector<32x32xf32> to vector<32x8xf32>
    %cst_65 = arith.constant dense<0.000000e+00> : vector<32x32xf32>
    %137 = tpu.matmul %134, %135, %cst_65 {dimension_numbers = #tpu.dot_dimension_numbers<[1], [1], [0], [0], [0, 0, 1, 0], [], []>} : vector<32x8xf32>, vector<32x8xf32>, vector<32x32xf32> -> vector<32x32xf32>
    %cst_66 = arith.constant 0.353553385 : f32
    %138 = vector.broadcast %cst_66 : f32 to vector<32x32xf32>
    %139 = arith.mulf %137, %138 : vector<32x32xf32>
    %140 = arith.addf %139, %80 : vector<32x32xf32>
    %cst_67 = arith.constant dense<0xFF800000> : vector<32xf32>
    %141 = vector.multi_reduction <maximumf>, %140, %cst_67 [1] : vector<32x32xf32> to vector<32xf32>
    %142 = vector.shape_cast %141 : vector<32xf32> to vector<32x1xf32>
    %143 = vector.broadcast %142 : vector<32x1xf32> to vector<32x32xf32>
    %144 = arith.subf %140, %143 : vector<32x32xf32>
    %145 = math.exp %144 : vector<32x32xf32>
    %cst_68 = arith.constant dense<0.000000e+00> : vector<32xf32>
    %146 = vector.multi_reduction <add>, %145, %cst_68 [1] : vector<32x32xf32> to vector<32xf32>
    %147 = vector.shape_cast %146 : vector<32xf32> to vector<32x1xf32>
    %148 = tpu.reciprocal %147 : vector<32x1xf32> -> vector<32x1xf32>
    %149 = vector.broadcast %148 : vector<32x1xf32> to vector<32x32xf32>
    %150 = arith.mulf %145, %149 : vector<32x32xf32>
    %151 = arith.truncf %150 : vector<32x32xf32> to vector<32x32xbf16>
    %152 = arith.truncf %136 : vector<32x8xf32> to vector<32x8xbf16>
    %cst_69 = arith.constant dense<0.000000e+00> : vector<32x8xf32>
    %153 = tpu.matmul %151, %152, %cst_69 {dimension_numbers = #tpu.dot_dimension_numbers<[1], [0], [0], [1], [0, 0, 1, 1], [], []>} : vector<32x32xbf16>, vector<32x8xbf16>, vector<32x8xf32> -> vector<32x8xf32>
    %154 = vector.extract_strided_slice %111 {offsets = [0, 16], sizes = [32, 8], strides = [1, 1]} : vector<32x32xf32> to vector<32x8xf32>
    %155 = vector.extract_strided_slice %112 {offsets = [0, 16], sizes = [32, 8], strides = [1, 1]} : vector<32x32xf32> to vector<32x8xf32>
    %156 = vector.extract_strided_slice %113 {offsets = [0, 16], sizes = [32, 8], strides = [1, 1]} : vector<32x32xf32> to vector<32x8xf32>
    %cst_70 = arith.constant dense<0.000000e+00> : vector<32x32xf32>
    %157 = tpu.matmul %154, %155, %cst_70 {dimension_numbers = #tpu.dot_dimension_numbers<[1], [1], [0], [0], [0, 0, 1, 0], [], []>} : vector<32x8xf32>, vector<32x8xf32>, vector<32x32xf32> -> vector<32x32xf32>
    %cst_71 = arith.constant 0.353553385 : f32
    %158 = vector.broadcast %cst_71 : f32 to vector<32x32xf32>
    %159 = arith.mulf %157, %158 : vector<32x32xf32>
    %160 = arith.addf %159, %80 : vector<32x32xf32>
    %cst_72 = arith.constant dense<0xFF800000> : vector<32xf32>
    %161 = vector.multi_reduction <maximumf>, %160, %cst_72 [1] : vector<32x32xf32> to vector<32xf32>
    %162 = vector.shape_cast %161 : vector<32xf32> to vector<32x1xf32>
    %163 = vector.broadcast %162 : vector<32x1xf32> to vector<32x32xf32>
    %164 = arith.subf %160, %163 : vector<32x32xf32>
    %165 = math.exp %164 : vector<32x32xf32>
    %cst_73 = arith.constant dense<0.000000e+00> : vector<32xf32>
    %166 = vector.multi_reduction <add>, %165, %cst_73 [1] : vector<32x32xf32> to vector<32xf32>
    %167 = vector.shape_cast %166 : vector<32xf32> to vector<32x1xf32>
    %168 = tpu.reciprocal %167 : vector<32x1xf32> -> vector<32x1xf32>
    %169 = vector.broadcast %168 : vector<32x1xf32> to vector<32x32xf32>
    %170 = arith.mulf %165, %169 : vector<32x32xf32>
    %171 = arith.truncf %170 : vector<32x32xf32> to vector<32x32xbf16>
    %172 = arith.truncf %156 : vector<32x8xf32> to vector<32x8xbf16>
    %cst_74 = arith.constant dense<0.000000e+00> : vector<32x8xf32>
    %173 = tpu.matmul %171, %172, %cst_74 {dimension_numbers = #tpu.dot_dimension_numbers<[1], [0], [0], [1], [0, 0, 1, 1], [], []>} : vector<32x32xbf16>, vector<32x8xbf16>, vector<32x8xf32> -> vector<32x8xf32>
    %174 = vector.extract_strided_slice %111 {offsets = [0, 24], sizes = [32, 8], strides = [1, 1]} : vector<32x32xf32> to vector<32x8xf32>
    %175 = vector.extract_strided_slice %112 {offsets = [0, 24], sizes = [32, 8], strides = [1, 1]} : vector<32x32xf32> to vector<32x8xf32>
    %176 = vector.extract_strided_slice %113 {offsets = [0, 24], sizes = [32, 8], strides = [1, 1]} : vector<32x32xf32> to vector<32x8xf32>
    %cst_75 = arith.constant dense<0.000000e+00> : vector<32x32xf32>
    %177 = tpu.matmul %174, %175, %cst_75 {dimension_numbers = #tpu.dot_dimension_numbers<[1], [1], [0], [0], [0, 0, 1, 0], [], []>} : vector<32x8xf32>, vector<32x8xf32>, vector<32x32xf32> -> vector<32x32xf32>
    %cst_76 = arith.constant 0.353553385 : f32
    %178 = vector.broadcast %cst_76 : f32 to vector<32x32xf32>
    %179 = arith.mulf %177, %178 : vector<32x32xf32>
    %180 = arith.addf %179, %80 : vector<32x32xf32>
    %cst_77 = arith.constant dense<0xFF800000> : vector<32xf32>
    %181 = vector.multi_reduction <maximumf>, %180, %cst_77 [1] : vector<32x32xf32> to vector<32xf32>
    %182 = vector.shape_cast %181 : vector<32xf32> to vector<32x1xf32>
    %183 = vector.broadcast %182 : vector<32x1xf32> to vector<32x32xf32>
    %184 = arith.subf %180, %183 : vector<32x32xf32>
    %185 = math.exp %184 : vector<32x32xf32>
    %cst_78 = arith.constant dense<0.000000e+00> : vector<32xf32>
    %186 = vector.multi_reduction <add>, %185, %cst_78 [1] : vector<32x32xf32> to vector<32xf32>
    %187 = vector.shape_cast %186 : vector<32xf32> to vector<32x1xf32>
    %188 = tpu.reciprocal %187 : vector<32x1xf32> -> vector<32x1xf32>
    %189 = vector.broadcast %188 : vector<32x1xf32> to vector<32x32xf32>
    %190 = arith.mulf %185, %189 : vector<32x32xf32>
    %191 = arith.truncf %190 : vector<32x32xf32> to vector<32x32xbf16>
    %192 = arith.truncf %176 : vector<32x8xf32> to vector<32x8xbf16>
    %cst_79 = arith.constant dense<0.000000e+00> : vector<32x8xf32>
    %193 = tpu.matmul %191, %192, %cst_79 {dimension_numbers = #tpu.dot_dimension_numbers<[1], [0], [0], [1], [0, 0, 1, 1], [], []>} : vector<32x32xbf16>, vector<32x8xbf16>, vector<32x8xf32> -> vector<32x8xf32>
    %194 = tpu.concatenate %133, %153, %173, %193 in 1 : vector<32x8xf32>, vector<32x8xf32>, vector<32x8xf32>, vector<32x8xf32> -> vector<32x32xf32>
    %195 = arith.truncf %194 : vector<32x32xf32> to vector<32x32xbf16>
    %c32_80 = arith.constant 32 : index
    %c0_81 = arith.constant 0 : index
    %196 = vector.load %arg6[%c32_80, %c0_81] : memref<256x128xbf16, #tpu.memory_space<vmem>>, vector<32x32xbf16>
    %cst_82 = arith.constant dense<0.000000e+00> : vector<32x32xf32>
    %197 = tpu.matmul %195, %196, %cst_82 {dimension_numbers = #tpu.dot_dimension_numbers<[1], [0], [0], [1], [0, 0, 1, 1], [], []>} : vector<32x32xbf16>, vector<32x32xbf16>, vector<32x32xf32> -> vector<32x32xf32>
    %198 = arith.addf %26, %197 : vector<32x32xf32>
    %c35 = arith.constant 35 : index
    %c0_83 = arith.constant 0 : index
    %199 = vector.load %arg5[%c35, %c0_83] : memref<42x128xf32, #tpu.memory_space<vmem>>, vector<1x32xf32>
    %200 = vector.broadcast %199 : vector<1x32xf32> to vector<32x32xf32>
    %201 = arith.addf %198, %200 : vector<32x32xf32>
    %c36 = arith.constant 36 : index
    %c0_84 = arith.constant 0 : index
    %202 = vector.load %arg5[%c36, %c0_84] : memref<42x128xf32, #tpu.memory_space<vmem>>, vector<1x32xf32>
    %c37 = arith.constant 37 : index
    %c0_85 = arith.constant 0 : index
    %203 = vector.load %arg5[%c37, %c0_85] : memref<42x128xf32, #tpu.memory_space<vmem>>, vector<1x32xf32>
    %cst_86 = arith.constant dense<0.000000e+00> : vector<32xf32>
    %204 = vector.multi_reduction <add>, %201, %cst_86 [1] : vector<32x32xf32> to vector<32xf32>
    %205 = vector.shape_cast %204 : vector<32xf32> to vector<32x1xf32>
    %cst_87 = arith.constant 3.200000e+01 : f32
    %206 = vector.broadcast %cst_87 : f32 to vector<32x1xf32>
    %207 = arith.divf %205, %206 : vector<32x1xf32>
    %208 = vector.broadcast %207 : vector<32x1xf32> to vector<32x32xf32>
    %209 = arith.subf %201, %208 : vector<32x32xf32>
    %210 = arith.mulf %209, %209 : vector<32x32xf32>
    %cst_88 = arith.constant dense<0.000000e+00> : vector<32xf32>
    %211 = vector.multi_reduction <add>, %210, %cst_88 [1] : vector<32x32xf32> to vector<32xf32>
    %212 = vector.shape_cast %211 : vector<32xf32> to vector<32x1xf32>
    %cst_89 = arith.constant 3.200000e+01 : f32
    %213 = vector.broadcast %cst_89 : f32 to vector<32x1xf32>
    %214 = arith.divf %212, %213 : vector<32x1xf32>
    %215 = vector.broadcast %207 : vector<32x1xf32> to vector<32x32xf32>
    %216 = arith.subf %201, %215 : vector<32x32xf32>
    %cst_90 = arith.constant 9.99999974E-6 : f32
    %217 = vector.broadcast %cst_90 : f32 to vector<32x1xf32>
    %218 = arith.addf %214, %217 : vector<32x1xf32>
    %219 = math.rsqrt %218 : vector<32x1xf32>
    %220 = vector.broadcast %219 : vector<32x1xf32> to vector<32x32xf32>
    %221 = arith.mulf %216, %220 : vector<32x32xf32>
    %222 = vector.broadcast %202 : vector<1x32xf32> to vector<32x32xf32>
    %223 = arith.mulf %221, %222 : vector<32x32xf32>
    %224 = vector.broadcast %203 : vector<1x32xf32> to vector<32x32xf32>
    %225 = arith.addf %223, %224 : vector<32x32xf32>
    %226 = arith.truncf %225 : vector<32x32xf32> to vector<32x32xbf16>
    %c64 = arith.constant 64 : index
    %c0_91 = arith.constant 0 : index
    %227 = vector.load %arg6[%c64, %c0_91] : memref<256x128xbf16, #tpu.memory_space<vmem>>, vector<32x128xbf16>
    %cst_92 = arith.constant dense<0.000000e+00> : vector<32x128xf32>
    %228 = tpu.matmul %226, %227, %cst_92 {dimension_numbers = #tpu.dot_dimension_numbers<[1], [0], [0], [1], [0, 0, 1, 1], [], []>} : vector<32x32xbf16>, vector<32x128xbf16>, vector<32x128xf32> -> vector<32x128xf32>
    %c38 = arith.constant 38 : index
    %c0_93 = arith.constant 0 : index
    %229 = vector.load %arg5[%c38, %c0_93] : memref<42x128xf32, #tpu.memory_space<vmem>>, vector<1x128xf32>
    %230 = vector.broadcast %229 : vector<1x128xf32> to vector<32x128xf32>
    %231 = arith.addf %228, %230 : vector<32x128xf32>
    %cst_94 = arith.constant 1.702000e+00 : f32
    %232 = vector.broadcast %cst_94 : f32 to vector<32x128xf32>
    %233 = arith.mulf %232, %231 : vector<32x128xf32>
    %234 = arith.negf %233 : vector<32x128xf32>
    %235 = math.exp %234 : vector<32x128xf32>
    %cst_95 = arith.constant 1.000000e+00 : f32
    %236 = vector.broadcast %cst_95 : f32 to vector<32x128xf32>
    %237 = arith.addf %236, %235 : vector<32x128xf32>
    %238 = arith.divf %236, %237 : vector<32x128xf32>
    %239 = arith.mulf %231, %238 : vector<32x128xf32>
    %240 = arith.truncf %239 : vector<32x128xf32> to vector<32x128xbf16>
    %c96 = arith.constant 96 : index
    %c0_96 = arith.constant 0 : index
    %241 = vector.load %arg6[%c96, %c0_96] : memref<256x128xbf16, #tpu.memory_space<vmem>>, vector<128x32xbf16>
    %cst_97 = arith.constant dense<0.000000e+00> : vector<32x32xf32>
    %242 = tpu.matmul %240, %241, %cst_97 {dimension_numbers = #tpu.dot_dimension_numbers<[1], [0], [0], [1], [0, 0, 1, 1], [], []>} : vector<32x128xbf16>, vector<128x32xbf16>, vector<32x32xf32> -> vector<32x32xf32>
    %c39 = arith.constant 39 : index
    %c0_98 = arith.constant 0 : index
    %243 = vector.load %arg5[%c39, %c0_98] : memref<42x128xf32, #tpu.memory_space<vmem>>, vector<1x32xf32>
    %244 = vector.broadcast %243 : vector<1x32xf32> to vector<32x32xf32>
    %245 = arith.addf %242, %244 : vector<32x32xf32>
    %246 = arith.addf %201, %245 : vector<32x32xf32>
    %c40 = arith.constant 40 : index
    %c0_99 = arith.constant 0 : index
    %247 = vector.load %arg5[%c40, %c0_99] : memref<42x128xf32, #tpu.memory_space<vmem>>, vector<1x32xf32>
    %c41 = arith.constant 41 : index
    %c0_100 = arith.constant 0 : index
    %248 = vector.load %arg5[%c41, %c0_100] : memref<42x128xf32, #tpu.memory_space<vmem>>, vector<1x32xf32>
    %cst_101 = arith.constant dense<0.000000e+00> : vector<32xf32>
    %249 = vector.multi_reduction <add>, %246, %cst_101 [1] : vector<32x32xf32> to vector<32xf32>
    %250 = vector.shape_cast %249 : vector<32xf32> to vector<32x1xf32>
    %cst_102 = arith.constant 3.200000e+01 : f32
    %251 = vector.broadcast %cst_102 : f32 to vector<32x1xf32>
    %252 = arith.divf %250, %251 : vector<32x1xf32>
    %253 = vector.broadcast %252 : vector<32x1xf32> to vector<32x32xf32>
    %254 = arith.subf %246, %253 : vector<32x32xf32>
    %255 = arith.mulf %254, %254 : vector<32x32xf32>
    %cst_103 = arith.constant dense<0.000000e+00> : vector<32xf32>
    %256 = vector.multi_reduction <add>, %255, %cst_103 [1] : vector<32x32xf32> to vector<32xf32>
    %257 = vector.shape_cast %256 : vector<32xf32> to vector<32x1xf32>
    %cst_104 = arith.constant 3.200000e+01 : f32
    %258 = vector.broadcast %cst_104 : f32 to vector<32x1xf32>
    %259 = arith.divf %257, %258 : vector<32x1xf32>
    %260 = vector.broadcast %252 : vector<32x1xf32> to vector<32x32xf32>
    %261 = arith.subf %246, %260 : vector<32x32xf32>
    %cst_105 = arith.constant 9.99999974E-6 : f32
    %262 = vector.broadcast %cst_105 : f32 to vector<32x1xf32>
    %263 = arith.addf %259, %262 : vector<32x1xf32>
    %264 = math.rsqrt %263 : vector<32x1xf32>
    %265 = vector.broadcast %264 : vector<32x1xf32> to vector<32x32xf32>
    %266 = arith.mulf %261, %265 : vector<32x32xf32>
    %267 = vector.broadcast %247 : vector<1x32xf32> to vector<32x32xf32>
    %268 = arith.mulf %266, %267 : vector<32x32xf32>
    %269 = vector.broadcast %248 : vector<1x32xf32> to vector<32x32xf32>
    %270 = arith.addf %268, %269 : vector<32x32xf32>
    %c0_106 = arith.constant 0 : index
    %c0_107 = arith.constant 0 : index
    %271 = vector.load %arg8[%c0_106, %c0_107] : memref<32x32xf32, #tpu.memory_space<vmem>>, vector<32x32xf32>
    tpu.vector_store %arg8[%c0_106, %c0_107], %270 {strides = array<i32>} : memref<32x32xf32, #tpu.memory_space<vmem>>, vector<32x32xf32>,
    %c0_108 = arith.constant 0 : index
    %272 = memref.load %arg1[%c0_108] : memref<4xi32, #tpu.memory_space<smem>>
    %c0_i32_109 = arith.constant 0 : i32
    %273 = arith.addi %c0_i32_109, %272 : i32
    %274 = arith.index_cast %273 : i32 to index
    %c0_110 = arith.constant 0 : index
    %275 = vector.load %arg8[%274, %c0_110] : memref<32x32xf32, #tpu.memory_space<vmem>>, vector<1x32xf32>
    %c1_111 = arith.constant 1 : index
    %276 = memref.load %arg1[%c1_111] : memref<4xi32, #tpu.memory_space<smem>>
    %c8_i32_112 = arith.constant 8 : i32
    %277 = arith.addi %c8_i32_112, %276 : i32
    %278 = arith.index_cast %277 : i32 to index
    %c0_113 = arith.constant 0 : index
    %279 = vector.load %arg8[%278, %c0_113] : memref<32x32xf32, #tpu.memory_space<vmem>>, vector<1x32xf32>
    %c2_114 = arith.constant 2 : index
    %280 = memref.load %arg1[%c2_114] : memref<4xi32, #tpu.memory_space<smem>>
    %c16_i32_115 = arith.constant 16 : i32
    %281 = arith.addi %c16_i32_115, %280 : i32
    %282 = arith.index_cast %281 : i32 to index
    %c0_116 = arith.constant 0 : index
    %283 = vector.load %arg8[%282, %c0_116] : memref<32x32xf32, #tpu.memory_space<vmem>>, vector<1x32xf32>
    %c3_117 = arith.constant 3 : index
    %284 = memref.load %arg1[%c3_117] : memref<4xi32, #tpu.memory_space<smem>>
    %c24_i32_118 = arith.constant 24 : i32
    %285 = arith.addi %c24_i32_118, %284 : i32
    %286 = arith.index_cast %285 : i32 to index
    %c0_119 = arith.constant 0 : index
    %287 = vector.load %arg8[%286, %c0_119] : memref<32x32xf32, #tpu.memory_space<vmem>>, vector<1x32xf32>
    %288 = tpu.concatenate %275, %279, %283, %287 in 0 : vector<1x32xf32>, vector<1x32xf32>, vector<1x32xf32>, vector<1x32xf32> -> vector<4x32xf32>
    %289 = arith.truncf %288 : vector<4x32xf32> to vector<4x32xbf16>
    %c224 = arith.constant 224 : index
    %c0_120 = arith.constant 0 : index
    %290 = vector.load %arg6[%c224, %c0_120] : memref<256x128xbf16, #tpu.memory_space<vmem>>, vector<32x32xbf16>
    %cst_121 = arith.constant dense<0.000000e+00> : vector<4x32xf32>
    %291 = tpu.matmul %289, %290, %cst_121 {dimension_numbers = #tpu.dot_dimension_numbers<[1], [0], [0], [1], [0, 0, 1, 1], [], []>} : vector<4x32xbf16>, vector<32x32xbf16>, vector<4x32xf32> -> vector<4x32xf32>
    %292 = arith.mulf %291, %291 : vector<4x32xf32>
    %cst_122 = arith.constant dense<0.000000e+00> : vector<4xf32>
    %293 = vector.multi_reduction <add>, %292, %cst_122 [1] : vector<4x32xf32> to vector<4xf32>
    %294 = vector.shape_cast %293 : vector<4xf32> to vector<4x1xf32>
    %cst_123 = arith.constant 9.99999996E-13 : f32
    %295 = vector.broadcast %cst_123 : f32 to vector<4x1xf32>
    %296 = arith.addf %294, %295 : vector<4x1xf32>
    %297 = math.rsqrt %296 : vector<4x1xf32>
    %298 = vector.broadcast %297 : vector<4x1xf32> to vector<4x32xf32>
    %299 = arith.mulf %291, %298 : vector<4x32xf32>
    %c0_124 = arith.constant 0 : index
    %c0_125 = arith.constant 0 : index
    %300 = vector.load %arg7[%c0_124, %c0_125] : memref<4x32xf32, #tpu.memory_space<vmem>>, vector<4x32xf32>
    tpu.vector_store %arg7[%c0_124, %c0_125], %299 {strides = array<i32>} : memref<4x32xf32, #tpu.memory_space<vmem>>, vector<4x32xf32>,
    return
  }
  func.func @transform_0(%arg0: i32) -> i32 {
    %c0_i32 = arith.constant 0 : i32
    %c0_i32_0 = arith.constant 0 : i32
    return %c0_i32 : i32
  }
  func.func @transform_1(%arg0: i32) -> (i32, i32) {
    %c0_i32 = arith.constant 0 : i32
    %c0_i32_0 = arith.constant 0 : i32
    %c0_i32_1 = arith.constant 0 : i32
    return %c0_i32, %c0_i32_0 : i32, i32
  }
  func.func @transform_2(%arg0: i32) -> (i32, i32) {
    %c0_i32 = arith.constant 0 : i32
    %c0_i32_0 = arith.constant 0 : i32
    %c0_i32_1 = arith.constant 0 : i32
    return %c0_i32, %c0_i32_0 : i32, i32
  }
  func.func @transform_3(%arg0: i32) -> (i32, i32) {
    %c0_i32 = arith.constant 0 : i32
    %c0_i32_0 = arith.constant 0 : i32
    %c0_i32_1 = arith.constant 0 : i32
    return %c0_i32, %c0_i32_0 : i32, i32
  }
  func.func @transform_4(%arg0: i32) -> (i32, i32) {
    %c0_i32 = arith.constant 0 : i32
    %c0_i32_0 = arith.constant 0 : i32
    %c0_i32_1 = arith.constant 0 : i32
    return %c0_i32, %c0_i32_0 : i32, i32
  }
  func.func @transform_5(%arg0: i32) -> (i32, i32) {
    %c0_i32 = arith.constant 0 : i32
    %c0_i32_0 = arith.constant 0 : i32
    %c0_i32_1 = arith.constant 0 : i32
    return %c0_i32, %c0_i32_0 : i32, i32
  }
  func.func @transform_6(%arg0: i32) -> (i32, i32) {
    %c0_i32 = arith.constant 0 : i32
    %c0_i32_0 = arith.constant 0 : i32
    %c0_i32_1 = arith.constant 0 : i32
    return %c0_i32, %c0_i32_0 : i32, i32
  }
}

module attributes {stable_mosaic.version = 11 : i64} {
  func.func @kernel(%arg0: i32, %arg1: memref<34x48xf32, #tpu.memory_space<vmem>>, %arg2: memref<50x128xf32, #tpu.memory_space<vmem>>, %arg3: memref<368x128xbf16, #tpu.memory_space<vmem>>, %arg4: memref<2x32xf32, #tpu.memory_space<vmem>>, %arg5: memref<2x17xf32, #tpu.memory_space<vmem>>, %arg6: memref<34x32xf32, #tpu.memory_space<vmem>>) attributes {dimension_semantics = [#tpu.dimension_semantics<arbitrary>], iteration_bounds = array<i64: 1>, scalar_prefetch = 0 : i64, scratch_operands = 0 : i64, tpu.core_type = #tpu.core_type<tc>, window_params = [{pipeline_mode = #tpu.pipeline_mode<synchronous>, transform_indices = @transform_0, window_bounds = array<i64: 34, 48>}, {pipeline_mode = #tpu.pipeline_mode<synchronous>, transform_indices = @transform_1, window_bounds = array<i64: 50, 128>}, {pipeline_mode = #tpu.pipeline_mode<synchronous>, transform_indices = @transform_2, window_bounds = array<i64: 368, 128>}, {pipeline_mode = #tpu.pipeline_mode<synchronous>, transform_indices = @transform_3, window_bounds = array<i64: 2, 32>}, {pipeline_mode = #tpu.pipeline_mode<synchronous>, transform_indices = @transform_4, window_bounds = array<i64: 2, 17>}, {pipeline_mode = #tpu.pipeline_mode<synchronous>, transform_indices = @transform_5, window_bounds = array<i64: 34, 32>}]} {
    %c0 = arith.constant 0 : index
    %c0_0 = arith.constant 0 : index
    %0 = vector.load %arg1[%c0, %c0_0] : memref<34x48xf32, #tpu.memory_space<vmem>>, vector<34x48xf32>
    %1 = arith.truncf %0 : vector<34x48xf32> to vector<34x48xbf16>
    %c256 = arith.constant 256 : index
    %c0_1 = arith.constant 0 : index
    %2 = vector.load %arg3[%c256, %c0_1] : memref<368x128xbf16, #tpu.memory_space<vmem>>, vector<48x32xbf16>
    %cst = arith.constant dense<0.000000e+00> : vector<34x32xf32>
    %3 = tpu.matmul %1, %2, %cst {dimension_numbers = #tpu.dot_dimension_numbers<[1], [0], [0], [1], [0, 0, 1, 1], [], []>} : vector<34x48xbf16>, vector<48x32xbf16>, vector<34x32xf32> -> vector<34x32xf32>
    %c0_2 = arith.constant 0 : index
    %c0_3 = arith.constant 0 : index
    %4 = vector.load %arg2[%c0_2, %c0_3] : memref<50x128xf32, #tpu.memory_space<vmem>>, vector<34x32xf32>
    %5 = arith.addf %3, %4 : vector<34x32xf32>
    %c34 = arith.constant 34 : index
    %c0_4 = arith.constant 0 : index
    %6 = vector.load %arg2[%c34, %c0_4] : memref<50x128xf32, #tpu.memory_space<vmem>>, vector<1x32xf32>
    %c35 = arith.constant 35 : index
    %c0_5 = arith.constant 0 : index
    %7 = vector.load %arg2[%c35, %c0_5] : memref<50x128xf32, #tpu.memory_space<vmem>>, vector<1x32xf32>
    %cst_6 = arith.constant dense<0.000000e+00> : vector<34xf32>
    %8 = vector.multi_reduction <add>, %5, %cst_6 [1] : vector<34x32xf32> to vector<34xf32>
    %9 = vector.shape_cast %8 : vector<34xf32> to vector<34x1xf32>
    %cst_7 = arith.constant 3.200000e+01 : f32
    %10 = vector.broadcast %cst_7 : f32 to vector<34x1xf32>
    %11 = arith.divf %9, %10 : vector<34x1xf32>
    %12 = vector.broadcast %11 : vector<34x1xf32> to vector<34x32xf32>
    %13 = arith.subf %5, %12 : vector<34x32xf32>
    %14 = arith.mulf %13, %13 : vector<34x32xf32>
    %cst_8 = arith.constant dense<0.000000e+00> : vector<34xf32>
    %15 = vector.multi_reduction <add>, %14, %cst_8 [1] : vector<34x32xf32> to vector<34xf32>
    %16 = vector.shape_cast %15 : vector<34xf32> to vector<34x1xf32>
    %cst_9 = arith.constant 3.200000e+01 : f32
    %17 = vector.broadcast %cst_9 : f32 to vector<34x1xf32>
    %18 = arith.divf %16, %17 : vector<34x1xf32>
    %19 = vector.broadcast %11 : vector<34x1xf32> to vector<34x32xf32>
    %20 = arith.subf %5, %19 : vector<34x32xf32>
    %cst_10 = arith.constant 9.99999974E-6 : f32
    %21 = vector.broadcast %cst_10 : f32 to vector<34x1xf32>
    %22 = arith.addf %18, %21 : vector<34x1xf32>
    %23 = math.rsqrt %22 : vector<34x1xf32>
    %24 = vector.broadcast %23 : vector<34x1xf32> to vector<34x32xf32>
    %25 = arith.mulf %20, %24 : vector<34x32xf32>
    %26 = vector.broadcast %6 : vector<1x32xf32> to vector<34x32xf32>
    %27 = arith.mulf %25, %26 : vector<34x32xf32>
    %28 = vector.broadcast %7 : vector<1x32xf32> to vector<34x32xf32>
    %29 = arith.addf %27, %28 : vector<34x32xf32>
    %30 = tpu.iota {dimensions = array<i32: 0>} : vector<34x34xi32>
    %31 = tpu.iota {dimensions = array<i32: 1>} : vector<34x34xi32>
    %c0_i32 = arith.constant 0 : i32
    %32 = vector.broadcast %c0_i32 : i32 to vector<34x34xi32>
    %33 = arith.cmpi sge, %30, %32 : vector<34x34xi32>
    %c17_i32 = arith.constant 17 : i32
    %34 = vector.broadcast %c17_i32 : i32 to vector<34x34xi32>
    %35 = arith.cmpi slt, %30, %34 : vector<34x34xi32>
    %36 = arith.andi %33, %35 : vector<34x34xi1>
    %c0_i32_11 = arith.constant 0 : i32
    %37 = vector.broadcast %c0_i32_11 : i32 to vector<34x34xi32>
    %38 = arith.cmpi sge, %31, %37 : vector<34x34xi32>
    %39 = arith.andi %36, %38 : vector<34x34xi1>
    %c17_i32_12 = arith.constant 17 : i32
    %40 = vector.broadcast %c17_i32_12 : i32 to vector<34x34xi32>
    %41 = arith.cmpi slt, %31, %40 : vector<34x34xi32>
    %42 = arith.andi %39, %41 : vector<34x34xi1>
    %c17_i32_13 = arith.constant 17 : i32
    %43 = vector.broadcast %c17_i32_13 : i32 to vector<34x34xi32>
    %44 = arith.cmpi sge, %30, %43 : vector<34x34xi32>
    %c34_i32 = arith.constant 34 : i32
    %45 = vector.broadcast %c34_i32 : i32 to vector<34x34xi32>
    %46 = arith.cmpi slt, %30, %45 : vector<34x34xi32>
    %47 = arith.andi %44, %46 : vector<34x34xi1>
    %c17_i32_14 = arith.constant 17 : i32
    %48 = vector.broadcast %c17_i32_14 : i32 to vector<34x34xi32>
    %49 = arith.cmpi sge, %31, %48 : vector<34x34xi32>
    %50 = arith.andi %47, %49 : vector<34x34xi1>
    %c34_i32_15 = arith.constant 34 : i32
    %51 = vector.broadcast %c34_i32_15 : i32 to vector<34x34xi32>
    %52 = arith.cmpi slt, %31, %51 : vector<34x34xi32>
    %53 = arith.andi %50, %52 : vector<34x34xi1>
    %54 = arith.ori %42, %53 : vector<34x34xi1>
    %cst_16 = arith.constant 0.000000e+00 : f32
    %cst_17 = arith.constant -1.000000e+09 : f32
    %55 = vector.broadcast %cst_16 : f32 to vector<34x34xf32>
    %56 = vector.broadcast %cst_17 : f32 to vector<34x34xf32>
    %57 = arith.select %54, %55, %56 : vector<34x34xi1>, vector<34x34xf32>
    %c36 = arith.constant 36 : index
    %c0_18 = arith.constant 0 : index
    %58 = vector.load %arg2[%c36, %c0_18] : memref<50x128xf32, #tpu.memory_space<vmem>>, vector<1x32xf32>
    %c37 = arith.constant 37 : index
    %c0_19 = arith.constant 0 : index
    %59 = vector.load %arg2[%c37, %c0_19] : memref<50x128xf32, #tpu.memory_space<vmem>>, vector<1x32xf32>
    %cst_20 = arith.constant dense<0.000000e+00> : vector<34xf32>
    %60 = vector.multi_reduction <add>, %29, %cst_20 [1] : vector<34x32xf32> to vector<34xf32>
    %61 = vector.shape_cast %60 : vector<34xf32> to vector<34x1xf32>
    %cst_21 = arith.constant 3.200000e+01 : f32
    %62 = vector.broadcast %cst_21 : f32 to vector<34x1xf32>
    %63 = arith.divf %61, %62 : vector<34x1xf32>
    %64 = vector.broadcast %63 : vector<34x1xf32> to vector<34x32xf32>
    %65 = arith.subf %29, %64 : vector<34x32xf32>
    %66 = arith.mulf %65, %65 : vector<34x32xf32>
    %cst_22 = arith.constant dense<0.000000e+00> : vector<34xf32>
    %67 = vector.multi_reduction <add>, %66, %cst_22 [1] : vector<34x32xf32> to vector<34xf32>
    %68 = vector.shape_cast %67 : vector<34xf32> to vector<34x1xf32>
    %cst_23 = arith.constant 3.200000e+01 : f32
    %69 = vector.broadcast %cst_23 : f32 to vector<34x1xf32>
    %70 = arith.divf %68, %69 : vector<34x1xf32>
    %71 = vector.broadcast %63 : vector<34x1xf32> to vector<34x32xf32>
    %72 = arith.subf %29, %71 : vector<34x32xf32>
    %cst_24 = arith.constant 9.99999974E-6 : f32
    %73 = vector.broadcast %cst_24 : f32 to vector<34x1xf32>
    %74 = arith.addf %70, %73 : vector<34x1xf32>
    %75 = math.rsqrt %74 : vector<34x1xf32>
    %76 = vector.broadcast %75 : vector<34x1xf32> to vector<34x32xf32>
    %77 = arith.mulf %72, %76 : vector<34x32xf32>
    %78 = vector.broadcast %58 : vector<1x32xf32> to vector<34x32xf32>
    %79 = arith.mulf %77, %78 : vector<34x32xf32>
    %80 = vector.broadcast %59 : vector<1x32xf32> to vector<34x32xf32>
    %81 = arith.addf %79, %80 : vector<34x32xf32>
    %82 = arith.truncf %81 : vector<34x32xf32> to vector<34x32xbf16>
    %c0_25 = arith.constant 0 : index
    %c0_26 = arith.constant 0 : index
    %83 = vector.load %arg3[%c0_25, %c0_26] : memref<368x128xbf16, #tpu.memory_space<vmem>>, vector<32x96xbf16>
    %cst_27 = arith.constant dense<0.000000e+00> : vector<34x96xf32>
    %84 = tpu.matmul %82, %83, %cst_27 {dimension_numbers = #tpu.dot_dimension_numbers<[1], [0], [0], [1], [0, 0, 1, 1], [], []>} : vector<34x32xbf16>, vector<32x96xbf16>, vector<34x96xf32> -> vector<34x96xf32>
    %c38 = arith.constant 38 : index
    %c0_28 = arith.constant 0 : index
    %85 = vector.load %arg2[%c38, %c0_28] : memref<50x128xf32, #tpu.memory_space<vmem>>, vector<1x96xf32>
    %86 = vector.broadcast %85 : vector<1x96xf32> to vector<34x96xf32>
    %87 = arith.addf %84, %86 : vector<34x96xf32>
    %88 = vector.extract_strided_slice %87 {offsets = [0, 0], sizes = [34, 32], strides = [1, 1]} : vector<34x96xf32> to vector<34x32xf32>
    %89 = vector.extract_strided_slice %87 {offsets = [0, 32], sizes = [34, 32], strides = [1, 1]} : vector<34x96xf32> to vector<34x32xf32>
    %90 = vector.extract_strided_slice %87 {offsets = [0, 64], sizes = [34, 32], strides = [1, 1]} : vector<34x96xf32> to vector<34x32xf32>
    %cst_29 = arith.constant 0.000000e+00 : f32
    %91 = vector.broadcast %cst_29 : f32 to vector<2x17xf32>
    %92 = vector.extract_strided_slice %88 {offsets = [0, 0], sizes = [34, 8], strides = [1, 1]} : vector<34x32xf32> to vector<34x8xf32>
    %93 = vector.extract_strided_slice %89 {offsets = [0, 0], sizes = [34, 8], strides = [1, 1]} : vector<34x32xf32> to vector<34x8xf32>
    %94 = vector.extract_strided_slice %90 {offsets = [0, 0], sizes = [34, 8], strides = [1, 1]} : vector<34x32xf32> to vector<34x8xf32>
    %cst_30 = arith.constant dense<0.000000e+00> : vector<34x34xf32>
    %95 = tpu.matmul %92, %93, %cst_30 {dimension_numbers = #tpu.dot_dimension_numbers<[1], [1], [0], [0], [0, 0, 1, 0], [], []>} : vector<34x8xf32>, vector<34x8xf32>, vector<34x34xf32> -> vector<34x34xf32>
    %cst_31 = arith.constant 0.353553385 : f32
    %96 = vector.broadcast %cst_31 : f32 to vector<34x34xf32>
    %97 = arith.mulf %95, %96 : vector<34x34xf32>
    %98 = arith.addf %97, %57 : vector<34x34xf32>
    %cst_32 = arith.constant dense<0xFF800000> : vector<34xf32>
    %99 = vector.multi_reduction <maximumf>, %98, %cst_32 [1] : vector<34x34xf32> to vector<34xf32>
    %100 = vector.shape_cast %99 : vector<34xf32> to vector<34x1xf32>
    %101 = vector.broadcast %100 : vector<34x1xf32> to vector<34x34xf32>
    %102 = arith.subf %98, %101 : vector<34x34xf32>
    %103 = math.exp %102 : vector<34x34xf32>
    %cst_33 = arith.constant dense<0.000000e+00> : vector<34xf32>
    %104 = vector.multi_reduction <add>, %103, %cst_33 [1] : vector<34x34xf32> to vector<34xf32>
    %105 = vector.shape_cast %104 : vector<34xf32> to vector<34x1xf32>
    %106 = tpu.reciprocal %105 : vector<34x1xf32> -> vector<34x1xf32>
    %107 = vector.broadcast %106 : vector<34x1xf32> to vector<34x34xf32>
    %108 = arith.mulf %103, %107 : vector<34x34xf32>
    %109 = vector.extract_strided_slice %108 {offsets = [0, 0], sizes = [1, 17], strides = [1, 1]} : vector<34x34xf32> to vector<1x17xf32>
    %110 = vector.extract_strided_slice %108 {offsets = [17, 17], sizes = [1, 17], strides = [1, 1]} : vector<34x34xf32> to vector<1x17xf32>
    %111 = tpu.concatenate %109, %110 in 0 : vector<1x17xf32>, vector<1x17xf32> -> vector<2x17xf32>
    %cst_34 = arith.constant 2.500000e-01 : f32
    %112 = vector.broadcast %cst_34 : f32 to vector<2x17xf32>
    %113 = arith.mulf %111, %112 : vector<2x17xf32>
    %114 = arith.addf %91, %113 : vector<2x17xf32>
    %115 = arith.truncf %108 : vector<34x34xf32> to vector<34x34xbf16>
    %116 = arith.truncf %94 : vector<34x8xf32> to vector<34x8xbf16>
    %cst_35 = arith.constant dense<0.000000e+00> : vector<34x8xf32>
    %117 = tpu.matmul %115, %116, %cst_35 {dimension_numbers = #tpu.dot_dimension_numbers<[1], [0], [0], [1], [0, 0, 1, 1], [], []>} : vector<34x34xbf16>, vector<34x8xbf16>, vector<34x8xf32> -> vector<34x8xf32>
    %118 = vector.extract_strided_slice %88 {offsets = [0, 8], sizes = [34, 8], strides = [1, 1]} : vector<34x32xf32> to vector<34x8xf32>
    %119 = vector.extract_strided_slice %89 {offsets = [0, 8], sizes = [34, 8], strides = [1, 1]} : vector<34x32xf32> to vector<34x8xf32>
    %120 = vector.extract_strided_slice %90 {offsets = [0, 8], sizes = [34, 8], strides = [1, 1]} : vector<34x32xf32> to vector<34x8xf32>
    %cst_36 = arith.constant dense<0.000000e+00> : vector<34x34xf32>
    %121 = tpu.matmul %118, %119, %cst_36 {dimension_numbers = #tpu.dot_dimension_numbers<[1], [1], [0], [0], [0, 0, 1, 0], [], []>} : vector<34x8xf32>, vector<34x8xf32>, vector<34x34xf32> -> vector<34x34xf32>
    %cst_37 = arith.constant 0.353553385 : f32
    %122 = vector.broadcast %cst_37 : f32 to vector<34x34xf32>
    %123 = arith.mulf %121, %122 : vector<34x34xf32>
    %124 = arith.addf %123, %57 : vector<34x34xf32>
    %cst_38 = arith.constant dense<0xFF800000> : vector<34xf32>
    %125 = vector.multi_reduction <maximumf>, %124, %cst_38 [1] : vector<34x34xf32> to vector<34xf32>
    %126 = vector.shape_cast %125 : vector<34xf32> to vector<34x1xf32>
    %127 = vector.broadcast %126 : vector<34x1xf32> to vector<34x34xf32>
    %128 = arith.subf %124, %127 : vector<34x34xf32>
    %129 = math.exp %128 : vector<34x34xf32>
    %cst_39 = arith.constant dense<0.000000e+00> : vector<34xf32>
    %130 = vector.multi_reduction <add>, %129, %cst_39 [1] : vector<34x34xf32> to vector<34xf32>
    %131 = vector.shape_cast %130 : vector<34xf32> to vector<34x1xf32>
    %132 = tpu.reciprocal %131 : vector<34x1xf32> -> vector<34x1xf32>
    %133 = vector.broadcast %132 : vector<34x1xf32> to vector<34x34xf32>
    %134 = arith.mulf %129, %133 : vector<34x34xf32>
    %135 = vector.extract_strided_slice %134 {offsets = [0, 0], sizes = [1, 17], strides = [1, 1]} : vector<34x34xf32> to vector<1x17xf32>
    %136 = vector.extract_strided_slice %134 {offsets = [17, 17], sizes = [1, 17], strides = [1, 1]} : vector<34x34xf32> to vector<1x17xf32>
    %137 = tpu.concatenate %135, %136 in 0 : vector<1x17xf32>, vector<1x17xf32> -> vector<2x17xf32>
    %cst_40 = arith.constant 2.500000e-01 : f32
    %138 = vector.broadcast %cst_40 : f32 to vector<2x17xf32>
    %139 = arith.mulf %137, %138 : vector<2x17xf32>
    %140 = arith.addf %114, %139 : vector<2x17xf32>
    %141 = arith.truncf %134 : vector<34x34xf32> to vector<34x34xbf16>
    %142 = arith.truncf %120 : vector<34x8xf32> to vector<34x8xbf16>
    %cst_41 = arith.constant dense<0.000000e+00> : vector<34x8xf32>
    %143 = tpu.matmul %141, %142, %cst_41 {dimension_numbers = #tpu.dot_dimension_numbers<[1], [0], [0], [1], [0, 0, 1, 1], [], []>} : vector<34x34xbf16>, vector<34x8xbf16>, vector<34x8xf32> -> vector<34x8xf32>
    %144 = vector.extract_strided_slice %88 {offsets = [0, 16], sizes = [34, 8], strides = [1, 1]} : vector<34x32xf32> to vector<34x8xf32>
    %145 = vector.extract_strided_slice %89 {offsets = [0, 16], sizes = [34, 8], strides = [1, 1]} : vector<34x32xf32> to vector<34x8xf32>
    %146 = vector.extract_strided_slice %90 {offsets = [0, 16], sizes = [34, 8], strides = [1, 1]} : vector<34x32xf32> to vector<34x8xf32>
    %cst_42 = arith.constant dense<0.000000e+00> : vector<34x34xf32>
    %147 = tpu.matmul %144, %145, %cst_42 {dimension_numbers = #tpu.dot_dimension_numbers<[1], [1], [0], [0], [0, 0, 1, 0], [], []>} : vector<34x8xf32>, vector<34x8xf32>, vector<34x34xf32> -> vector<34x34xf32>
    %cst_43 = arith.constant 0.353553385 : f32
    %148 = vector.broadcast %cst_43 : f32 to vector<34x34xf32>
    %149 = arith.mulf %147, %148 : vector<34x34xf32>
    %150 = arith.addf %149, %57 : vector<34x34xf32>
    %cst_44 = arith.constant dense<0xFF800000> : vector<34xf32>
    %151 = vector.multi_reduction <maximumf>, %150, %cst_44 [1] : vector<34x34xf32> to vector<34xf32>
    %152 = vector.shape_cast %151 : vector<34xf32> to vector<34x1xf32>
    %153 = vector.broadcast %152 : vector<34x1xf32> to vector<34x34xf32>
    %154 = arith.subf %150, %153 : vector<34x34xf32>
    %155 = math.exp %154 : vector<34x34xf32>
    %cst_45 = arith.constant dense<0.000000e+00> : vector<34xf32>
    %156 = vector.multi_reduction <add>, %155, %cst_45 [1] : vector<34x34xf32> to vector<34xf32>
    %157 = vector.shape_cast %156 : vector<34xf32> to vector<34x1xf32>
    %158 = tpu.reciprocal %157 : vector<34x1xf32> -> vector<34x1xf32>
    %159 = vector.broadcast %158 : vector<34x1xf32> to vector<34x34xf32>
    %160 = arith.mulf %155, %159 : vector<34x34xf32>
    %161 = vector.extract_strided_slice %160 {offsets = [0, 0], sizes = [1, 17], strides = [1, 1]} : vector<34x34xf32> to vector<1x17xf32>
    %162 = vector.extract_strided_slice %160 {offsets = [17, 17], sizes = [1, 17], strides = [1, 1]} : vector<34x34xf32> to vector<1x17xf32>
    %163 = tpu.concatenate %161, %162 in 0 : vector<1x17xf32>, vector<1x17xf32> -> vector<2x17xf32>
    %cst_46 = arith.constant 2.500000e-01 : f32
    %164 = vector.broadcast %cst_46 : f32 to vector<2x17xf32>
    %165 = arith.mulf %163, %164 : vector<2x17xf32>
    %166 = arith.addf %140, %165 : vector<2x17xf32>
    %167 = arith.truncf %160 : vector<34x34xf32> to vector<34x34xbf16>
    %168 = arith.truncf %146 : vector<34x8xf32> to vector<34x8xbf16>
    %cst_47 = arith.constant dense<0.000000e+00> : vector<34x8xf32>
    %169 = tpu.matmul %167, %168, %cst_47 {dimension_numbers = #tpu.dot_dimension_numbers<[1], [0], [0], [1], [0, 0, 1, 1], [], []>} : vector<34x34xbf16>, vector<34x8xbf16>, vector<34x8xf32> -> vector<34x8xf32>
    %170 = vector.extract_strided_slice %88 {offsets = [0, 24], sizes = [34, 8], strides = [1, 1]} : vector<34x32xf32> to vector<34x8xf32>
    %171 = vector.extract_strided_slice %89 {offsets = [0, 24], sizes = [34, 8], strides = [1, 1]} : vector<34x32xf32> to vector<34x8xf32>
    %172 = vector.extract_strided_slice %90 {offsets = [0, 24], sizes = [34, 8], strides = [1, 1]} : vector<34x32xf32> to vector<34x8xf32>
    %cst_48 = arith.constant dense<0.000000e+00> : vector<34x34xf32>
    %173 = tpu.matmul %170, %171, %cst_48 {dimension_numbers = #tpu.dot_dimension_numbers<[1], [1], [0], [0], [0, 0, 1, 0], [], []>} : vector<34x8xf32>, vector<34x8xf32>, vector<34x34xf32> -> vector<34x34xf32>
    %cst_49 = arith.constant 0.353553385 : f32
    %174 = vector.broadcast %cst_49 : f32 to vector<34x34xf32>
    %175 = arith.mulf %173, %174 : vector<34x34xf32>
    %176 = arith.addf %175, %57 : vector<34x34xf32>
    %cst_50 = arith.constant dense<0xFF800000> : vector<34xf32>
    %177 = vector.multi_reduction <maximumf>, %176, %cst_50 [1] : vector<34x34xf32> to vector<34xf32>
    %178 = vector.shape_cast %177 : vector<34xf32> to vector<34x1xf32>
    %179 = vector.broadcast %178 : vector<34x1xf32> to vector<34x34xf32>
    %180 = arith.subf %176, %179 : vector<34x34xf32>
    %181 = math.exp %180 : vector<34x34xf32>
    %cst_51 = arith.constant dense<0.000000e+00> : vector<34xf32>
    %182 = vector.multi_reduction <add>, %181, %cst_51 [1] : vector<34x34xf32> to vector<34xf32>
    %183 = vector.shape_cast %182 : vector<34xf32> to vector<34x1xf32>
    %184 = tpu.reciprocal %183 : vector<34x1xf32> -> vector<34x1xf32>
    %185 = vector.broadcast %184 : vector<34x1xf32> to vector<34x34xf32>
    %186 = arith.mulf %181, %185 : vector<34x34xf32>
    %187 = vector.extract_strided_slice %186 {offsets = [0, 0], sizes = [1, 17], strides = [1, 1]} : vector<34x34xf32> to vector<1x17xf32>
    %188 = vector.extract_strided_slice %186 {offsets = [17, 17], sizes = [1, 17], strides = [1, 1]} : vector<34x34xf32> to vector<1x17xf32>
    %189 = tpu.concatenate %187, %188 in 0 : vector<1x17xf32>, vector<1x17xf32> -> vector<2x17xf32>
    %cst_52 = arith.constant 2.500000e-01 : f32
    %190 = vector.broadcast %cst_52 : f32 to vector<2x17xf32>
    %191 = arith.mulf %189, %190 : vector<2x17xf32>
    %192 = arith.addf %166, %191 : vector<2x17xf32>
    %193 = arith.truncf %186 : vector<34x34xf32> to vector<34x34xbf16>
    %194 = arith.truncf %172 : vector<34x8xf32> to vector<34x8xbf16>
    %cst_53 = arith.constant dense<0.000000e+00> : vector<34x8xf32>
    %195 = tpu.matmul %193, %194, %cst_53 {dimension_numbers = #tpu.dot_dimension_numbers<[1], [0], [0], [1], [0, 0, 1, 1], [], []>} : vector<34x34xbf16>, vector<34x8xbf16>, vector<34x8xf32> -> vector<34x8xf32>
    %196 = tpu.concatenate %117, %143, %169, %195 in 1 : vector<34x8xf32>, vector<34x8xf32>, vector<34x8xf32>, vector<34x8xf32> -> vector<34x32xf32>
    %197 = arith.truncf %196 : vector<34x32xf32> to vector<34x32xbf16>
    %c32 = arith.constant 32 : index
    %c0_54 = arith.constant 0 : index
    %198 = vector.load %arg3[%c32, %c0_54] : memref<368x128xbf16, #tpu.memory_space<vmem>>, vector<32x32xbf16>
    %cst_55 = arith.constant dense<0.000000e+00> : vector<34x32xf32>
    %199 = tpu.matmul %197, %198, %cst_55 {dimension_numbers = #tpu.dot_dimension_numbers<[1], [0], [0], [1], [0, 0, 1, 1], [], []>} : vector<34x32xbf16>, vector<32x32xbf16>, vector<34x32xf32> -> vector<34x32xf32>
    %200 = arith.addf %29, %199 : vector<34x32xf32>
    %c39 = arith.constant 39 : index
    %c0_56 = arith.constant 0 : index
    %201 = vector.load %arg2[%c39, %c0_56] : memref<50x128xf32, #tpu.memory_space<vmem>>, vector<1x32xf32>
    %202 = vector.broadcast %201 : vector<1x32xf32> to vector<34x32xf32>
    %203 = arith.addf %200, %202 : vector<34x32xf32>
    %c40 = arith.constant 40 : index
    %c0_57 = arith.constant 0 : index
    %204 = vector.load %arg2[%c40, %c0_57] : memref<50x128xf32, #tpu.memory_space<vmem>>, vector<1x32xf32>
    %c41 = arith.constant 41 : index
    %c0_58 = arith.constant 0 : index
    %205 = vector.load %arg2[%c41, %c0_58] : memref<50x128xf32, #tpu.memory_space<vmem>>, vector<1x32xf32>
    %cst_59 = arith.constant dense<0.000000e+00> : vector<34xf32>
    %206 = vector.multi_reduction <add>, %203, %cst_59 [1] : vector<34x32xf32> to vector<34xf32>
    %207 = vector.shape_cast %206 : vector<34xf32> to vector<34x1xf32>
    %cst_60 = arith.constant 3.200000e+01 : f32
    %208 = vector.broadcast %cst_60 : f32 to vector<34x1xf32>
    %209 = arith.divf %207, %208 : vector<34x1xf32>
    %210 = vector.broadcast %209 : vector<34x1xf32> to vector<34x32xf32>
    %211 = arith.subf %203, %210 : vector<34x32xf32>
    %212 = arith.mulf %211, %211 : vector<34x32xf32>
    %cst_61 = arith.constant dense<0.000000e+00> : vector<34xf32>
    %213 = vector.multi_reduction <add>, %212, %cst_61 [1] : vector<34x32xf32> to vector<34xf32>
    %214 = vector.shape_cast %213 : vector<34xf32> to vector<34x1xf32>
    %cst_62 = arith.constant 3.200000e+01 : f32
    %215 = vector.broadcast %cst_62 : f32 to vector<34x1xf32>
    %216 = arith.divf %214, %215 : vector<34x1xf32>
    %217 = vector.broadcast %209 : vector<34x1xf32> to vector<34x32xf32>
    %218 = arith.subf %203, %217 : vector<34x32xf32>
    %cst_63 = arith.constant 9.99999974E-6 : f32
    %219 = vector.broadcast %cst_63 : f32 to vector<34x1xf32>
    %220 = arith.addf %216, %219 : vector<34x1xf32>
    %221 = math.rsqrt %220 : vector<34x1xf32>
    %222 = vector.broadcast %221 : vector<34x1xf32> to vector<34x32xf32>
    %223 = arith.mulf %218, %222 : vector<34x32xf32>
    %224 = vector.broadcast %204 : vector<1x32xf32> to vector<34x32xf32>
    %225 = arith.mulf %223, %224 : vector<34x32xf32>
    %226 = vector.broadcast %205 : vector<1x32xf32> to vector<34x32xf32>
    %227 = arith.addf %225, %226 : vector<34x32xf32>
    %228 = arith.truncf %227 : vector<34x32xf32> to vector<34x32xbf16>
    %c64 = arith.constant 64 : index
    %c0_64 = arith.constant 0 : index
    %229 = vector.load %arg3[%c64, %c0_64] : memref<368x128xbf16, #tpu.memory_space<vmem>>, vector<32x128xbf16>
    %cst_65 = arith.constant dense<0.000000e+00> : vector<34x128xf32>
    %230 = tpu.matmul %228, %229, %cst_65 {dimension_numbers = #tpu.dot_dimension_numbers<[1], [0], [0], [1], [0, 0, 1, 1], [], []>} : vector<34x32xbf16>, vector<32x128xbf16>, vector<34x128xf32> -> vector<34x128xf32>
    %c42 = arith.constant 42 : index
    %c0_66 = arith.constant 0 : index
    %231 = vector.load %arg2[%c42, %c0_66] : memref<50x128xf32, #tpu.memory_space<vmem>>, vector<1x128xf32>
    %232 = vector.broadcast %231 : vector<1x128xf32> to vector<34x128xf32>
    %233 = arith.addf %230, %232 : vector<34x128xf32>
    %cst_67 = arith.constant 1.702000e+00 : f32
    %234 = vector.broadcast %cst_67 : f32 to vector<34x128xf32>
    %235 = arith.mulf %234, %233 : vector<34x128xf32>
    %236 = arith.negf %235 : vector<34x128xf32>
    %237 = math.exp %236 : vector<34x128xf32>
    %cst_68 = arith.constant 1.000000e+00 : f32
    %238 = vector.broadcast %cst_68 : f32 to vector<34x128xf32>
    %239 = arith.addf %238, %237 : vector<34x128xf32>
    %240 = arith.divf %238, %239 : vector<34x128xf32>
    %241 = arith.mulf %233, %240 : vector<34x128xf32>
    %242 = arith.truncf %241 : vector<34x128xf32> to vector<34x128xbf16>
    %c96 = arith.constant 96 : index
    %c0_69 = arith.constant 0 : index
    %243 = vector.load %arg3[%c96, %c0_69] : memref<368x128xbf16, #tpu.memory_space<vmem>>, vector<128x32xbf16>
    %cst_70 = arith.constant dense<0.000000e+00> : vector<34x32xf32>
    %244 = tpu.matmul %242, %243, %cst_70 {dimension_numbers = #tpu.dot_dimension_numbers<[1], [0], [0], [1], [0, 0, 1, 1], [], []>} : vector<34x128xbf16>, vector<128x32xbf16>, vector<34x32xf32> -> vector<34x32xf32>
    %c43 = arith.constant 43 : index
    %c0_71 = arith.constant 0 : index
    %245 = vector.load %arg2[%c43, %c0_71] : memref<50x128xf32, #tpu.memory_space<vmem>>, vector<1x32xf32>
    %246 = vector.broadcast %245 : vector<1x32xf32> to vector<34x32xf32>
    %247 = arith.addf %244, %246 : vector<34x32xf32>
    %248 = arith.addf %203, %247 : vector<34x32xf32>
    %c0_72 = arith.constant 0 : index
    %c0_73 = arith.constant 0 : index
    %249 = vector.load %arg5[%c0_72, %c0_73] : memref<2x17xf32, #tpu.memory_space<vmem>>, vector<2x17xf32>
    tpu.vector_store %arg5[%c0_72, %c0_73], %192 {strides = array<i32>} : memref<2x17xf32, #tpu.memory_space<vmem>>, vector<2x17xf32>,
    %250 = vector.extract_strided_slice %248 {offsets = [0, 0], sizes = [1, 32], strides = [1, 1]} : vector<34x32xf32> to vector<1x32xf32>
    %251 = vector.extract_strided_slice %248 {offsets = [17, 0], sizes = [1, 32], strides = [1, 1]} : vector<34x32xf32> to vector<1x32xf32>
    %252 = tpu.concatenate %250, %251 in 0 : vector<1x32xf32>, vector<1x32xf32> -> vector<2x32xf32>
    %c44 = arith.constant 44 : index
    %c0_74 = arith.constant 0 : index
    %253 = vector.load %arg2[%c44, %c0_74] : memref<50x128xf32, #tpu.memory_space<vmem>>, vector<1x32xf32>
    %c45 = arith.constant 45 : index
    %c0_75 = arith.constant 0 : index
    %254 = vector.load %arg2[%c45, %c0_75] : memref<50x128xf32, #tpu.memory_space<vmem>>, vector<1x32xf32>
    %cst_76 = arith.constant dense<0.000000e+00> : vector<2xf32>
    %255 = vector.multi_reduction <add>, %252, %cst_76 [1] : vector<2x32xf32> to vector<2xf32>
    %256 = vector.shape_cast %255 : vector<2xf32> to vector<2x1xf32>
    %cst_77 = arith.constant 3.200000e+01 : f32
    %257 = vector.broadcast %cst_77 : f32 to vector<2x1xf32>
    %258 = arith.divf %256, %257 : vector<2x1xf32>
    %259 = vector.broadcast %258 : vector<2x1xf32> to vector<2x32xf32>
    %260 = arith.subf %252, %259 : vector<2x32xf32>
    %261 = arith.mulf %260, %260 : vector<2x32xf32>
    %cst_78 = arith.constant dense<0.000000e+00> : vector<2xf32>
    %262 = vector.multi_reduction <add>, %261, %cst_78 [1] : vector<2x32xf32> to vector<2xf32>
    %263 = vector.shape_cast %262 : vector<2xf32> to vector<2x1xf32>
    %cst_79 = arith.constant 3.200000e+01 : f32
    %264 = vector.broadcast %cst_79 : f32 to vector<2x1xf32>
    %265 = arith.divf %263, %264 : vector<2x1xf32>
    %266 = vector.broadcast %258 : vector<2x1xf32> to vector<2x32xf32>
    %267 = arith.subf %252, %266 : vector<2x32xf32>
    %cst_80 = arith.constant 9.99999974E-6 : f32
    %268 = vector.broadcast %cst_80 : f32 to vector<2x1xf32>
    %269 = arith.addf %265, %268 : vector<2x1xf32>
    %270 = math.rsqrt %269 : vector<2x1xf32>
    %271 = vector.broadcast %270 : vector<2x1xf32> to vector<2x32xf32>
    %272 = arith.mulf %267, %271 : vector<2x32xf32>
    %273 = vector.broadcast %253 : vector<1x32xf32> to vector<2x32xf32>
    %274 = arith.mulf %272, %273 : vector<2x32xf32>
    %275 = vector.broadcast %254 : vector<1x32xf32> to vector<2x32xf32>
    %276 = arith.addf %274, %275 : vector<2x32xf32>
    %277 = arith.truncf %276 : vector<2x32xf32> to vector<2x32xbf16>
    %c224 = arith.constant 224 : index
    %c0_81 = arith.constant 0 : index
    %278 = vector.load %arg3[%c224, %c0_81] : memref<368x128xbf16, #tpu.memory_space<vmem>>, vector<32x32xbf16>
    %cst_82 = arith.constant dense<0.000000e+00> : vector<2x32xf32>
    %279 = tpu.matmul %277, %278, %cst_82 {dimension_numbers = #tpu.dot_dimension_numbers<[1], [0], [0], [1], [0, 0, 1, 1], [], []>} : vector<2x32xbf16>, vector<32x32xbf16>, vector<2x32xf32> -> vector<2x32xf32>
    %280 = arith.mulf %279, %279 : vector<2x32xf32>
    %cst_83 = arith.constant dense<0.000000e+00> : vector<2xf32>
    %281 = vector.multi_reduction <add>, %280, %cst_83 [1] : vector<2x32xf32> to vector<2xf32>
    %282 = vector.shape_cast %281 : vector<2xf32> to vector<2x1xf32>
    %cst_84 = arith.constant 9.99999996E-13 : f32
    %283 = vector.broadcast %cst_84 : f32 to vector<2x1xf32>
    %284 = arith.addf %282, %283 : vector<2x1xf32>
    %285 = math.rsqrt %284 : vector<2x1xf32>
    %286 = vector.broadcast %285 : vector<2x1xf32> to vector<2x32xf32>
    %287 = arith.mulf %279, %286 : vector<2x32xf32>
    %c0_85 = arith.constant 0 : index
    %c0_86 = arith.constant 0 : index
    %288 = vector.load %arg4[%c0_85, %c0_86] : memref<2x32xf32, #tpu.memory_space<vmem>>, vector<2x32xf32>
    tpu.vector_store %arg4[%c0_85, %c0_86], %287 {strides = array<i32>} : memref<2x32xf32, #tpu.memory_space<vmem>>, vector<2x32xf32>,
    %289 = arith.truncf %248 : vector<34x32xf32> to vector<34x32xbf16>
    %c304 = arith.constant 304 : index
    %c0_87 = arith.constant 0 : index
    %290 = vector.load %arg3[%c304, %c0_87] : memref<368x128xbf16, #tpu.memory_space<vmem>>, vector<32x32xbf16>
    %cst_88 = arith.constant dense<0.000000e+00> : vector<34x32xf32>
    %291 = tpu.matmul %289, %290, %cst_88 {dimension_numbers = #tpu.dot_dimension_numbers<[1], [0], [0], [1], [0, 0, 1, 1], [], []>} : vector<34x32xbf16>, vector<32x32xbf16>, vector<34x32xf32> -> vector<34x32xf32>
    %c46 = arith.constant 46 : index
    %c0_89 = arith.constant 0 : index
    %292 = vector.load %arg2[%c46, %c0_89] : memref<50x128xf32, #tpu.memory_space<vmem>>, vector<1x32xf32>
    %293 = vector.broadcast %292 : vector<1x32xf32> to vector<34x32xf32>
    %294 = arith.addf %291, %293 : vector<34x32xf32>
    %cst_90 = arith.constant dense<0.000000e+00> : vector<32xf32>
    %295 = vector.multi_reduction <add>, %294, %cst_90 [0] : vector<34x32xf32> to vector<32xf32>
    %296 = vector.shape_cast %295 : vector<32xf32> to vector<1x32xf32>
    %cst_91 = arith.constant 3.400000e+01 : f32
    %297 = vector.broadcast %cst_91 : f32 to vector<1x32xf32>
    %298 = arith.divf %296, %297 : vector<1x32xf32>
    %299 = vector.broadcast %298 : vector<1x32xf32> to vector<34x32xf32>
    %300 = arith.subf %294, %299 : vector<34x32xf32>
    %301 = arith.mulf %300, %300 : vector<34x32xf32>
    %cst_92 = arith.constant dense<0.000000e+00> : vector<32xf32>
    %302 = vector.multi_reduction <add>, %301, %cst_92 [0] : vector<34x32xf32> to vector<32xf32>
    %303 = vector.shape_cast %302 : vector<32xf32> to vector<1x32xf32>
    %cst_93 = arith.constant 3.400000e+01 : f32
    %304 = vector.broadcast %cst_93 : f32 to vector<1x32xf32>
    %305 = arith.divf %303, %304 : vector<1x32xf32>
    %306 = vector.broadcast %298 : vector<1x32xf32> to vector<34x32xf32>
    %307 = arith.subf %294, %306 : vector<34x32xf32>
    %cst_94 = arith.constant 9.99999974E-6 : f32
    %308 = vector.broadcast %cst_94 : f32 to vector<1x32xf32>
    %309 = arith.addf %305, %308 : vector<1x32xf32>
    %310 = math.rsqrt %309 : vector<1x32xf32>
    %311 = vector.broadcast %310 : vector<1x32xf32> to vector<34x32xf32>
    %312 = arith.mulf %307, %311 : vector<34x32xf32>
    %c47 = arith.constant 47 : index
    %c0_95 = arith.constant 0 : index
    %313 = vector.load %arg2[%c47, %c0_95] : memref<50x128xf32, #tpu.memory_space<vmem>>, vector<1x32xf32>
    %314 = vector.broadcast %313 : vector<1x32xf32> to vector<34x32xf32>
    %315 = arith.mulf %312, %314 : vector<34x32xf32>
    %c48 = arith.constant 48 : index
    %c0_96 = arith.constant 0 : index
    %316 = vector.load %arg2[%c48, %c0_96] : memref<50x128xf32, #tpu.memory_space<vmem>>, vector<1x32xf32>
    %317 = vector.broadcast %316 : vector<1x32xf32> to vector<34x32xf32>
    %318 = arith.addf %315, %317 : vector<34x32xf32>
    %cst_97 = arith.constant 0.000000e+00 : f32
    %319 = vector.broadcast %cst_97 : f32 to vector<34x32xf32>
    %320 = arith.maximumf %318, %319 : vector<34x32xf32>
    %321 = arith.truncf %320 : vector<34x32xf32> to vector<34x32xbf16>
    %c336 = arith.constant 336 : index
    %c0_98 = arith.constant 0 : index
    %322 = vector.load %arg3[%c336, %c0_98] : memref<368x128xbf16, #tpu.memory_space<vmem>>, vector<32x32xbf16>
    %cst_99 = arith.constant dense<0.000000e+00> : vector<34x32xf32>
    %323 = tpu.matmul %321, %322, %cst_99 {dimension_numbers = #tpu.dot_dimension_numbers<[1], [0], [0], [1], [0, 0, 1, 1], [], []>} : vector<34x32xbf16>, vector<32x32xbf16>, vector<34x32xf32> -> vector<34x32xf32>
    %c49 = arith.constant 49 : index
    %c0_100 = arith.constant 0 : index
    %324 = vector.load %arg2[%c49, %c0_100] : memref<50x128xf32, #tpu.memory_space<vmem>>, vector<1x32xf32>
    %325 = vector.broadcast %324 : vector<1x32xf32> to vector<34x32xf32>
    %326 = arith.addf %323, %325 : vector<34x32xf32>
    %c0_101 = arith.constant 0 : index
    %c0_102 = arith.constant 0 : index
    %327 = vector.load %arg6[%c0_101, %c0_102] : memref<34x32xf32, #tpu.memory_space<vmem>>, vector<34x32xf32>
    tpu.vector_store %arg6[%c0_101, %c0_102], %326 {strides = array<i32>} : memref<34x32xf32, #tpu.memory_space<vmem>>, vector<34x32xf32>,
    return
  }
  func.func @transform_0(%arg0: i32) -> (i32, i32) {
    %c0_i32 = arith.constant 0 : i32
    %c0_i32_0 = arith.constant 0 : i32
    %c0_i32_1 = arith.constant 0 : i32
    return %c0_i32, %c0_i32_0 : i32, i32
  }
  func.func @transform_1(%arg0: i32) -> (i32, i32) {
    %c0_i32 = arith.constant 0 : i32
    %c0_i32_0 = arith.constant 0 : i32
    %c0_i32_1 = arith.constant 0 : i32
    return %c0_i32, %c0_i32_0 : i32, i32
  }
  func.func @transform_2(%arg0: i32) -> (i32, i32) {
    %c0_i32 = arith.constant 0 : i32
    %c0_i32_0 = arith.constant 0 : i32
    %c0_i32_1 = arith.constant 0 : i32
    return %c0_i32, %c0_i32_0 : i32, i32
  }
  func.func @transform_3(%arg0: i32) -> (i32, i32) {
    %c0_i32 = arith.constant 0 : i32
    %c0_i32_0 = arith.constant 0 : i32
    %c0_i32_1 = arith.constant 0 : i32
    return %c0_i32, %c0_i32_0 : i32, i32
  }
  func.func @transform_4(%arg0: i32) -> (i32, i32) {
    %c0_i32 = arith.constant 0 : i32
    %c0_i32_0 = arith.constant 0 : i32
    %c0_i32_1 = arith.constant 0 : i32
    return %c0_i32, %c0_i32_0 : i32, i32
  }
  func.func @transform_5(%arg0: i32) -> (i32, i32) {
    %c0_i32 = arith.constant 0 : i32
    %c0_i32_0 = arith.constant 0 : i32
    %c0_i32_1 = arith.constant 0 : i32
    return %c0_i32, %c0_i32_0 : i32, i32
  }
}

</mosaic_0001>

<bundles_post_ra>
// kernel: tile.14
= control target key start
LH: loop header
LB: loop body
LE: loop exit
PB: predicated region body
PF: predicated region fallthrough
CT: control target
= control target key end

     0   :  { %vm3_vm0 = vcmask 261120   ;;  %s11_s6 = smov 3  ;;  %s74_s0 = inlined_call_operand.vmem [shape: f32[2,17,32], index: 0, kind: input, shape index: {}]   ;;  %s75_s1 = inlined_call_operand.vmem [shape: f32[34,32], index: 1, kind: output, shape index: {}]  }
   0x1   :  { %v2_v0 = vld [vmem:[%s74_s0] sm:$0xff]   ;;  %v26_v1 = vld [vmem:[%s74_s0 + $0x8] sm:$0xff]  }
   0x2   :  { %v28_v2 = vld [vmem:[%s74_s0 + $0x10] ss:$8 sm:%s11_s6]   ;;  %4 = vst.msk [vmem:[%s75_s1] sm:$0xff] %vm3_vm0, %v2_v0  }
   0x3   :  { %v30_v3 = vld [vmem:[%s74_s0 + $0x19] sm:$0xff]   ;;  %27 = vst.msk [vmem:[%s75_s1 + $0x8] sm:$0xff] %vm3_vm0, %v26_v1   ;;  %v32_v4 = vld [vmem:[%s74_s0 + $0x21] sm:$0xff]  }
   0x4   :  { %29 = vst.msk [vmem:[%s75_s1 + $0x10] sm:$0x3] %vm3_vm0, %v28_v2  }
   0x5   :  { %31 = vst.msk [vmem:[%s75_s1 + $0x12] sm:$0xff] %vm3_vm0, %v30_v3  }
   0x6   :  { %33 = vst.msk [vmem:[%s75_s1 + $0x1a] sm:$0xff] %vm3_vm0, %v32_v4  }

// kernel: custom_clip_forward.3
= control target key start
LH: loop header
LB: loop body
LE: loop exit
PB: predicated region body
PF: predicated region fallthrough
CT: control target
= control target key end

     0   :  { %11 = vsyncpa [#allocation5], 0  ;;  %s2797_s0 = inlined_call_operand.vmem [shape: s32[4], index: 0, kind: input, shape index: {}]   ;;  %s2798_s1 = inlined_call_operand.vmem [shape: f32[4,32], index: 1, kind: input, shape index: {}]   ;;  %s2799_s2 = inlined_call_operand.vmem [shape: f32[4,32], index: 2, kind: input, shape index: {}]   ;;  %s2800_s3 = inlined_call_operand.vmem [shape: f32[12,32], index: 3, kind: input, shape index: {}]   ;;  %s2801_s4 = inlined_call_operand.vmem [shape: f32[42,128], index: 4, kind: input, shape index: {}]   ;;  %s2802_s5 = inlined_call_operand.vmem [shape: bf16[256,128], index: 5, kind: input, shape index: {}]   ;;  %s2803_s6 = inlined_call_operand.hbm [shape: f32[4,32], index: 6, kind: output, shape index: {}]  }
   0x1   :  { %12 = vsyncpa [#allocation4], 0  ;;  %s18_s23 = sshll.u32 %s2797_s0, 4  ;;  %s2128_s24 = smov [#allocation3]   ;;  %s19_s23 = int_to_ptr.vmem [resolvable:$true] %s18_s23 }
   0x2   :  { %21 = dma.vmem_to_smem %s19_s23, 16, %s2128_s24, [#allocation5]  }
   0x3   :  { %2124 = dma.done.wait [#allocation5], 16  }
   0x4   :  { %2125 = vsyncadd [#allocation5], 4294967280 }
   0x5   :  { %36 = sfence }
   0x6   :  { %vm39_vm0 = vcmask 253952   ;;  %vm42_vm1 = vcmask 257024   ;;  %vm45_vm2 = vcmask 256000   ;;  %v53_v0 = vld [vmem:[%s2798_s1 + $0x2] sm:$0x1]  ;;  %vm198_vm3 = vcmask 261120  }
   0x7   :  { %54 = vst.msk [vmem:[#allocation2 + $0x10] sm:$0x1] %vm39_vm0, %v53_v0  ;;  %v55_v1 = vld [vmem:[%s2799_s2] sm:$0xf]  ;;  %v57_v2 = vld [vmem:[%s2800_s3 + $0x6] sm:$0x7] }
   0x8   :  { %56 = vst.msk [vmem:[#allocation2 + $0x11] sm:$0xf] %vm42_vm1, %v55_v1  ;;  %v38_v3 = vld [vmem:[%s2798_s1] sm:$0x1]  ;;  %v59_v6 = vld [vmem:[%s2798_s1 + $0x3] sm:$0x1] }
   0x9   :  { %58 = vst.msk [vmem:[#allocation2 + $0x15] sm:$0x7] %vm45_vm2, %v57_v2  ;;  %v41_v4 = vld [vmem:[%s2799_s2] sm:$0xf]  ;;  %v71_v8 = vld [vmem:[%s2801_s4 + $0x10] sm:$0xff]  ;;  %v72_v19 = vld [vmem:[%s2801_s4 + $0x18] sm:$0xff] }
   0xa   :  { %v44_v5 = vld [vmem:[%s2800_s3] sm:$0x7]  ;;  %40 = vst.msk [vmem:[#allocation2] sm:$0x1] %vm39_vm0, %v38_v3  ;;  %v63_v9 = vld [vmem:[%s2800_s3 + $0x9] sm:$0x7] }
   0xb   :  { %43 = vst.msk [vmem:[#allocation2 + $0x1] sm:$0xf] %vm42_vm1, %v41_v4  ;;  %v61_v7 = vld [vmem:[%s2799_s2] sm:$0xf]  ;;  %v70_v23 = vld [vmem:[%s2801_s4 + $0x8] sm:$0xff]  ;;  %v2129_v28 = vmov 32.0  }
   0xc   :  { %46 = vst.msk [vmem:[#allocation2 + $0x5] sm:$0x7] %vm45_vm2, %v44_v5  ;;  %v47_v10 = vld [vmem:[%s2798_s1 + $0x1] sm:$0x1]  ;;  %v51_v12 = vld [vmem:[%s2800_s3 + $0x3] sm:$0x7]  ;;  %1980 = vrcp.f32 %v2129_v28 }
   0xd   :  { %60 = vst.msk [vmem:[#allocation2 + $0x18] sm:$0x1] %vm39_vm0, %v59_v6  ;;  %v49_v11 = vld [vmem:[%s2799_s2] sm:$0xf]  ;;  %v1907_v55 = vld [vmem:[%s2802_s5 + $0x8] sm:$0xff]  ;;  %s2130_s14 = smov 96  }
   0xe   :  { %62 = vst.msk [vmem:[#allocation2 + $0x19] sm:$0xf] %vm42_vm1, %v61_v7  ;;  %v69_v14 = vld [vmem:[%s2801_s4] sm:$0xff]  ;;  %336 = vmatpush.bf16.msra.mxu0 %v1907_v55  ;;  %s2131_s15 = smov 88   ;;  %s2132_s16 = smov 64  }
   0xf   :  { %64 = vst.msk [vmem:[#allocation2 + $0x1d] sm:$0x7] %vm45_vm2, %v63_v9  ;;  %v1906_v58 = vld [vmem:[%s2802_s5] sm:$0xff]  ;;  %s2133_s17 = smov 120   ;;  %s2134_s18 = smov 80  }
  0x10   :  { %v67_v13 = vld [vmem:[#allocation2 + $0x10] sm:$0xff]  ;;  %48 = vst.msk [vmem:[#allocation2 + $0x8] sm:$0x1] %vm39_vm0, %v47_v10  ;;  %s2135_s19 = smov 72   ;;  %s2137_s20 = smov 112  }
  0x11   :  { %v2236_v15 = vadd.f32 %v71_v8, %v67_v13  ;;  %50 = vst.msk [vmem:[#allocation2 + $0x9] sm:$0xf] %vm42_vm1, %v49_v11  ;;  %s2138_s21 = smov 104   ;;  %s2139_s22 = smov 56  }
  0x12   :  { %52 = vst.msk [vmem:[#allocation2 + $0xd] sm:$0x7] %vm45_vm2, %v51_v12  ;;  %v1981_v29 = vpop.eup %1980  ;;  %337 = vmatpush.bf16.msra.mxu0 %v1906_v58  ;;  %vm361_vm2 = vcmask 64512   ;;  %s2140_s23 = smov 48   ;;  %s2141_s24 = smov 40  }
  0x13   :  { %v205_v16 = vsel %vm198_vm3, %v2236_v15, 0.0  ;;  %v65_v17 = vld [vmem:[#allocation2] sm:$0xff]  ;;  %v212_v30 = vmul.f32 32.0, %v1981_v29  ;;  %vm216_vm4 = vweird.f32 %v1981_v29  ;;  %s2142_s25 = smov 8   ;;  %s2143_s26 = smov 16  }
  0x14   :  { %206 = vadd.xlane.f32.xlu1 %v205_v16  ;;  %v2242_v18 = vadd.f32 %v69_v14, %v65_v17  ;;  %s2144_s27 = smov 24   ;;  %s1893_s13 = sld [smem:[#allocation3 + $0x2]] }
  0x15   :  { %v213_v31 = vsub.f32 1.0, %v212_v30 }
  0x16   :  { %v199_v20 = vsel %vm198_vm3, %v2242_v18, 0.0  ;;  %v68_v21 = vld [vmem:[#allocation2 + $0x18] sm:$0xff] }
  0x17   :  { %200 = vadd.xlane.f32.xlu0 %v199_v20  ;;  %v2249_v22 = vadd.f32 %v72_v19, %v68_v21  ;;  %v214_v32 = vmul.f32 %v1981_v29, %v213_v31 }
  0x19   :  { %v208_v24 = vsel %vm198_vm3, %v2249_v22, 0.0  ;;  %v66_v25 = vld [vmem:[#allocation2 + $0x8] sm:$0xff]  ;;  %v215_v33 = vadd.f32 %v1981_v29, %v214_v32 }
  0x1a   :  { %v2256_v26 = vadd.f32 %v70_v23, %v66_v25 }
  0x1b   :  { %v2260_v34 = vsel %vm216_vm4, %v1981_v29, %v215_v33  ;;  %v1970_v29 = vld [vmem:[%s2801_s4 + $0x20] ss:$0 sm:$0xff] }
  0x1c   :  { %209 = vadd.xlane.f32.xlu1 %v208_v24  ;;  %v202_v27 = vsel %vm198_vm3, %v2256_v26, 0.0 }
  0x1f   :  { %203 = vadd.xlane.f32.xlu0 %v202_v27 }
  0x87   :  { %v207_v35 = vpop.xlane.xlu1 %206 }
  0x88   :  { %v220_v36 = vmul.f32 %v2260_v34, %v207_v35 }
  0x8a   :  { %v2264_v37 = vsub.f32 %v2236_v15, %v220_v36  ;;  %v201_v38 = vpop.xlane.xlu0 %200 }
  0x8b   :  { %v218_v39 = vmul.f32 %v2260_v34, %v201_v38  ;;  %v1971_v38 = vld [vmem:[%s2801_s4 + $0x21] ss:$0 sm:$0xff] }
  0x8c   :  { %v228_v40 = vmul.f32 %v2264_v37, %v2264_v37 }
  0x8d   :  { %v222_v41 = vsub.f32 %v2242_v18, %v218_v39 }
  0x8e   :  { %v236_v42 = vsel %vm198_vm3, %v228_v40, 0.0 }
  0x8f   :  { %v210_v43 = vpop.xlane.xlu1 %209  ;;  %237 = vadd.xlane.f32.xlu0 %v236_v42  ;;  %v226_v44 = vmul.f32 %v222_v41, %v222_v41 }
  0x90   :  { %v221_v45 = vmul.f32 %v2260_v34, %v210_v43 }
  0x91   :  { %v230_v46 = vsel %vm198_vm3, %v226_v44, 0.0 }
  0x92   :  { %v2274_v47 = vsub.f32 %v2249_v22, %v221_v45  ;;  %231 = vadd.xlane.f32.xlu2 %v230_v46  ;;  %v204_v48 = vpop.xlane.xlu0 %203 }
  0x93   :  { %v219_v49 = vmul.f32 %v2260_v34, %v204_v48 }
  0x94   :  { %v229_v50 = vmul.f32 %v2274_v47, %v2274_v47 }
  0x95   :  { %v223_v51 = vsub.f32 %v2256_v26, %v219_v49 }
  0x96   :  { %v239_v52 = vsel %vm198_vm3, %v229_v50, 0.0 }
  0x97   :  { %240 = vadd.xlane.f32.xlu1 %v239_v52  ;;  %v227_v53 = vmul.f32 %v223_v51, %v223_v51 }
  0x99   :  { %v233_v54 = vsel %vm198_vm3, %v227_v53, 0.0 }
  0x9a   :  { %234 = vadd.xlane.f32.xlu2 %v233_v54 }
 0x102   :  { %v238_v57 = vpop.xlane.xlu0 %237 }
 0x103   :  { %v244_v61 = vmul.f32 %v238_v57, %v2260_v34  ;;  %v1972_v57 = vld [vmem:[%s2801_s4 + $0x22] ss:$0 sm:$0xff] }
 0x105   :  { %v232_v56 = vpop.xlane.xlu2 %231  ;;  %v248_v0 = vadd.f32 1e-05, %v244_v61 }
 0x106   :  { %v242_v59 = vmul.f32 %v232_v56, %v2260_v34 }
 0x107   :  { %vm276_vm13 = vweird.f32 %v248_v0 }
 0x108   :  { %v246_v60 = vadd.f32 1e-05, %v242_v59 }
 0x10a   :  { %1982 = vrsqrt.f32 %v246_v60  ;;  %v241_v62 = vpop.xlane.xlu1 %240  ;;  %vm256_vm6 = vweird.f32 %v246_v60 }
 0x10b   :  { %v245_v63 = vmul.f32 %v241_v62, %v2260_v34 }
 0x10d   :  { %v249_v1 = vadd.f32 1e-05, %v245_v63  ;;  %v235_v2 = vpop.xlane.xlu2 %234 }
 0x10e   :  { %v243_v3 = vmul.f32 %v235_v2, %v2260_v34 }
 0x10f   :  { %1984 = vrsqrt.f32 %v249_v1  ;;  %vm286_vm11 = vweird.f32 %v249_v1 }
 0x110   :  { %v1983_v4 = vpop.eup %1982  ;;  %1986 = vrsqrt.f32 %v248_v0  ;;  %v247_v5 = vadd.f32 1e-05, %v243_v3 }
 0x111   :  { %v251_v6 = vmul.f32 %v1983_v4, %v246_v60  ;;  %vm257_vm5 = vweird.f32 %v1983_v4 }
 0x112   :  { %1988 = vrsqrt.f32 %v247_v5  ;;  %vm258_vm7 = vmor %vm256_vm6, %vm257_vm5  ;;  %vm266_vm9 = vweird.f32 %v247_v5 }
 0x113   :  { %v252_v7 = vmul.f32 %v1983_v4, %v251_v6 }
 0x115   :  { %v1985_v8 = vpop.eup %1984  ;;  %v253_v9 = vmul.f32 0.5, %v252_v7 }
 0x116   :  { %v1987_v10 = vpop.eup %1986  ;;  %v281_v12 = vmul.f32 %v1985_v8, %v249_v1  ;;  %vm287_vm12 = vweird.f32 %v1985_v8 }
 0x117   :  { %v254_v11 = vsub.f32 1.5, %v253_v9  ;;  %v271_v16 = vmul.f32 %v1987_v10, %v248_v0  ;;  %vm277_vm14 = vweird.f32 %v1987_v10  ;;  %vm288_vm15 = vmor %vm286_vm11, %vm287_vm12 }
 0x118   :  { %v1989_v13 = vpop.eup %1988  ;;  %v282_v19 = vmul.f32 %v1985_v8, %v281_v12  ;;  %vm278_vm0 = vmor %vm276_vm13, %vm277_vm14 }
 0x119   :  { %v255_v14 = vmul.f32 %v1983_v4, %v254_v11  ;;  %v261_v17 = vmul.f32 %v1989_v13, %v247_v5  ;;  %v272_v23 = vmul.f32 %v1987_v10, %v271_v16  ;;  %vm267_vm8 = vweird.f32 %v1989_v13 }
 0x11a   :  { %v283_v25 = vmul.f32 0.5, %v282_v19  ;;  %vm268_vm10 = vmor %vm266_vm9, %vm267_vm8 }
 0x11b   :  { %v262_v20 = vmul.f32 %v1989_v13, %v261_v17  ;;  %v259_v21 = vsel %vm258_vm7, %v1983_v4, %v255_v14  ;;  %v273_v30 = vmul.f32 0.5, %v272_v23  ;;  %v77_v17 = vlaneseq }
 0x11c   :  { %v290_v28 = vmul.f32 %v259_v21, %v222_v41  ;;  %v284_v32 = vsub.f32 1.5, %v283_v25 }
 0x11d   :  { %v263_v24 = vmul.f32 0.5, %v262_v20  ;;  %v274_v39 = vsub.f32 1.5, %v273_v30  ;;  %v78_v19 = vshrl.u32 %v77_v17, 7  ;;  %v83_v20 = vand.u32 127, %v77_v17 }
 0x11e   :  { %v295_v36 = vmul.f32 %v1970_v29, %v290_v28  ;;  %v285_v41 = vmul.f32 %v1985_v8, %v284_v32 }
 0x11f   :  { %v264_v27 = vsub.f32 1.5, %v263_v24  ;;  %v275_v44 = vmul.f32 %v1987_v10, %v274_v39  ;;  %vm101_vm4 = vcmp.lt.s32.totalorder %v83_v20, 8  ;;  %vm184_vm5 = vcmp.le.s32.totalorder %v83_v20, %v78_v19 }
 0x120   :  { %v300_v42 = vadd.f32 %v1971_v38, %v295_v36  ;;  %v289_v46 = vsel %vm288_vm15, %v1985_v8, %v285_v41  ;;  %vm188_vm6 = vmand %vm101_vm4, %vm184_vm5  ;;  %v79_v21 = vadd.s32 8, %v78_v19  ;;  %vm118_vm7 = vcmp.ge.s32.totalorder %v83_v20, 8 }
 0x121   :  { %v265_v31 = vmul.f32 %v1989_v13, %v264_v27  ;;  %v279_v48 = vsel %vm278_vm0, %v1987_v10, %v275_v44  ;;  %v293_v49 = vmul.f32 %v289_v46, %v2274_v47  ;;  %vm123_vm8 = vcmp.lt.s32.totalorder %v83_v20, 16 }
 0x122   :  { %v292_v50 = vmul.f32 %v279_v48, %v2264_v37  ;;  %v2136_v24 = vmov -1e+09   ;;  %vm125_vm9 = vmand %vm118_vm7, %vm123_vm8  ;;  %v80_v30 = vadd.s32 16, %v78_v19  ;;  %vm144_vm12 = vcmp.ge.s32.totalorder %v83_v20, 16 }
 0x123   :  { %v269_v33 = vsel %vm268_vm10, %v1989_v13, %v265_v31  ;;  %v2362_v25 = vsel %vm188_vm6, 0.0, %v2136_v24  ;;  %vm185_vm10 = vcmp.le.s32.totalorder %v83_v20, %v79_v21  ;;  %vm149_vm13 = vcmp.lt.s32.totalorder %v83_v20, 24 }
 0x124   :  { %v291_v35 = vmul.f32 %v269_v33, %v223_v51  ;;  %v298_v51 = vmul.f32 %v1970_v29, %v293_v49  ;;  %v297_v52 = vmul.f32 %v1970_v29, %v292_v50  ;;  %vm189_vm11 = vmand %vm125_vm9, %vm185_vm10  ;;  %vm186_vm15 = vcmp.le.s32.totalorder %v83_v20, %v80_v30 }
 0x125   :  { %v2366_v32 = vsel %vm189_vm11, 0.0, %v2136_v24  ;;  %vm152_vm14 = vmand %vm144_vm12, %vm149_vm13  ;;  %vm170_vm4 = vcmp.ge.s32.totalorder %v83_v20, 24  ;;  %vm175_vm5 = vcmp.lt.s32.totalorder %v83_v20, 32 }
 0x126   :  { %v296_v40 = vmul.f32 %v1970_v29, %v291_v35  ;;  %v303_v53 = vadd.f32 %v1971_v38, %v298_v51  ;;  %v302_v54 = vadd.f32 %v1971_v38, %v297_v52  ;;  %vm190_vm0 = vmand %vm152_vm14, %vm186_vm15 }
 0x127   :  { %v2370_v39 = vsel %vm190_vm0, 0.0, %v2136_v24  ;;  %vm179_vm6 = vmand %vm170_vm4, %vm175_vm5 }
 0x128   :  { %v301_v43 = vadd.f32 %v1971_v38, %v296_v40  ;;  %v305_v55 = vpack.c.bf16 %v303_v53, %v302_v54 }
 0x12a   :  { %v304_v45 = vpack.c.bf16 %v301_v43, %v300_v42  ;;  %v81_v43 = vadd.s32 24, %v78_v19 }
 0x12c   :  { %1793 = vmatmul.msk.bf16.vlgmr.msra.gmra.mxu0 %vm198_vm3, %v304_v45  ;;  %vm187_vm7 = vcmp.le.s32.totalorder %v83_v20, %v81_v43 }
 0x12d   :  { %vm191_vm8 = vmand %vm179_vm6, %vm187_vm7 }
 0x12e   :  { %v2378_v46 = vsel %vm191_vm8, 0.0, %v2136_v24 }
 0x13c   :  { %1794 = vmatmul.msk.bf16.gmra.mxu0 %vm198_vm3, %v305_v55 }
 0x1a9   :  { %v339_v56 = vpop.f32.mrf.mxu0 }
 0x1aa   :  { %v2312_v60 = vadd.f32 %v1972_v57, %v339_v56 }
 0x1b1   :  { %v341_v58 = vpop.f32.mrf.mxu0 }
 0x1b2   :  { %v2305_v59 = vadd.f32 %v1972_v57, %v341_v58 }
 0x1b4   :  { %355 = vrot.lane.b32.xlu1 %v2305_v59, %s2130_s14  ;;  %v2318_v63 = vpack.c.bf16 %v2305_v59, %v2312_v60 }
 0x1b9   :  { %v344_v47 = vpop.f32.mrf.mxu0 }
 0x1ba   :  { %v2308_v37 = vadd.f32 %v1972_v57, %v344_v47 }
 0x1bc   :  { %558 = vrot.lane.b32.xlu1 %v2305_v59, %s2131_s15  ;;  %357 = vrot.lane.b32.xlu0 %v2308_v37, %s2130_s14 }
 0x1c1   :  { %v346_v61 = vpop.f32.mrf.mxu0 }
 0x1c2   :  { %v2314_v62 = vadd.f32 %v1972_v57, %v346_v61 }
 0x1c4   :  { %517 = vrot.lane.b32.xlu1 %v2318_v63, %s2132_s16  ;;  %359 = vrot.lane.b32.xlu2 %v2314_v62, %s2130_s14  ;;  %v2338_v0 = vpack.c.bf16 %v2314_v62, %v2308_v37 }
 0x1c5   :  { %550 = vrot.lane.b32.xlu0 %v2305_v59, %s2133_s17 }
 0x1cc   :  { %556 = vrot.lane.b32.xlu1 %v2312_v60, %s2131_s15  ;;  %353 = vrot.lane.b32.xlu2 %v2312_v60, %s2130_s14  ;;  %s1895_s14 = sld [smem:[#allocation3 + $0x3]] }
 0x1cd   :  { %562 = vrot.lane.b32.xlu0 %v2314_v62, %s2131_s15 }
 0x1d4   :  { %548 = vrot.lane.b32.xlu1 %v2312_v60, %s2133_s17  ;;  %560 = vrot.lane.b32.xlu2 %v2308_v37, %s2131_s15  ;;  %s1681_s15 = sld [smem:[#allocation3]] }
 0x1dc   :  { %552 = vrot.lane.b32.xlu1 %v2308_v37, %s2133_s17  ;;  %760 = vrot.lane.b32.xlu2 %v2314_v62, %s2134_s18 }
 0x1e4   :  { %958 = vrot.lane.b32.xlu1 %v2314_v62, %s2135_s19 }
 0x1ec   :  { %519 = vrot.lane.b32.xlu1 %v2338_v0, %s2132_s16 }
 0x21e   :  { %v360_v1 = vpop.permute.xlu2 %359 }
 0x21f   :  { %1795 = vmatpush.xpose.msk.msra.mxu1 %vm361_vm2, %v360_v1 }
 0x226   :  { %v356_v2 = vpop.permute.xlu1 %355  ;;  %v354_v6 = vpop.permute.xlu2 %353 }
 0x22e   :  { %v559_v3 = vpop.permute.xlu1 %558  ;;  %v358_v4 = vpop.permute.xlu0 %357 }
 0x22f   :  { %1796 = vmatpush.xpose.msk.msra.mxu1 %vm361_vm2, %v358_v4  ;;  %v561_v10 = vpop.permute.xlu2 %560 }
 0x233   :  { %1797 = vmatpush.xpose.msk.msra.mxu1 %vm361_vm2, %v356_v2 }
 0x236   :  { %v518_v5 = vpop.permute.xlu1 %517 }
 0x237   :  { %v551_v7 = vpop.permute.xlu0 %550  ;;  %1798 = vmatpush.xpose.msk.msra.mxu1 %vm361_vm2, %v354_v6  ;;  %v761_v16 = vpop.permute.xlu2 %760 }
 0x23a   :  { %1799 = vmatmul.msk.f32.vlgmr.msra.gmra.mxu1 %vm361_vm2, %v2312_v60 }
 0x23e   :  { %v557_v8 = vpop.permute.xlu1 %556 }
 0x23f   :  { %v563_v9 = vpop.permute.xlu0 %562 }
 0x240   :  { %1805 = vmatpush.xpose.msk.msra.mxu3 %vm361_vm2, %v563_v9 }
 0x242   :  { %1800 = vmatmul.msk.f32.gmra.mxu1 %vm361_vm2, %v2305_v59 }
 0x244   :  { %1806 = vmatpush.xpose.msk.msra.mxu3 %vm361_vm2, %v561_v10 }
 0x246   :  { %v549_v11 = vpop.permute.xlu1 %548 }
 0x248   :  { %1807 = vmatpush.xpose.msk.msra.mxu3 %vm361_vm2, %v559_v3 }
 0x24a   :  { %1801 = vmatmul.msk.f32.gmra.mxu1 %vm361_vm2, %v2308_v37 }
 0x24c   :  { %1808 = vmatpush.xpose.msk.msra.mxu3 %vm361_vm2, %v557_v8 }
 0x24e   :  { %v553_v12 = vpop.permute.xlu1 %552 }
 0x24f   :  { %1809 = vmatmul.msk.f32.vlgmr.msra.gmra.mxu3 %vm361_vm2, %v549_v11 }
 0x252   :  { %1802 = vmatmul.msk.f32.gmra.mxu1 %vm361_vm2, %v2314_v62 }
 0x256   :  { %v959_v13 = vpop.permute.xlu1 %958 }
 0x257   :  { %1810 = vmatmul.msk.f32.gmra.mxu3 %vm361_vm2, %v551_v7 }
 0x258   :  { %1825 = vmatpush.xpose.msk.msrb.mxu3 %vm361_vm2, %v959_v13 }
 0x25e   :  { %v520_v14 = vpop.permute.xlu1 %519 }
 0x25f   :  { %1811 = vmatmul.msk.f32.gmra.mxu3 %vm361_vm2, %v553_v12  ;;  %535 = vmatpush.bf16.msra.mxu2 %v520_v14 }
 0x263   :  { %536 = vmatpush.bf16.msra.mxu2 %v518_v5 }
 0x267   :  { %1815 = vmatpush.xpose.msk.msrb.mxu2 %vm361_vm2, %v761_v16 }
 0x2b7   :  { %v395_v23 = vpop.f32.mrf.mxu1 }
 0x2b8   :  { %v407_v27 = vmul.f32 0.35355338, %v395_v23 }
 0x2ba   :  { %v411_v28 = vadd.f32 %v407_v27, %v2362_v25 }
 0x2bc   :  { %v415_v29 = vsel %vm198_vm3, %v411_v28, -inf }
 0x2bd   :  { %416 = vmax.xlane.f32.xlu0 %v415_v29 }
 0x2bf   :  { %v398_v31 = vpop.f32.mrf.mxu1 }
 0x2c0   :  { %v408_v33 = vmul.f32 0.35355338, %v398_v31 }
 0x2c2   :  { %v412_v35 = vadd.f32 %v408_v33, %v2366_v32 }
 0x2c4   :  { %v418_v36 = vsel %vm198_vm3, %v412_v35, -inf }
 0x2c5   :  { %419 = vmax.xlane.f32.xlu2 %v418_v36 }
 0x2c7   :  { %v401_v38 = vpop.f32.mrf.mxu1 }
 0x2c8   :  { %v409_v40 = vmul.f32 0.35355338, %v401_v38 }
 0x2ca   :  { %v413_v41 = vadd.f32 %v409_v40, %v2370_v39 }
 0x2cc   :  { %v421_v42 = vsel %vm198_vm3, %v413_v41, -inf }
 0x2cd   :  { %422 = vmax.xlane.f32.xlu1 %v421_v42 }
 0x2cf   :  { %v404_v44 = vpop.f32.mrf.mxu1 }
 0x2d0   :  { %v410_v45 = vmul.f32 0.35355338, %v404_v44 }
 0x2d1   :  { %956 = vrot.lane.b32.xlu0 %v2308_v37, %s2135_s19 }
 0x2d2   :  { %v414_v48 = vadd.f32 %v410_v45, %v2378_v46  ;;  %v597_v13 = vpop.f32.mrf.mxu3 }
 0x2d3   :  { %v609_v14 = vmul.f32 0.35355338, %v597_v13 }
 0x2d4   :  { %v424_v49 = vsel %vm198_vm3, %v414_v48, -inf }
 0x2d5   :  { %v2418_v17 = vadd.f32 %v609_v14, %v2362_v25 }
 0x2da   :  { %v600_v16 = vpop.f32.mrf.mxu3 }
 0x2db   :  { %v610_v45 = vmul.f32 0.35355338, %v600_v16 }
 0x2e2   :  { %v603_v19 = vpop.f32.mrf.mxu3 }
 0x2e3   :  { %v611_v20 = vmul.f32 0.35355338, %v603_v19 }
 0x2e5   :  { %v2424_v21 = vadd.f32 %v611_v20, %v2370_v39 }
 0x2e6   :  { %758 = vrot.lane.b32.xlu1 %v2308_v37, %s2134_s18 }
 0x2e7   :  { %v623_v23 = vsel %vm198_vm3, %v2424_v21, -inf }
 0x2fb   :  { %425 = vmax.xlane.f32.xlu0 %v424_v49 }
 0x30f   :  { %756 = vrot.lane.b32.xlu0 %v2305_v59, %s2134_s18 }
 0x330   :  { %v417_v50 = vpop.xlane.xlu0 %416 }
 0x331   :  { %v427_v51 = vsub.f32 %v411_v28, %v417_v50 }
 0x333   :  { %v431_v52 = vmul.f32 1.442695, %v427_v51 }
 0x335   :  { %1990 = vpow2.f32 %v431_v52 }
 0x338   :  { %v420_v53 = vpop.xlane.xlu2 %419 }
 0x339   :  { %v428_v54 = vsub.f32 %v412_v35, %v420_v53 }
 0x33b   :  { %v2384_v55 = vpop.eup %1990  ;;  %v433_v56 = vmul.f32 1.442695, %v428_v54 }
 0x33c   :  { %v439_v57 = vsel %vm198_vm3, %v2384_v55, 0.0 }
 0x33d   :  { %1992 = vpow2.f32 %v433_v56  ;;  %440 = vadd.xlane.f32.xlu2 %v439_v57  ;;  %v2433_v56 = vadd.f32 %v610_v45, %v2366_v32 }
 0x340   :  { %v423_v58 = vpop.xlane.xlu1 %422 }
 0x341   :  { %v429_v47 = vsub.f32 %v413_v41, %v423_v58 }
 0x343   :  { %v2388_v61 = vpop.eup %1992  ;;  %v435_v1 = vmul.f32 1.442695, %v429_v47  ;;  %v957_v2 = vpop.permute.xlu0 %956  ;;  %v620_v47 = vsel %vm198_vm3, %v2433_v56, -inf }
 0x344   :  { %1826 = vmatpush.xpose.msk.msrb.mxu3 %vm361_vm2, %v957_v2  ;;  %v442_v3 = vsel %vm198_vm3, %v2388_v61, 0.0 }
 0x345   :  { %1994 = vpow2.f32 %v435_v1  ;;  %443 = vadd.xlane.f32.xlu1 %v442_v3 }
 0x34b   :  { %v2393_v4 = vpop.eup %1994 }
 0x34c   :  { %v445_v5 = vsel %vm198_vm3, %v2393_v4, 0.0 }
 0x34d   :  { %446 = vadd.xlane.f32.xlu0 %v445_v5 }
 0x355   :  { %954 = vrot.lane.b32.xlu2 %v2305_v59, %s2135_s19 }
 0x358   :  { %v759_v6 = vpop.permute.xlu1 %758 }
 0x359   :  { %1816 = vmatpush.xpose.msk.msrb.mxu2 %vm361_vm2, %v759_v6 }
 0x35e   :  { %554 = vrot.lane.b32.xlu1 %v2314_v62, %s2133_s17  ;;  %s1781_s17 = scalar_lea.vmem [#allocation2], %s1893_s13 }
 0x361   :  { %952 = vrot.lane.b32.xlu0 %v2312_v60, %s2135_s19  ;;  %s1682_s19 = scalar_lea.vmem [#allocation2], %s1681_s15 }
 0x366   :  { %754 = vrot.lane.b32.xlu1 %v2312_v60, %s2134_s18  ;;  %s1783_s18 = scalar_lea.vmem [#allocation2], %s1895_s14 }
 0x369   :  { %748 = vrot.lane.b32.xlu0 %v2305_v59, %s2137_s20 }
 0x36e   :  { %v426_v7 = vpop.xlane.xlu0 %425  ;;  %944 = vrot.lane.b32.xlu1 %v2312_v60, %s2138_s21 }
 0x36f   :  { %v430_v8 = vsub.f32 %v414_v48, %v426_v7 }
 0x371   :  { %v437_v9 = vmul.f32 1.442695, %v430_v8  ;;  %948 = vrot.lane.b32.xlu0 %v2308_v37, %s2138_s21 }
 0x373   :  { %1996 = vpow2.f32 %v437_v9 }
 0x376   :  { %750 = vrot.lane.b32.xlu1 %v2308_v37, %s2137_s20  ;;  %v617_v37 = vsel %vm198_vm3, %v2418_v17, -inf }
 0x379   :  { %v2410_v10 = vpop.eup %1996 }
 0x37a   :  { %v448_v11 = vsel %vm198_vm3, %v2410_v10, 0.0 }
 0x37e   :  { %449 = vadd.xlane.f32.xlu2 %v448_v11  ;;  %950 = vrot.lane.b32.xlu1 %v2314_v62, %s2138_s21 }
 0x381   :  { %v757_v12 = vpop.permute.xlu0 %756 }
 0x382   :  { %1817 = vmatpush.xpose.msk.msrb.mxu2 %vm361_vm2, %v757_v12 }
 0x396   :  { %746 = vrot.lane.b32.xlu2 %v2312_v60, %s2137_s20 }
 0x39b   :  { %618 = vmax.xlane.f32.xlu0 %v617_v37 }
 0x39e   :  { %946 = vrot.lane.b32.xlu2 %v2305_v59, %s2138_s21 }
 0x3a6   :  { %752 = vrot.lane.b32.xlu2 %v2314_v62, %s2137_s20  ;;  %s2145_s20 = smov [#allocation6]  }
 0x3a7   :  { %s1766_s21 = sshll.u32 %s2145_s20, 4  ;;  %s1767_s21 = int_to_ptr.vmem [resolvable:$true] %s1766_s21 }
 0x3a8   :  { %624 = vmax.xlane.f32.xlu1 %v623_v23 }
 0x3b0   :  { %v441_v60 = vpop.xlane.xlu2 %440 }
 0x3b1   :  { %1998 = vrcp.f32 %v441_v60  ;;  %v462_v62 = vand.u32 2147483648, %v441_v60  ;;  %vm456_vm10 = vweird.f32 %v441_v60  ;;  %v460_v36 = vand.u32 2147483647, %v441_v60 }
 0x3b3   :  { %v463_v44 = vor.u32 1.1754944e-38, %v462_v62  ;;  %vm461_vm13 = vcmp.eq.f32.partialorder %v460_v36, 8.507059e+37 }
 0x3b7   :  { %v1999_v24 = vpop.eup %1998 }
 0x3b8   :  { %v452_v27 = vmul.f32 %v1999_v24, %v441_v60  ;;  %v955_v28 = vpop.permute.xlu2 %954  ;;  %v444_v29 = vpop.xlane.xlu1 %443  ;;  %vm457_vm9 = vweird.f32 %v1999_v24 }
 0x3b9   :  { %2000 = vrcp.f32 %v444_v29  ;;  %1827 = vmatpush.xpose.msk.msrb.mxu3 %vm361_vm2, %v955_v28  ;;  %vm458_vm11 = vmor %vm456_vm10, %vm457_vm9  ;;  %v476_v40 = vand.u32 2147483648, %v444_v29  ;;  %v474_v42 = vand.u32 2147483647, %v444_v29  ;;  %vm470_vm14 = vweird.f32 %v444_v29 }
 0x3ba   :  { %v453_v59 = vsub.f32 1.0, %v452_v27 }
 0x3bb   :  { %v477_v49 = vor.u32 1.1754944e-38, %v476_v40  ;;  %vm475_vm0 = vcmp.eq.f32.partialorder %v474_v42, 8.507059e+37 }
 0x3bc   :  { %v454_v30 = vmul.f32 %v1999_v24, %v453_v59 }
 0x3be   :  { %v455_v33 = vadd.f32 %v1999_v24, %v454_v30 }
 0x3bf   :  { %v2001_v31 = vpop.eup %2000 }
 0x3c0   :  { %v466_v35 = vmul.f32 %v2001_v31, %v444_v29  ;;  %vm471_vm12 = vweird.f32 %v2001_v31  ;;  %v459_v43 = vsel %vm458_vm11, %v1999_v24, %v455_v33  ;;  %v447_v57 = vpop.xlane.xlu0 %446 }
 0x3c1   :  { %vm472_vm15 = vmor %vm470_vm14, %vm471_vm12  ;;  %v464_v50 = vsel %vm461_vm13, %v463_v44, %v459_v43  ;;  %2002 = vrcp.f32 %v447_v57  ;;  %v490_v14 = vand.u32 2147483648, %v447_v57  ;;  %vm484_vm5 = vweird.f32 %v447_v57 }
 0x3c2   :  { %v467_v38 = vsub.f32 1.0, %v466_v35  ;;  %v507_v53 = vmul.f32 %v2384_v55, %v464_v50  ;;  %v488_v16 = vand.u32 2147483647, %v447_v57 }
 0x3c3   :  { %v491_v24 = vor.u32 1.1754944e-38, %v490_v14 }
 0x3c4   :  { %v468_v41 = vmul.f32 %v2001_v31, %v467_v38  ;;  %vm489_vm8 = vcmp.eq.f32.partialorder %v488_v16, 8.507059e+37 }
 0x3c6   :  { %v469_v48 = vadd.f32 %v2001_v31, %v468_v41 }
 0x3c7   :  { %v2003_v3 = vpop.eup %2002 }
 0x3c8   :  { %v473_v51 = vsel %vm472_vm15, %v2001_v31, %v469_v48  ;;  %v480_v5 = vmul.f32 %v2003_v3, %v447_v57  ;;  %vm485_vm4 = vweird.f32 %v2003_v3 }
 0x3c9   :  { %v478_v52 = vsel %vm475_vm0, %v477_v49, %v473_v51  ;;  %vm486_vm6 = vmor %vm484_vm5, %vm485_vm4 }
 0x3ca   :  { %v508_v54 = vmul.f32 %v2388_v61, %v478_v52  ;;  %v481_v6 = vsub.f32 1.0, %v480_v5 }
 0x3cc   :  { %v511_v58 = vpack.c.bf16 %v508_v54, %v507_v53  ;;  %v482_v8 = vmul.f32 %v2003_v3, %v481_v6 }
 0x3ce   :  { %1803 = vmatmul.msk.bf16.vlgmr.msra.gmra.mxu2 %vm198_vm3, %v511_v58  ;;  %v483_v11 = vadd.f32 %v2003_v3, %v482_v8 }
 0x3cf   :  { %621 = vmax.xlane.f32.xlu2 %v620_v47 }
 0x3d0   :  { %v555_v1 = vpop.permute.xlu1 %554  ;;  %v487_v60 = vsel %vm486_vm6, %v2003_v3, %v483_v11 }
 0x3d1   :  { %1812 = vmatmul.msk.f32.gmra.mxu3 %vm361_vm2, %v555_v1  ;;  %v492_v59 = vsel %vm489_vm8, %v491_v24, %v487_v60 }
 0x3d2   :  { %v509_v35 = vmul.f32 %v2393_v4, %v492_v59 }
 0x3d3   :  { %v953_v2 = vpop.permute.xlu0 %952 }
 0x3d4   :  { %1828 = vmatpush.xpose.msk.msrb.mxu3 %vm361_vm2, %v953_v2 }
 0x3d8   :  { %v755_v55 = vpop.permute.xlu1 %754 }
 0x3d9   :  { %1818 = vmatpush.xpose.msk.msrb.mxu2 %vm361_vm2, %v755_v55 }
 0x3db   :  { %v749_v27 = vpop.permute.xlu0 %748 }
 0x3e0   :  { %v945_v61 = vpop.permute.xlu1 %944 }
 0x3e1   :  { %1829 = vmatmul.msk.f32.vlgmr.msrb.gmra.mxu3 %vm361_vm2, %v945_v61 }
 0x3e3   :  { %v949_v40 = vpop.permute.xlu0 %948 }
 0x3e8   :  { %v751_v38 = vpop.permute.xlu1 %750 }
 0x3f0   :  { %v951_v41 = vpop.permute.xlu1 %950 }
 0x3f1   :  { %v450_v7 = vpop.xlane.xlu2 %449 }
 0x3f2   :  { %2004 = vrcp.f32 %v450_v7  ;;  %v504_v19 = vand.u32 2147483648, %v450_v7  ;;  %v502_v23 = vand.u32 2147483647, %v450_v7  ;;  %vm498_vm9 = vweird.f32 %v450_v7 }
 0x3f4   :  { %v505_v29 = vor.u32 1.1754944e-38, %v504_v19  ;;  %vm503_vm11 = vcmp.eq.f32.partialorder %v502_v23, 8.507059e+37 }
 0x3f8   :  { %v2005_v9 = vpop.eup %2004 }
 0x3f9   :  { %v494_v12 = vmul.f32 %v2005_v9, %v450_v7  ;;  %v747_v13 = vpop.permute.xlu2 %746  ;;  %vm499_vm7 = vweird.f32 %v2005_v9 }
 0x3fa   :  { %vm500_vm10 = vmor %vm498_vm9, %vm499_vm7 }
 0x3fb   :  { %v495_v37 = vsub.f32 1.0, %v494_v12 }
 0x3fd   :  { %v496_v20 = vmul.f32 %v2005_v9, %v495_v37 }
 0x3ff   :  { %v497_v28 = vadd.f32 %v2005_v9, %v496_v20 }
 0x401   :  { %v947_v30 = vpop.permute.xlu2 %946  ;;  %v501_v31 = vsel %vm500_vm10, %v2005_v9, %v497_v28 }
 0x402   :  { %1830 = vmatmul.msk.f32.gmra.mxu3 %vm361_vm2, %v947_v30  ;;  %v506_v33 = vsel %vm503_vm11, %v505_v29, %v501_v31 }
 0x403   :  { %v510_v62 = vmul.f32 %v2410_v10, %v506_v33 }
 0x405   :  { %v512_v36 = vpack.c.bf16 %v510_v62, %v509_v35 }
 0x407   :  { %1804 = vmatmul.msk.bf16.gmra.mxu2 %vm198_vm3, %v512_v36 }
 0x409   :  { %v753_v42 = vpop.permute.xlu2 %752 }
 0x40a   :  { %1831 = vmatmul.msk.f32.gmra.mxu3 %vm361_vm2, %v949_v40 }
 0x40e   :  { %v619_v45 = vpop.xlane.xlu0 %618 }
 0x40f   :  { %v629_v48 = vsub.f32 %v2418_v17, %v619_v45 }
 0x411   :  { %v633_v49 = vmul.f32 1.442695, %v629_v48 }
 0x412   :  { %1832 = vmatmul.msk.f32.gmra.mxu3 %vm361_vm2, %v951_v41 }
 0x413   :  { %2006 = vpow2.f32 %v633_v49 }
 0x417   :  { %1819 = vmatmul.msk.f32.vlgmr.msrb.gmra.mxu2 %vm361_vm2, %v747_v13 }
 0x419   :  { %v2464_v47 = vpop.eup %2006 }
 0x41a   :  { %v641_v17 = vsel %vm198_vm3, %v2464_v47, 0.0 }
 0x41b   :  { %v625_v51 = vpop.xlane.xlu1 %624 }
 0x41c   :  { %v631_v54 = vsub.f32 %v2424_v21, %v625_v51 }
 0x41e   :  { %v637_v58 = vmul.f32 1.442695, %v631_v54 }
 0x41f   :  { %1820 = vmatmul.msk.f32.gmra.mxu2 %vm361_vm2, %v749_v27 }
 0x420   :  { %2008 = vpow2.f32 %v637_v58 }
 0x426   :  { %v2468_v1 = vpop.eup %2008 }
 0x427   :  { %1821 = vmatmul.msk.f32.gmra.mxu2 %vm361_vm2, %v751_v38  ;;  %v647_v55 = vsel %vm198_vm3, %v2468_v1, 0.0 }
 0x42f   :  { %1822 = vmatmul.msk.f32.gmra.mxu2 %vm361_vm2, %v753_v42 }
 0x442   :  { %v622_v3 = vpop.xlane.xlu2 %621 }
 0x443   :  { %v630_v7 = vsub.f32 %v2433_v56, %v622_v3 }
 0x445   :  { %v635_v11 = vmul.f32 1.442695, %v630_v7 }
 0x447   :  { %2010 = vpow2.f32 %v635_v11 }
 0x44d   :  { %v2487_v20 = vpop.eup %2010 }
 0x44e   :  { %v644_v24 = vsel %vm198_vm3, %v2487_v20, 0.0 }
 0x451   :  { %v2470_v2 = vpop.f32.mrf.mxu2 }
 0x454   :  { %v606_v4 = vpop.f32.mrf.mxu3 }
 0x455   :  { %v612_v10 = vmul.f32 0.35355338, %v606_v4 }
 0x457   :  { %v2453_v43 = vadd.f32 %v612_v10, %v2378_v46 }
 0x459   :  { %v626_v44 = vsel %vm198_vm3, %v2453_v43, -inf  ;;  %v2474_v21 = vpop.f32.mrf.mxu2 }
 0x45a   :  { %627 = vmax.xlane.f32.xlu0 %v626_v44 }
 0x464   :  { %v993_v50 = vpop.f32.mrf.mxu3 }
 0x465   :  { %v1005_v52 = vmul.f32 0.35355338, %v993_v50 }
 0x467   :  { %v2459_v53 = vadd.f32 %v1005_v52, %v2362_v25 }
 0x469   :  { %v1013_v57 = vsel %vm198_vm3, %v2459_v53, -inf }
 0x46a   :  { %1014 = vmax.xlane.f32.xlu0 %v1013_v57 }
 0x472   :  { %642 = vadd.xlane.f32.xlu0 %v641_v17 }
 0x47a   :  { %648 = vadd.xlane.f32.xlu0 %v647_v55 }
 0x485   :  { %v996_v61 = vpop.f32.mrf.mxu3 }
 0x486   :  { %v1006_v5 = vmul.f32 0.35355338, %v996_v61 }
 0x488   :  { %v1010_v6 = vadd.f32 %v1006_v5, %v2366_v32 }
 0x48a   :  { %v2478_v8 = vpop.f32.mrf.mxu2  ;;  %v1016_v9 = vsel %vm198_vm3, %v1010_v6, -inf }
 0x48b   :  { %1017 = vmax.xlane.f32.xlu2 %v1016_v9 }
 0x48d   :  { %v999_v12 = vpop.f32.mrf.mxu3 }
 0x48e   :  { %v1007_v13 = vmul.f32 0.35355338, %v999_v12  ;;  %715 = vrot.lane.b32.xlu0 %v2318_v63, %s2139_s22 }
 0x490   :  { %v1011_v14 = vadd.f32 %v1007_v13, %v2370_v39 }
 0x492   :  { %v2484_v16 = vpop.f32.mrf.mxu2  ;;  %v1019_v37 = vsel %vm198_vm3, %v1011_v14, -inf }
 0x493   :  { %1020 = vmax.xlane.f32.xlu2 %v1019_v37 }
 0x495   :  { %v1002_v56 = vpop.f32.mrf.mxu3 }
 0x496   :  { %v1008_v19 = vmul.f32 0.35355338, %v1002_v56 }
 0x498   :  { %v2490_v23 = vadd.f32 %v1008_v19, %v2378_v46 }
 0x49a   :  { %v795_v60 = vpop.f32.mrf.mxu2  ;;  %v1022_v27 = vsel %vm198_vm3, %v2490_v23, -inf }
 0x49b   :  { %v807_v28 = vmul.f32 0.35355338, %v795_v60  ;;  %645 = vadd.xlane.f32.xlu2 %v644_v24  ;;  %1023 = vmax.xlane.f32.xlu1 %v1022_v27 }
 0x49d   :  { %v811_v29 = vadd.f32 %v807_v28, %v2362_v25 }
 0x49f   :  { %v815_v30 = vsel %vm198_vm3, %v811_v29, -inf }
 0x4a2   :  { %v798_v59 = vpop.f32.mrf.mxu2 }
 0x4a3   :  { %v808_v31 = vmul.f32 0.35355338, %v798_v59  ;;  %816 = vmax.xlane.f32.xlu2 %v815_v30 }
 0x4a5   :  { %v812_v33 = vadd.f32 %v808_v31, %v2366_v32 }
 0x4a7   :  { %v818_v35 = vsel %vm198_vm3, %v812_v33, -inf }
 0x4a8   :  { %819 = vmax.xlane.f32.xlu1 %v818_v35 }
 0x4aa   :  { %v801_v62 = vpop.f32.mrf.mxu2 }
 0x4ab   :  { %v809_v45 = vmul.f32 0.35355338, %v801_v62 }
 0x4ad   :  { %v2516_v49 = vadd.f32 %v809_v45, %v2370_v39 }
 0x4b2   :  { %v804_v36 = vpop.f32.mrf.mxu2 }
 0x4b3   :  { %v810_v38 = vmul.f32 0.35355338, %v804_v36 }
 0x4b5   :  { %v2501_v40 = vadd.f32 %v810_v38, %v2378_v46 }
 0x4b7   :  { %v824_v41 = vsel %vm198_vm3, %v2501_v40, -inf }
 0x4b8   :  { %825 = vmax.xlane.f32.xlu0 %v824_v41 }
 0x4c1   :  { %717 = vrot.lane.b32.xlu1 %v2338_v0, %s2139_s22 }
 0x4cc   :  { %915 = vrot.lane.b32.xlu0 %v2338_v0, %s2140_s23 }
 0x4cd   :  { %v628_v25 = vpop.xlane.xlu0 %627 }
 0x4ce   :  { %v632_v32 = vsub.f32 %v2453_v43, %v628_v25  ;;  %v821_v43 = vsel %vm198_vm3, %v2516_v49, -inf }
 0x4d0   :  { %v639_v42 = vmul.f32 1.442695, %v632_v32 }
 0x4d2   :  { %2012 = vpow2.f32 %v639_v42 }
 0x4d8   :  { %v2510_v4 = vpop.eup %2012 }
 0x4d9   :  { %v650_v46 = vsel %vm198_vm3, %v2510_v4, 0.0 }
 0x4da   :  { %651 = vadd.xlane.f32.xlu2 %v650_v46 }
 0x4dd   :  { %v1015_v10 = vpop.xlane.xlu0 %1014 }
 0x4de   :  { %v1025_v44 = vsub.f32 %v2459_v53, %v1015_v10 }
 0x4e0   :  { %v1029_v48 = vmul.f32 1.442695, %v1025_v44 }
 0x4e2   :  { %2014 = vpow2.f32 %v1029_v48 }
 0x4e5   :  { %v643_v5 = vpop.xlane.xlu0 %642 }
 0x4e6   :  { %v664_v10 = vand.u32 2147483648, %v643_v5  ;;  %vm658_vm0 = vweird.f32 %v643_v5  ;;  %v662_v45 = vand.u32 2147483647, %v643_v5 }
 0x4e8   :  { %v2520_v50 = vpop.eup %2014  ;;  %vm663_vm6 = vcmp.eq.f32.partialorder %v662_v45, 8.507059e+37 }
 0x4e9   :  { %v1037_v51 = vsel %vm198_vm3, %v2520_v50, 0.0 }
 0x4eb   :  { %822 = vmax.xlane.f32.xlu1 %v821_v43 }
 0x4ed   :  { %v2534_v13 = vpop.xlane.xlu0 %648 }
 0x4ee   :  { %vm686_vm8 = vweird.f32 %v2534_v13 }
 0x4f3   :  { %1038 = vadd.xlane.f32.xlu1 %v1037_v51 }
 0x4fe   :  { %v1018_v52 = vpop.xlane.xlu2 %1017 }
 0x4ff   :  { %v1026_v54 = vsub.f32 %v1010_v6, %v1018_v52  ;;  %v665_v52 = vor.u32 1.1754944e-38, %v664_v10 }
 0x500   :  { %v716_v30 = vpop.permute.xlu0 %715 }
 0x501   :  { %v1031_v57 = vmul.f32 1.442695, %v1026_v54 }
 0x503   :  { %2016 = vpow2.f32 %v1031_v57 }
 0x506   :  { %v1021_v53 = vpop.xlane.xlu2 %1020 }
 0x507   :  { %v1027_v58 = vsub.f32 %v1011_v14, %v1021_v53 }
 0x509   :  { %v2524_v17 = vpop.eup %2016  ;;  %v1033_v39 = vmul.f32 1.442695, %v1027_v58 }
 0x50a   :  { %v1040_v55 = vsel %vm198_vm3, %v2524_v17, 0.0 }
 0x50b   :  { %2018 = vpow2.f32 %v1033_v39  ;;  %1041 = vadd.xlane.f32.xlu2 %v1040_v55 }
 0x50e   :  { %v646_v61 = vpop.xlane.xlu2 %645  ;;  %v2532_v6 = vpop.xlane.xlu1 %1023 }
 0x50f   :  { %2020 = vrcp.f32 %v646_v61  ;;  %v678_v25 = vand.u32 2147483648, %v646_v61  ;;  %vm672_vm14 = vweird.f32 %v646_v61  ;;  %v676_v46 = vand.u32 2147483647, %v646_v61 }
 0x510   :  { %2022 = vrcp.f32 %v643_v5 }
 0x511   :  { %v2528_v3 = vpop.eup %2018  ;;  %v679_v43 = vor.u32 1.1754944e-38, %v678_v25  ;;  %vm677_vm5 = vcmp.eq.f32.partialorder %v676_v46, 8.507059e+37 }
 0x512   :  { %v1043_v7 = vsel %vm198_vm3, %v2528_v3, 0.0 }
 0x513   :  { %1044 = vadd.xlane.f32.xlu1 %v1043_v7 }
 0x515   :  { %v2021_v37 = vpop.eup %2020 }
 0x516   :  { %v817_v9 = vpop.xlane.xlu2 %816  ;;  %v2023_v19 = vpop.eup %2022  ;;  %v668_v24 = vmul.f32 %v2021_v37, %v646_v61  ;;  %vm673_vm12 = vweird.f32 %v2021_v37 }
 0x517   :  { %v827_v11 = vsub.f32 %v811_v29, %v817_v9  ;;  %v654_v28 = vmul.f32 %v2023_v19, %v643_v5  ;;  %vm659_vm13 = vweird.f32 %v2023_v19  ;;  %vm674_vm15 = vmor %vm672_vm14, %vm673_vm12 }
 0x518   :  { %v669_v29 = vsub.f32 1.0, %v668_v24  ;;  %vm660_vm4 = vmor %vm658_vm0, %vm659_vm13 }
 0x519   :  { %v831_v12 = vmul.f32 1.442695, %v827_v11  ;;  %v655_v31 = vsub.f32 1.0, %v654_v28 }
 0x51a   :  { %v670_v62 = vmul.f32 %v2021_v37, %v669_v29 }
 0x51b   :  { %2024 = vpow2.f32 %v831_v12  ;;  %v820_v14 = vpop.xlane.xlu1 %819  ;;  %v656_v36 = vmul.f32 %v2023_v19, %v655_v31 }
 0x51c   :  { %v828_v56 = vsub.f32 %v812_v33, %v820_v14  ;;  %v671_v38 = vadd.f32 %v2021_v37, %v670_v62 }
 0x51d   :  { %v657_v42 = vadd.f32 %v2023_v19, %v656_v36 }
 0x51e   :  { %v833_v60 = vmul.f32 1.442695, %v828_v56  ;;  %v675_v48 = vsel %vm674_vm15, %v2021_v37, %v671_v38  ;;  %v692_v56 = vand.u32 2147483648, %v2534_v13 }
 0x51f   :  { %v661_v51 = vsel %vm660_vm4, %v2023_v19, %v657_v42  ;;  %v690_v19 = vand.u32 2147483647, %v2534_v13  ;;  %v1028_v42 = vsub.f32 %v2490_v23, %v2532_v6 }
 0x520   :  { %2026 = vpow2.f32 %v833_v60  ;;  %v666_v57 = vsel %vm663_vm6, %v665_v52, %v661_v51 }
 0x521   :  { %v2536_v27 = vpop.eup %2024  ;;  %v709_v55 = vmul.f32 %v2464_v47, %v666_v57  ;;  %vm691_vm11 = vcmp.eq.f32.partialorder %v690_v19, 8.507059e+37  ;;  %v1035_v46 = vmul.f32 1.442695, %v1028_v42 }
 0x522   :  { %v839_v59 = vsel %vm198_vm3, %v2536_v27, 0.0 }
 0x523   :  { %840 = vadd.xlane.f32.xlu2 %v839_v59  ;;  %v693_v59 = vor.u32 1.1754944e-38, %v692_v56 }
 0x526   :  { %v2540_v35 = vpop.eup %2026 }
 0x527   :  { %v842_v33 = vsel %vm198_vm3, %v2540_v35, 0.0 }
 0x52b   :  { %v826_v41 = vpop.xlane.xlu0 %825  ;;  %843 = vadd.xlane.f32.xlu2 %v842_v33 }
 0x52c   :  { %v830_v32 = vsub.f32 %v2501_v40, %v826_v41  ;;  %913 = vrot.lane.b32.xlu1 %v2318_v63, %s2140_s23  ;;  %v680_v40 = vsel %vm677_vm5, %v679_v43, %v675_v48 }
 0x52d   :  { %v710_v53 = vmul.f32 %v2487_v20, %v680_v40 }
 0x52e   :  { %v837_v44 = vmul.f32 1.442695, %v830_v32 }
 0x52f   :  { %v713_v61 = vpack.c.bf16 %v710_v53, %v709_v55 }
 0x530   :  { %2028 = vpow2.f32 %v837_v44 }
 0x531   :  { %2030 = vrcp.f32 %v2534_v13 }
 0x533   :  { %v718_v54 = vpop.permute.xlu1 %717 }
 0x534   :  { %733 = vmatpush.bf16.msrb.mxu0 %v718_v54 }
 0x536   :  { %v2548_v58 = vpop.eup %2028 }
 0x537   :  { %v848_v39 = vsel %vm198_vm3, %v2548_v58, 0.0  ;;  %v2031_v20 = vpop.eup %2030 }
 0x538   :  { %849 = vadd.xlane.f32.xlu0 %v848_v39  ;;  %734 = vmatpush.bf16.msrb.mxu0 %v716_v30  ;;  %v682_v7 = vmul.f32 %v2031_v20, %v2534_v13  ;;  %vm687_vm7 = vweird.f32 %v2031_v20 }
 0x539   :  { %vm688_vm9 = vmor %vm686_vm8, %vm687_vm7 }
 0x53a   :  { %v683_v9 = vsub.f32 1.0, %v682_v7 }
 0x53b   :  { %1813 = vmatmul.msk.bf16.vlgmr.msrb.gmra.mxu0 %vm198_vm3, %v713_v61 }
 0x53c   :  { %v684_v47 = vmul.f32 %v2031_v20, %v683_v9 }
 0x53e   :  { %v916_v5 = vpop.permute.xlu0 %915  ;;  %v685_v14 = vadd.f32 %v2031_v20, %v684_v47 }
 0x53f   :  { %931 = vmatpush.bf16.msrb.mxu1 %v916_v5 }
 0x540   :  { %v689_v28 = vsel %vm688_vm9, %v2031_v20, %v685_v14 }
 0x541   :  { %v694_v31 = vsel %vm691_vm11, %v693_v59, %v689_v28 }
 0x542   :  { %v711_v38 = vmul.f32 %v2468_v1, %v694_v31 }
 0x543   :  { %1113 = vrot.lane.b32.xlu2 %v2338_v0, %s2141_s24 }
 0x54c   :  { %1111 = vrot.lane.b32.xlu0 %v2318_v63, %s2141_s24  ;;  %s1768_s24 = sshll.u32 %s2803_s6, 4  ;;  %s1769_s24 = int_to_ptr.hbm [resolvable:$true] %s1768_s24 }
 0x54d   :  { %v652_v11 = vpop.xlane.xlu2 %651 }
 0x54e   :  { %2032 = vrcp.f32 %v652_v11  ;;  %v706_v60 = vand.u32 2147483648, %v652_v11  ;;  %v704_v63 = vand.u32 2147483647, %v652_v11  ;;  %vm700_vm12 = vweird.f32 %v652_v11 }
 0x550   :  { %v707_v29 = vor.u32 1.1754944e-38, %v706_v60  ;;  %vm705_vm14 = vcmp.eq.f32.partialorder %v704_v63, 8.507059e+37 }
 0x554   :  { %v2033_v12 = vpop.eup %2032 }
 0x555   :  { %v696_v37 = vmul.f32 %v2033_v12, %v652_v11  ;;  %vm701_vm10 = vweird.f32 %v2033_v12 }
 0x556   :  { %vm702_vm13 = vmor %vm700_vm12, %vm701_vm10 }
 0x557   :  { %v697_v0 = vsub.f32 1.0, %v696_v37 }
 0x559   :  { %v698_v24 = vmul.f32 %v2033_v12, %v697_v0 }
 0x55b   :  { %v699_v30 = vadd.f32 %v2033_v12, %v698_v24 }
 0x55d   :  { %v703_v62 = vsel %vm702_vm13, %v2033_v12, %v699_v30 }
 0x55e   :  { %v823_v36 = vpop.xlane.xlu1 %822  ;;  %v708_v33 = vsel %vm705_vm14, %v707_v29, %v703_v62 }
 0x55f   :  { %v829_v13 = vsub.f32 %v2516_v49, %v823_v36  ;;  %v712_v41 = vmul.f32 %v2510_v4, %v708_v33 }
 0x561   :  { %v835_v25 = vmul.f32 1.442695, %v829_v13  ;;  %v714_v32 = vpack.c.bf16 %v712_v41, %v711_v38 }
 0x563   :  { %2034 = vpow2.f32 %v835_v25  ;;  %1814 = vmatmul.msk.bf16.gmra.mxu0 %vm198_vm3, %v714_v32 }
 0x564   :  { %2036 = vpow2.f32 %v1035_v46 }
 0x566   :  { %v2575_v4 = vpop.xlane.xlu1 %1038 }
 0x567   :  { %v1060_v32 = vand.u32 2147483648, %v2575_v4  ;;  %vm1054_vm14 = vweird.f32 %v2575_v4 }
 0x569   :  { %v2567_v10 = vpop.eup %2034 }
 0x56a   :  { %v845_v44 = vsel %vm198_vm3, %v2567_v10, 0.0  ;;  %v2571_v49 = vpop.eup %2036 }
 0x56b   :  { %v1046_v1 = vsel %vm198_vm3, %v2571_v49, 0.0 }
 0x56c   :  { %846 = vadd.xlane.f32.xlu2 %v845_v44 }
 0x574   :  { %1047 = vadd.xlane.f32.xlu2 %v1046_v1 }
 0x57e   :  { %v2577_v23 = vpop.xlane.xlu2 %1041 }
 0x57f   :  { %v1074_v38 = vand.u32 2147483648, %v2577_v23  ;;  %vm1068_vm12 = vweird.f32 %v2577_v23  ;;  %v1072_v25 = vand.u32 2147483647, %v2577_v23 }
 0x581   :  { %v1075_v46 = vor.u32 1.1754944e-38, %v1074_v38 }
 0x586   :  { %v2579_v6 = vpop.xlane.xlu1 %1044 }
 0x596   :  { %v841_v45 = vpop.xlane.xlu2 %840 }
 0x597   :  { %2038 = vrcp.f32 %v841_v45  ;;  %v862_v7 = vand.u32 2147483648, %v841_v45  ;;  %vm856_vm0 = vweird.f32 %v841_v45  ;;  %v860_v11 = vand.u32 2147483647, %v841_v45 }
 0x598   :  { %2040 = vrcp.f32 %v2577_v23 }
 0x599   :  { %2042 = vrcp.f32 %v2575_v4  ;;  %v863_v0 = vor.u32 1.1754944e-38, %v862_v7  ;;  %vm861_vm6 = vcmp.eq.f32.partialorder %v860_v11, 8.507059e+37 }
 0x59d   :  { %v2039_v48 = vpop.eup %2038 }
 0x59e   :  { %v852_v43 = vmul.f32 %v2039_v48, %v841_v45  ;;  %v844_v51 = vpop.xlane.xlu2 %843  ;;  %v914_v52 = vpop.permute.xlu1 %913  ;;  %vm857_vm15 = vweird.f32 %v2039_v48  ;;  %v1061_v45 = vor.u32 1.1754944e-38, %v1060_v32 }
 0x59f   :  { %2044 = vrcp.f32 %v844_v51  ;;  %932 = vmatpush.bf16.msrb.mxu1 %v914_v52  ;;  %v2041_v54 = vpop.eup %2040  ;;  %vm858_vm4 = vmor %vm856_vm0, %vm857_vm15  ;;  %v876_v14 = vand.u32 2147483648, %v844_v51  ;;  %v874_v19 = vand.u32 2147483647, %v844_v51  ;;  %vm870_vm7 = vweird.f32 %v844_v51 }
 0x5a0   :  { %v853_v40 = vsub.f32 1.0, %v852_v43  ;;  %v2043_v53 = vpop.eup %2042  ;;  %v1064_v55 = vmul.f32 %v2041_v54, %v2577_v23  ;;  %vm1069_vm10 = vweird.f32 %v2041_v54  ;;  %vm1073_vm0 = vcmp.eq.f32.partialorder %v1072_v25, 8.507059e+37 }
 0x5a1   :  { %v1050_v9 = vmul.f32 %v2043_v53, %v2575_v4  ;;  %v877_v63 = vor.u32 1.1754944e-38, %v876_v14  ;;  %vm875_vm9 = vcmp.eq.f32.partialorder %v874_v19, 8.507059e+37  ;;  %vm1055_vm11 = vweird.f32 %v2043_v53  ;;  %vm1070_vm13 = vmor %vm1068_vm12, %vm1069_vm10 }
 0x5a2   :  { %v854_v57 = vmul.f32 %v2039_v48, %v853_v40  ;;  %v1065_v12 = vsub.f32 1.0, %v1064_v55  ;;  %vm1056_vm15 = vmor %vm1054_vm14, %vm1055_vm11  ;;  %vm1082_vm14 = vweird.f32 %v2579_v6 }
 0x5a3   :  { %v1051_v60 = vsub.f32 1.0, %v1050_v9 }
 0x5a4   :  { %v855_v61 = vadd.f32 %v2039_v48, %v854_v57  ;;  %v1066_v59 = vmul.f32 %v2041_v54, %v1065_v12 }
 0x5a5   :  { %v2045_v39 = vpop.eup %2044  ;;  %v1052_v31 = vmul.f32 %v2043_v53, %v1051_v60 }
 0x5a6   :  { %v866_v5 = vmul.f32 %v2045_v39, %v844_v51  ;;  %v1114_v20 = vpop.permute.xlu2 %1113  ;;  %v859_v37 = vsel %vm858_vm4, %v2039_v48, %v855_v61  ;;  %vm871_vm5 = vweird.f32 %v2045_v39  ;;  %v1067_v33 = vadd.f32 %v2041_v54, %v1066_v59 }
 0x5a7   :  { %1129 = vmatpush.bf16.msra.mxu0 %v1114_v20  ;;  %vm872_vm8 = vmor %vm870_vm7, %vm871_vm5  ;;  %v864_v28 = vsel %vm861_vm6, %v863_v0, %v859_v37  ;;  %v1053_v41 = vadd.f32 %v2043_v53, %v1052_v31 }
 0x5a8   :  { %v867_v47 = vsub.f32 1.0, %v866_v5  ;;  %v907_v62 = vmul.f32 %v2536_v27, %v864_v28  ;;  %v1058_v27 = vand.u32 2147483647, %v2575_v4 }
 0x5a9   :  { %v1057_v44 = vsel %vm1056_vm15, %v2043_v53, %v1053_v41  ;;  %v1086_v41 = vand.u32 2147483647, %v2579_v6 }
 0x5aa   :  { %v868_v56 = vmul.f32 %v2045_v39, %v867_v47  ;;  %vm1059_vm4 = vcmp.eq.f32.partialorder %v1058_v27, 8.507059e+37 }
 0x5ab   :  { %v850_v42 = vpop.xlane.xlu0 %849  ;;  %v1062_v23 = vsel %vm1059_vm4, %v1061_v45, %v1057_v44  ;;  %vm1087_vm4 = vcmp.eq.f32.partialorder %v1086_v41, 8.507059e+37 }
 0x5ac   :  { %v869_v24 = vadd.f32 %v2045_v39, %v868_v56  ;;  %v1105_v51 = vmul.f32 %v2520_v50, %v1062_v23  ;;  %2046 = vrcp.f32 %v850_v42  ;;  %v904_v47 = vand.u32 2147483648, %v850_v42 }
 0x5ad   :  { %2048 = vrcp.f32 %v2579_v6  ;;  %vm898_vm6 = vweird.f32 %v850_v42  ;;  %v902_v12 = vand.u32 2147483647, %v850_v42 }
 0x5ae   :  { %v873_v30 = vsel %vm872_vm8, %v2045_v39, %v869_v24 }
 0x5af   :  { %v878_v29 = vsel %vm875_vm9, %v877_v63, %v873_v30  ;;  %v905_v63 = vor.u32 1.1754944e-38, %v904_v47  ;;  %vm903_vm9 = vcmp.eq.f32.partialorder %v902_v12, 8.507059e+37 }
 0x5b0   :  { %v908_v36 = vmul.f32 %v2540_v35, %v878_v29  ;;  %v1071_v35 = vsel %vm1070_vm13, %v2041_v54, %v1067_v33  ;;  %v1088_v33 = vand.u32 2147483648, %v2579_v6 }
 0x5b1   :  { %v1076_v48 = vsel %vm1073_vm0, %v1075_v46, %v1071_v35 }
 0x5b2   :  { %v911_v13 = vpack.c.bf16 %v908_v36, %v907_v62  ;;  %v1106_v43 = vmul.f32 %v2524_v17, %v1076_v48  ;;  %v2047_v54 = vpop.eup %2046  ;;  %v1089_v45 = vor.u32 1.1754944e-38, %v1088_v33 }
 0x5b3   :  { %v894_v53 = vmul.f32 %v2047_v54, %v850_v42  ;;  %v2049_v39 = vpop.eup %2048  ;;  %vm899_vm5 = vweird.f32 %v2047_v54 }
 0x5b4   :  { %1823 = vmatmul.msk.bf16.vlgmr.msrb.gmra.mxu1 %vm198_vm3, %v911_v13  ;;  %v1109_v57 = vpack.c.bf16 %v1106_v43, %v1105_v51  ;;  %v1078_v50 = vmul.f32 %v2049_v39, %v2579_v6  ;;  %vm2600_vm7 = vmor %vm898_vm6, %vm899_vm5  ;;  %vm1083_vm11 = vweird.f32 %v2049_v39 }
 0x5b5   :  { %v895_v55 = vsub.f32 1.0, %v894_v53  ;;  %vm2608_vm15 = vmor %vm1082_vm14, %vm1083_vm11 }
 0x5b6   :  { %v1079_v20 = vsub.f32 1.0, %v1078_v50 }
 0x5b7   :  { %v896_v61 = vmul.f32 %v2047_v54, %v895_v55 }
 0x5b8   :  { %v736_v1 = vpop.f32.mrf.mxu0  ;;  %v1080_v37 = vmul.f32 %v2049_v39, %v1079_v20 }
 0x5b9   :  { %v897_v7 = vadd.f32 %v2047_v54, %v896_v61 }
 0x5ba   :  { %v1081_v30 = vadd.f32 %v2049_v39, %v1080_v37 }
 0x5bb   :  { %v901_v24 = vsel %vm2600_vm7, %v2047_v54, %v897_v7 }
 0x5bc   :  { %v906_v31 = vsel %vm903_vm9, %v905_v63, %v901_v24  ;;  %v1085_v42 = vsel %vm2608_vm15, %v2049_v39, %v1081_v30  ;;  %vm1199_vm9 = vcmask 195584  }
 0x5bd   :  { %v910_v27 = vmul.f32 %v2548_v58, %v906_v31  ;;  %v1090_v23 = vsel %vm1087_vm4, %v1089_v45, %v1085_v42 }
 0x5be   :  { %v1112_v52 = vpop.permute.xlu0 %1111  ;;  %v1107_v43 = vmul.f32 %v2528_v3, %v1090_v23 }
 0x5bf   :  { %1130 = vmatpush.bf16.msra.mxu0 %v1112_v52 }
 0x5c0   :  { %v738_v40 = vpop.f32.mrf.mxu0 }
 0x5c1   :  { %v1940_v4 = vpack.i.bf16 %v738_v40, %v736_v1 }
 0x5c2   :  { %1833 = vmatmul.msk.bf16.vlgmr.msra.gmra.mxu0 %vm198_vm3, %v1109_v57 }
 0x5c3   :  { %1941 = vrot.lane.b32.xlu1 %v1940_v4, %s2142_s25 }
 0x5df   :  { %v847_v17 = vpop.xlane.xlu2 %846 }
 0x5e0   :  { %2050 = vrcp.f32 %v847_v17  ;;  %v890_v19 = vand.u32 2147483648, %v847_v17  ;;  %v888_v60 = vand.u32 2147483647, %v847_v17  ;;  %vm884_vm10 = vweird.f32 %v847_v17  ;;  %v741_v40 = vpop.f32.mrf.mxu0 }
 0x5e2   :  { %v891_v29 = vor.u32 1.1754944e-38, %v890_v19  ;;  %vm889_vm13 = vcmp.eq.f32.partialorder %v888_v60, 8.507059e+37 }
 0x5e6   :  { %v2051_v5 = vpop.eup %2050 }
 0x5e7   :  { %v880_v9 = vmul.f32 %v2051_v5, %v847_v17  ;;  %v1048_v11 = vpop.xlane.xlu2 %1047  ;;  %vm885_vm8 = vweird.f32 %v2051_v5 }
 0x5e8   :  { %2052 = vrcp.f32 %v1048_v11  ;;  %vm886_vm12 = vmor %vm884_vm10, %vm885_vm8  ;;  %v1102_v35 = vand.u32 2147483648, %v1048_v11  ;;  %v1100_v44 = vand.u32 2147483647, %v1048_v11  ;;  %vm1096_vm5 = vweird.f32 %v1048_v11  ;;  %v743_v4 = vpop.f32.mrf.mxu0 }
 0x5e9   :  { %v881_v14 = vsub.f32 1.0, %v880_v9  ;;  %v1955_v55 = vpack.i.bf16 %v743_v4, %v741_v40  ;;  %v1909_v9 = vld [vmem:[%s2802_s5 + $0x18] sm:$0xff]  ;;  %vm1194_vm8 = vcmask 130048  }
 0x5ea   :  { %v1103_v6 = vor.u32 1.1754944e-38, %v1102_v35  ;;  %vm1101_vm7 = vcmp.eq.f32.partialorder %v1100_v44, 8.507059e+37  ;;  %1234 = vmatpush.bf16.msra.mxu2 %v1909_v9 }
 0x5eb   :  { %v882_v0 = vmul.f32 %v2051_v5, %v881_v14 }
 0x5ed   :  { %v883_v28 = vadd.f32 %v2051_v5, %v882_v0 }
 0x5ee   :  { %v2053_v59 = vpop.eup %2052 }
 0x5ef   :  { %v1092_v62 = vmul.f32 %v2053_v59, %v1048_v11  ;;  %v887_v36 = vsel %vm886_vm12, %v2051_v5, %v883_v28  ;;  %vm1097_vm0 = vweird.f32 %v2053_v59  ;;  %v1908_v11 = vld [vmem:[%s2802_s5 + $0x10] sm:$0xff] }
 0x5f0   :  { %v892_v13 = vsel %vm889_vm13, %v891_v29, %v887_v36  ;;  %vm1098_vm6 = vmor %vm1096_vm5, %vm1097_vm0  ;;  %1235 = vmatpush.bf16.msra.mxu2 %v1908_v11 }
 0x5f1   :  { %v1093_v25 = vsub.f32 1.0, %v1092_v62  ;;  %v909_v32 = vmul.f32 %v2567_v10, %v892_v13 }
 0x5f3   :  { %v1094_v46 = vmul.f32 %v2053_v59, %v1093_v25  ;;  %v912_v1 = vpack.c.bf16 %v910_v27, %v909_v32 }
 0x5f5   :  { %v1095_v48 = vadd.f32 %v2053_v59, %v1094_v46  ;;  %1824 = vmatmul.msk.bf16.gmra.mxu1 %vm198_vm3, %v912_v1 }
 0x5f7   :  { %v1099_v10 = vsel %vm1098_vm6, %v2053_v59, %v1095_v48 }
 0x5f8   :  { %v1104_v58 = vsel %vm1101_vm7, %v1103_v6, %v1099_v10 }
 0x5f9   :  { %v1108_v51 = vmul.f32 %v2571_v49, %v1104_v58 }
 0x5fb   :  { %v1110_v52 = vpack.c.bf16 %v1108_v51, %v1107_v43 }
 0x5fd   :  { %1834 = vmatmul.msk.bf16.gmra.mxu0 %vm198_vm3, %v1110_v52 }
 0x631   :  { %v934_v57 = vpop.f32.mrf.mxu1 }
 0x635   :  { %v1942_v47 = vpop.permute.xlu1 %1941 }
 0x636   :  { %v1944_v14 = vunpack.i.h.bf16 %v1942_v47  ;;  %v1943_v37 = vunpack.i.l.bf16 %v1942_v47 }
 0x638   :  { %v1191_v60 = vsel %vm361_vm2, %v2474_v21, %v1944_v14  ;;  %v1190_v24 = vsel %vm361_vm2, %v2470_v2, %v1943_v37 }
 0x639   :  { %v936_v54 = vpop.f32.mrf.mxu1 }
 0x63a   :  { %v1945_v53 = vpack.i.bf16 %v936_v54, %v934_v57 }
 0x63c   :  { %1946 = vrot.lane.b32.xlu0 %v1945_v53, %s2143_s26 }
 0x63f   :  { %v1132_v39 = vpop.f32.mrf.mxu0 }
 0x644   :  { %1956 = vrot.lane.b32.xlu0 %v1955_v55, %s2142_s25 }
 0x647   :  { %v1134_v17 = vpop.f32.mrf.mxu0 }
 0x648   :  { %v1950_v50 = vpack.i.bf16 %v1134_v17, %v1132_v39 }
 0x64a   :  { %1951 = vrot.lane.b32.xlu1 %v1950_v50, %s2144_s27 }
 0x672   :  { %v939_v3 = vpop.f32.mrf.mxu1 }
 0x67a   :  { %v941_v49 = vpop.f32.mrf.mxu1  ;;  %v1137_v61 = vpop.f32.mrf.mxu0 }
 0x67b   :  { %v1960_v5 = vpack.i.bf16 %v941_v49, %v939_v3 }
 0x67d   :  { %1961 = vrot.lane.b32.xlu2 %v1960_v5, %s2143_s26 }
 0x682   :  { %v1139_v20 = vpop.f32.mrf.mxu0 }
 0x683   :  { %v1965_v7 = vpack.i.bf16 %v1139_v20, %v1137_v61 }
 0x685   :  { %1966 = vrot.lane.b32.xlu1 %v1965_v7, %s2144_s27 }
 0x6ae   :  { %v1947_v12 = vpop.permute.xlu0 %1946 }
 0x6af   :  { %v1949_v56 = vunpack.i.h.bf16 %v1947_v12  ;;  %v1948_v19 = vunpack.i.l.bf16 %v1947_v12 }
 0x6b1   :  { %v1195_v59 = vsel %vm1194_vm8, %v1190_v24, %v1948_v19  ;;  %v1196_v30 = vsel %vm1194_vm8, %v1191_v60, %v1949_v56 }
 0x6b6   :  { %v1957_v36 = vpop.permute.xlu0 %1956 }
 0x6b7   :  { %v1959_v13 = vunpack.i.h.bf16 %v1957_v36  ;;  %v1958_v21 = vunpack.i.l.bf16 %v1957_v36 }
 0x6b9   :  { %v1193_v25 = vsel %vm361_vm2, %v2484_v16, %v1959_v13  ;;  %v1192_v32 = vsel %vm361_vm2, %v2478_v8, %v1958_v21  ;;  %v1973_v16 = vld [vmem:[%s2801_s4 + $0x23] ss:$0 sm:$0xff] }
 0x6bc   :  { %v1952_v0 = vpop.permute.xlu1 %1951 }
 0x6bd   :  { %v1954_v63 = vunpack.i.h.bf16 %v1952_v0  ;;  %v1953_v28 = vunpack.i.l.bf16 %v1952_v0  ;;  %v1911_v0 = vld [vmem:[%s2802_s5 + $0x28] sm:$0xff] }
 0x6be   :  { %1389 = vmatpush.bf16.msra.mxu1 %v1911_v0 }
 0x6bf   :  { %v1200_v29 = vsel %vm1199_vm9, %v1195_v59, %v1953_v28  ;;  %v1201_v31 = vsel %vm1199_vm9, %v1196_v30, %v1954_v63  ;;  %v1910_v28 = vld [vmem:[%s2802_s5 + $0x20] sm:$0xff] }
 0x6c0   :  { %v1204_v62 = vpack.c.bf16 %v1201_v31, %v1200_v29 }
 0x6c2   :  { %1843 = vmatmul.msk.bf16.vlgmr.msra.gmra.mxu2 %vm198_vm3, %v1204_v62  ;;  %1390 = vmatpush.bf16.msra.mxu1 %v1910_v28  ;;  %v1915_v28 = vld [vmem:[%s2802_s5 + $0x48] sm:$0xff] }
 0x6d7   :  { %v1962_v33 = vpop.permute.xlu2 %1961 }
 0x6d8   :  { %v1964_v38 = vunpack.i.h.bf16 %v1962_v33  ;;  %v1963_v41 = vunpack.i.l.bf16 %v1962_v33 }
 0x6da   :  { %v1198_v42 = vsel %vm1194_vm8, %v1193_v25, %v1964_v38  ;;  %v1197_v46 = vsel %vm1194_vm8, %v1192_v32, %v1963_v41 }
 0x6f7   :  { %v1967_v2 = vpop.permute.xlu1 %1966 }
 0x6f8   :  { %v1969_v27 = vunpack.i.h.bf16 %v1967_v2  ;;  %v1968_v35 = vunpack.i.l.bf16 %v1967_v2 }
 0x6fa   :  { %v1202_v44 = vsel %vm1199_vm9, %v1197_v46, %v1968_v35  ;;  %v1203_v1 = vsel %vm1199_vm9, %v1198_v42, %v1969_v27  ;;  %v1974_v35 = vld [vmem:[%s2801_s4 + $0x24] ss:$0 sm:$0xff] }
 0x6fb   :  { %v1205_v45 = vpack.c.bf16 %v1203_v1, %v1202_v44  ;;  %v1975_v1 = vld [vmem:[%s2801_s4 + $0x25] ss:$0 sm:$0xff] }
 0x6fd   :  { %1844 = vmatmul.msk.bf16.gmra.mxu2 %vm198_vm3, %v1205_v45 }
 0x745   :  { %v1237_v48 = vpop.f32.mrf.mxu2 }
 0x746   :  { %v1247_v8 = vadd.f32 %v1237_v48, %v2242_v18 }
 0x748   :  { %v2650_v6 = vadd.f32 %v1973_v16, %v1247_v8 }
 0x74a   :  { %v1259_v23 = vsel %vm198_vm3, %v2650_v6, 0.0 }
 0x74b   :  { %1260 = vadd.xlane.f32.xlu0 %v1259_v23 }
 0x74d   :  { %v1239_v10 = vpop.f32.mrf.mxu2 }
 0x74e   :  { %v1248_v58 = vadd.f32 %v1239_v10, %v2256_v26 }
 0x750   :  { %v2655_v43 = vadd.f32 %v1973_v16, %v1248_v58 }
 0x752   :  { %v1262_v51 = vsel %vm198_vm3, %v2655_v43, 0.0 }
 0x753   :  { %1263 = vadd.xlane.f32.xlu1 %v1262_v51 }
 0x780   :  { %v1242_v52 = vpop.f32.mrf.mxu2 }
 0x781   :  { %v1249_v40 = vadd.f32 %v1242_v52, %v2236_v15 }
 0x783   :  { %v2660_v57 = vadd.f32 %v1973_v16, %v1249_v40 }
 0x785   :  { %v1265_v18 = vsel %vm198_vm3, %v2660_v57, 0.0 }
 0x786   :  { %1266 = vadd.xlane.f32.xlu2 %v1265_v18 }
 0x788   :  { %v1244_v4 = vpop.f32.mrf.mxu2 }
 0x789   :  { %v1250_v54 = vadd.f32 %v1244_v4, %v2249_v22 }
 0x78b   :  { %v2665_v53 = vadd.f32 %v1973_v16, %v1250_v54 }
 0x78d   :  { %v1268_v26 = vsel %vm198_vm3, %v2665_v53, 0.0 }
 0x78e   :  { %1269 = vadd.xlane.f32.xlu0 %v1268_v26 }
 0x7be   :  { %v1261_v39 = vpop.xlane.xlu0 %1260 }
 0x7bf   :  { %v1271_v55 = vmul.f32 %v1261_v39, %v2260_v34 }
 0x7c1   :  { %v1275_v15 = vsub.f32 %v2650_v6, %v1271_v55 }
 0x7c3   :  { %v1279_v17 = vmul.f32 %v1275_v15, %v1275_v15 }
 0x7c5   :  { %v1283_v50 = vsel %vm198_vm3, %v1279_v17, 0.0 }
 0x7c6   :  { %1284 = vadd.xlane.f32.xlu1 %v1283_v50  ;;  %v1264_v3 = vpop.xlane.xlu1 %1263 }
 0x7c7   :  { %v1272_v49 = vmul.f32 %v1264_v3, %v2260_v34 }
 0x7c9   :  { %v1276_v22 = vsub.f32 %v2655_v43, %v1272_v49 }
 0x7cb   :  { %v1280_v61 = vmul.f32 %v1276_v22, %v1276_v22 }
 0x7cd   :  { %v1286_v5 = vsel %vm198_vm3, %v1280_v61, 0.0 }
 0x7ce   :  { %1287 = vadd.xlane.f32.xlu0 %v1286_v5 }
 0x7f9   :  { %v1267_v20 = vpop.xlane.xlu2 %1266 }
 0x7fa   :  { %v1273_v7 = vmul.f32 %v1267_v20, %v2260_v34 }
 0x7fc   :  { %v2677_v9 = vsub.f32 %v2660_v57, %v1273_v7 }
 0x7fe   :  { %v1281_v11 = vmul.f32 %v2677_v9, %v2677_v9 }
 0x800   :  { %v1289_v47 = vsel %vm198_vm3, %v1281_v11, 0.0 }
 0x801   :  { %1290 = vadd.xlane.f32.xlu1 %v1289_v47  ;;  %v1270_v12 = vpop.xlane.xlu0 %1269 }
 0x802   :  { %v1274_v14 = vmul.f32 %v1270_v12, %v2260_v34 }
 0x804   :  { %v2684_v37 = vsub.f32 %v2665_v53, %v1274_v14 }
 0x806   :  { %v1282_v56 = vmul.f32 %v2684_v37, %v2684_v37 }
 0x808   :  { %v1292_v19 = vsel %vm198_vm3, %v1282_v56, 0.0 }
 0x809   :  { %1293 = vadd.xlane.f32.xlu2 %v1292_v19 }
 0x839   :  { %v1285_v60 = vpop.xlane.xlu1 %1284 }
 0x83a   :  { %v1295_v24 = vmul.f32 %v1285_v60, %v2260_v34  ;;  %v1919_v60 = vld [vmem:[%s2802_s5 + $0x68] sm:$0xff] }
 0x83b   :  { %1554 = vmatpush.bf16.msra.mxu3 %v1919_v60 }
 0x83c   :  { %v1299_v63 = vadd.f32 1e-05, %v1295_v24  ;;  %v1916_v24 = vld [vmem:[%s2802_s5 + $0x50] sm:$0xff] }
 0x83e   :  { %2054 = vrsqrt.f32 %v1299_v63  ;;  %vm1309_vm10 = vweird.f32 %v1299_v63 }
 0x841   :  { %v1288_v59 = vpop.xlane.xlu0 %1287 }
 0x842   :  { %v1296_v30 = vmul.f32 %v1288_v59, %v2260_v34 }
 0x844   :  { %v2055_v29 = vpop.eup %2054  ;;  %v1300_v31 = vadd.f32 1e-05, %v1296_v30 }
 0x845   :  { %v1304_v62 = vmul.f32 %v2055_v29, %v1299_v63  ;;  %vm1310_vm2 = vweird.f32 %v2055_v29  ;;  %v2724_v63 = vld [vmem:[%s2801_s4 + $0x26] ss:$0 sm:$0xff] }
 0x846   :  { %2056 = vrsqrt.f32 %v1300_v31  ;;  %vm1311_vm11 = vmor %vm1309_vm10, %vm1310_vm2  ;;  %vm1319_vm13 = vweird.f32 %v1300_v31 }
 0x847   :  { %v1305_v36 = vmul.f32 %v2055_v29, %v1304_v62 }
 0x849   :  { %v1306_v33 = vmul.f32 0.5, %v1305_v36  ;;  %v1913_v36 = vld [vmem:[%s2802_s5 + $0x38] sm:$0xff] }
 0x84b   :  { %v1307_v13 = vsub.f32 1.5, %v1306_v33 }
 0x84c   :  { %v2057_v21 = vpop.eup %2056 }
 0x84d   :  { %v1308_v38 = vmul.f32 %v2055_v29, %v1307_v13  ;;  %v1314_v41 = vmul.f32 %v2057_v21, %v1300_v31  ;;  %vm1320_vm12 = vweird.f32 %v2057_v21 }
 0x84e   :  { %vm1321_vm14 = vmor %vm1319_vm13, %vm1320_vm12 }
 0x84f   :  { %v1315_v2 = vmul.f32 %v2057_v21, %v1314_v41  ;;  %v1312_v25 = vsel %vm1311_vm11, %v2055_v29, %v1308_v38  ;;  %v1914_v29 = vld [vmem:[%s2802_s5 + $0x40] sm:$0xff] }
 0x850   :  { %v1343_v42 = vmul.f32 %v1312_v25, %v1275_v15 }
 0x851   :  { %v1316_v32 = vmul.f32 0.5, %v1315_v2 }
 0x852   :  { %v1348_v45 = vmul.f32 %v1974_v35, %v1343_v42 }
 0x853   :  { %v1317_v27 = vsub.f32 1.5, %v1316_v32 }
 0x854   :  { %v1353_v8 = vadd.f32 %v1975_v1, %v1348_v45 }
 0x855   :  { %v1318_v46 = vmul.f32 %v2057_v21, %v1317_v27 }
 0x857   :  { %v1322_v44 = vsel %vm1321_vm14, %v2057_v21, %v1318_v46  ;;  %v1912_v21 = vld [vmem:[%s2802_s5 + $0x30] sm:$0xff] }
 0x858   :  { %v1344_v16 = vmul.f32 %v1322_v44, %v1276_v22 }
 0x85a   :  { %v1349_v48 = vmul.f32 %v1974_v35, %v1344_v16 }
 0x85c   :  { %v1354_v23 = vadd.f32 %v1975_v1, %v1349_v48 }
 0x85e   :  { %v1357_v10 = vpack.c.bf16 %v1354_v23, %v1353_v8 }
 0x860   :  { %1853 = vmatmul.msk.bf16.vlgmr.msra.gmra.mxu1 %vm198_vm3, %v1357_v10 }
 0x874   :  { %v1291_v58 = vpop.xlane.xlu1 %1290 }
 0x875   :  { %v1297_v51 = vmul.f32 %v1291_v58, %v2260_v34 }
 0x877   :  { %v1301_v52 = vadd.f32 1e-05, %v1297_v51 }
 0x879   :  { %2058 = vrsqrt.f32 %v1301_v52  ;;  %vm1329_vm0 = vweird.f32 %v1301_v52 }
 0x87c   :  { %v1294_v40 = vpop.xlane.xlu2 %1293 }
 0x87d   :  { %v1298_v18 = vmul.f32 %v1294_v40, %v2260_v34 }
 0x87f   :  { %v2059_v4 = vpop.eup %2058  ;;  %v1302_v54 = vadd.f32 1e-05, %v1298_v18 }
 0x880   :  { %v1324_v26 = vmul.f32 %v2059_v4, %v1301_v52  ;;  %vm1330_vm15 = vweird.f32 %v2059_v4 }
 0x881   :  { %2060 = vrsqrt.f32 %v1302_v54  ;;  %vm1331_vm4 = vmor %vm1329_vm0, %vm1330_vm15  ;;  %vm1339_vm6 = vweird.f32 %v1302_v54 }
 0x882   :  { %v1325_v39 = vmul.f32 %v2059_v4, %v1324_v26 }
 0x884   :  { %v1326_v55 = vmul.f32 0.5, %v1325_v39 }
 0x886   :  { %v1327_v15 = vsub.f32 1.5, %v1326_v55 }
 0x887   :  { %v2061_v17 = vpop.eup %2060 }
 0x888   :  { %v1328_v50 = vmul.f32 %v2059_v4, %v1327_v15  ;;  %v1334_v3 = vmul.f32 %v2061_v17, %v1302_v54  ;;  %vm1340_vm5 = vweird.f32 %v2061_v17 }
 0x889   :  { %vm1341_vm7 = vmor %vm1339_vm6, %vm1340_vm5 }
 0x88a   :  { %v1335_v49 = vmul.f32 %v2061_v17, %v1334_v3  ;;  %v1332_v22 = vsel %vm1331_vm4, %v2059_v4, %v1328_v50 }
 0x88b   :  { %v1345_v20 = vmul.f32 %v1332_v22, %v2677_v9  ;;  %v1918_v9 = vld [vmem:[%s2802_s5 + $0x60] sm:$0xff] }
 0x88c   :  { %v1336_v61 = vmul.f32 0.5, %v1335_v49  ;;  %1555 = vmatpush.bf16.msra.mxu3 %v1918_v9 }
 0x88d   :  { %v1350_v12 = vmul.f32 %v1974_v35, %v1345_v20 }
 0x88e   :  { %v1337_v5 = vsub.f32 1.5, %v1336_v61 }
 0x88f   :  { %v1355_v56 = vadd.f32 %v1975_v1, %v1350_v12 }
 0x890   :  { %v1338_v7 = vmul.f32 %v2061_v17, %v1337_v5 }
 0x892   :  { %v1342_v11 = vsel %vm1341_vm7, %v2061_v17, %v1338_v7 }
 0x893   :  { %v1346_v47 = vmul.f32 %v1342_v11, %v2684_v37  ;;  %v1917_v37 = vld [vmem:[%s2802_s5 + $0x58] sm:$0xff] }
 0x894   :  { %1556 = vmatpush.bf16.msra.mxu3 %v1917_v37 }
 0x895   :  { %v1351_v14 = vmul.f32 %v1974_v35, %v1346_v47 }
 0x897   :  { %v1356_v19 = vadd.f32 %v1975_v1, %v1351_v14 }
 0x898   :  { %1557 = vmatpush.bf16.msra.mxu3 %v1916_v24 }
 0x899   :  { %v1358_v0 = vpack.c.bf16 %v1356_v19, %v1355_v56 }
 0x89b   :  { %1854 = vmatmul.msk.bf16.gmra.mxu1 %vm198_vm3, %v1358_v0 }
 0x89c   :  { %1558 = vmatpush.bf16.msra.mxu3 %v1915_v28 }
 0x8a0   :  { %1559 = vmatpush.bf16.msra.mxu3 %v1914_v29 }
 0x8a4   :  { %1560 = vmatpush.bf16.msra.mxu3 %v1913_v36 }
 0x8a8   :  { %1561 = vmatpush.bf16.msra.mxu3 %v1912_v21 }
 0x8dd   :  { %v1392_v59 = vpop.f32.mrf.mxu1 }
 0x8de   :  { %v1393_v30 = vadd.f32 %v2724_v63, %v1392_v59 }
 0x8e0   :  { %v1855_v31 = vmul.f32 -1.702, %v1393_v30 }
 0x8e2   :  { %v1410_v62 = vmul.f32 1.442695, %v1855_v31 }
 0x8e4   :  { %2062 = vpow2.f32 %v1410_v62 }
 0x8e5   :  { %v1394_v33 = vpop.f32.mrf.mxu1 }
 0x8e6   :  { %v1395_v13 = vadd.f32 %v2724_v63, %v1394_v33 }
 0x8e8   :  { %v1856_v38 = vmul.f32 -1.702, %v1395_v13 }
 0x8ea   :  { %v2063_v41 = vpop.eup %2062  ;;  %v1412_v2 = vmul.f32 1.442695, %v1856_v38 }
 0x8eb   :  { %v1418_v25 = vadd.f32 1.0, %v2063_v41 }
 0x8ec   :  { %2064 = vpow2.f32 %v1412_v2 }
 0x8ed   :  { %2066 = vrcp.f32 %v1418_v25  ;;  %v1433_v48 = vand.u32 2147483648, %v1418_v25  ;;  %vm1427_vm9 = vweird.f32 %v1418_v25  ;;  %v1431_v8 = vand.u32 2147483647, %v1418_v25 }
 0x8ef   :  { %v1434_v40 = vor.u32 1.1754944e-38, %v1433_v48  ;;  %vm1432_vm11 = vcmp.eq.f32.partialorder %v1431_v8, 8.507059e+37 }
 0x8f2   :  { %v2065_v32 = vpop.eup %2064 }
 0x8f3   :  { %v2067_v27 = vpop.eup %2066  ;;  %v1419_v35 = vadd.f32 1.0, %v2065_v32 }
 0x8f4   :  { %v1423_v42 = vmul.f32 %v2067_v27, %v1418_v25  ;;  %vm1428_vm8 = vweird.f32 %v2067_v27 }
 0x8f5   :  { %2068 = vrcp.f32 %v1419_v35  ;;  %vm1429_vm2 = vmor %vm1427_vm9, %vm1428_vm8  ;;  %v1448_v10 = vand.u32 2147483648, %v1419_v35  ;;  %v1446_v52 = vand.u32 2147483647, %v1419_v35  ;;  %vm1442_vm12 = vweird.f32 %v1419_v35 }
 0x8f6   :  { %v1424_v46 = vsub.f32 1.0, %v1423_v42 }
 0x8f7   :  { %v1449_v54 = vor.u32 1.1754944e-38, %v1448_v10  ;;  %vm1447_vm14 = vcmp.eq.f32.partialorder %v1446_v52, 8.507059e+37 }
 0x8f8   :  { %v1425_v44 = vmul.f32 %v2067_v27, %v1424_v46 }
 0x8fa   :  { %v1426_v45 = vadd.f32 %v2067_v27, %v1425_v44 }
 0x8fb   :  { %v2069_v1 = vpop.eup %2068 }
 0x8fc   :  { %v1438_v16 = vmul.f32 %v2069_v1, %v1419_v35  ;;  %v1430_v58 = vsel %vm1429_vm2, %v2067_v27, %v1426_v45  ;;  %vm1443_vm10 = vweird.f32 %v2069_v1  ;;  %v1977_v27 = vld [vmem:[%s2801_s4 + $0x27] ss:$0 sm:$0xff] }
 0x8fd   :  { %v1435_v4 = vsel %vm1432_vm11, %v1434_v40, %v1430_v58  ;;  %vm1444_vm13 = vmor %vm1442_vm12, %vm1443_vm10 }
 0x8fe   :  { %v1439_v23 = vsub.f32 1.0, %v1438_v16  ;;  %v1482_v55 = vmul.f32 %v1435_v4, %v1393_v30 }
 0x900   :  { %v1440_v51 = vmul.f32 %v2069_v1, %v1439_v23 }
 0x902   :  { %v1441_v18 = vadd.f32 %v2069_v1, %v1440_v51 }
 0x904   :  { %v1445_v26 = vsel %vm1444_vm13, %v2069_v1, %v1441_v18 }
 0x905   :  { %v1450_v39 = vsel %vm1447_vm14, %v1449_v54, %v1445_v26 }
 0x906   :  { %v1483_v15 = vmul.f32 %v1450_v39, %v1395_v13 }
 0x908   :  { %v1486_v17 = vpack.c.bf16 %v1483_v15, %v1482_v55 }
 0x90a   :  { %1562 = vmatmul.bf16.vlgmr.msra.gmra.mxu3 %v1486_v17 }
 0x918   :  { %v1397_v50 = vpop.f32.mrf.mxu1 }
 0x919   :  { %v1398_v3 = vadd.f32 %v2724_v63, %v1397_v50 }
 0x91b   :  { %v1857_v49 = vmul.f32 -1.702, %v1398_v3 }
 0x91d   :  { %v1414_v22 = vmul.f32 1.442695, %v1857_v49 }
 0x91f   :  { %2070 = vpow2.f32 %v1414_v22 }
 0x920   :  { %v1399_v61 = vpop.f32.mrf.mxu1 }
 0x921   :  { %v1400_v5 = vadd.f32 %v2724_v63, %v1399_v61 }
 0x923   :  { %v1858_v20 = vmul.f32 -1.702, %v1400_v5 }
 0x925   :  { %v2071_v7 = vpop.eup %2070  ;;  %v1416_v11 = vmul.f32 1.442695, %v1858_v20 }
 0x926   :  { %v1420_v47 = vadd.f32 1.0, %v2071_v7 }
 0x927   :  { %2072 = vpow2.f32 %v1416_v11 }
 0x928   :  { %2074 = vrcp.f32 %v1420_v47  ;;  %v1463_v28 = vand.u32 2147483648, %v1420_v47  ;;  %vm1457_vm0 = vweird.f32 %v1420_v47  ;;  %v1461_v63 = vand.u32 2147483647, %v1420_v47 }
 0x92a   :  { %v1464_v36 = vor.u32 1.1754944e-38, %v1463_v28  ;;  %vm1462_vm6 = vcmp.eq.f32.partialorder %v1461_v63, 8.507059e+37 }
 0x92d   :  { %v2073_v12 = vpop.eup %2072 }
 0x92e   :  { %v2075_v14 = vpop.eup %2074  ;;  %v1421_v56 = vadd.f32 1.0, %v2073_v12 }
 0x92f   :  { %v1453_v19 = vmul.f32 %v2075_v14, %v1420_v47  ;;  %vm1458_vm15 = vweird.f32 %v2075_v14 }
 0x930   :  { %2076 = vrcp.f32 %v1421_v56  ;;  %vm1459_vm4 = vmor %vm1457_vm0, %vm1458_vm15  ;;  %v1478_v30 = vand.u32 2147483648, %v1421_v56  ;;  %v1476_v62 = vand.u32 2147483647, %v1421_v56  ;;  %vm1472_vm7 = vweird.f32 %v1421_v56 }
 0x931   :  { %v1454_v0 = vsub.f32 1.0, %v1453_v19 }
 0x932   :  { %v1479_v21 = vor.u32 1.1754944e-38, %v1478_v30  ;;  %vm1477_vm9 = vcmp.eq.f32.partialorder %v1476_v62, 8.507059e+37 }
 0x933   :  { %v1455_v60 = vmul.f32 %v2075_v14, %v1454_v0 }
 0x935   :  { %v1456_v37 = vadd.f32 %v2075_v14, %v1455_v60 }
 0x936   :  { %v2077_v9 = vpop.eup %2076 }
 0x937   :  { %v1468_v24 = vmul.f32 %v2077_v9, %v1421_v56  ;;  %v1460_v29 = vsel %vm1459_vm4, %v2075_v14, %v1456_v37  ;;  %vm1473_vm5 = vweird.f32 %v2077_v9 }
 0x938   :  { %v1465_v13 = vsel %vm1462_vm6, %v1464_v36, %v1460_v29  ;;  %vm1474_vm8 = vmor %vm1472_vm7, %vm1473_vm5  ;;  %v1978_v29 = vld [vmem:[%s2801_s4 + $0x28] ss:$0 sm:$0xff]  ;;  %v1979_v36 = vld [vmem:[%s2801_s4 + $0x29] ss:$0 sm:$0xff] }
 0x939   :  { %v1469_v59 = vsub.f32 1.0, %v1468_v24  ;;  %v1484_v2 = vmul.f32 %v1465_v13, %v1398_v3 }
 0x93b   :  { %v1470_v31 = vmul.f32 %v2077_v9, %v1469_v59 }
 0x93d   :  { %v1471_v33 = vadd.f32 %v2077_v9, %v1470_v31 }
 0x93f   :  { %v1475_v38 = vsel %vm1474_vm8, %v2077_v9, %v1471_v33  ;;  %vm1705_vm8 = vcmask 1040384  }
 0x940   :  { %v1480_v41 = vsel %vm1477_vm9, %v1479_v21, %v1475_v38  ;;  %vm1707_vm9 = vcmask 1041408  }
 0x941   :  { %v1485_v25 = vmul.f32 %v1480_v41, %v1400_v5 }
 0x943   :  { %v1487_v32 = vpack.c.bf16 %v1485_v25, %v1484_v2 }
 0x945   :  { %1567 = vmatmul.bf16.gmra.mxu3 %v1487_v32 }
 0x98d   :  { %v1563_v35 = vpop.f32.mrf.mxu3 }
 0x98e   :  { %v1564_v42 = vadd.f32 %v1977_v27, %v1563_v35 }
 0x990   :  { %v1573_v46 = vadd.f32 %v1564_v42, %v2650_v6 }
 0x992   :  { %v1579_v44 = vsel %vm198_vm3, %v1573_v46, 0.0 }
 0x993   :  { %1580 = vadd.xlane.f32.xlu0 %v1579_v44 }
 0x995   :  { %v1565_v1 = vpop.f32.mrf.mxu3 }
 0x996   :  { %v1566_v45 = vadd.f32 %v1977_v27, %v1565_v1  ;;  %v1921_v1 = vld [vmem:[%s2802_s5 + $0x78] sm:$0xff] }
 0x997   :  { %1737 = vmatpush.bf16.msrb.mxu0 %v1921_v1 }
 0x998   :  { %v1574_v16 = vadd.f32 %v1566_v45, %v2655_v43  ;;  %v1920_v45 = vld [vmem:[%s2802_s5 + $0x70] sm:$0xff]  ;;  %s1891_s5 = sld [smem:[#allocation3 + $0x1]] }
 0x99a   :  { %v1582_v48 = vsel %vm198_vm3, %v1574_v16, 0.0 }
 0x99b   :  { %1583 = vadd.xlane.f32.xlu1 %v1582_v48  ;;  %1738 = vmatpush.bf16.msrb.mxu0 %v1920_v45 }
 0x99e   :  { %s1779_s16 = scalar_lea.vmem [#allocation2], %s1891_s5 }
 0x9c8   :  { %v1568_v8 = vpop.f32.mrf.mxu3 }
 0x9c9   :  { %v1569_v23 = vadd.f32 %v1977_v27, %v1568_v8 }
 0x9cb   :  { %v1575_v10 = vadd.f32 %v1569_v23, %v2660_v57 }
 0x9cd   :  { %v1585_v58 = vsel %vm198_vm3, %v1575_v10, 0.0 }
 0x9ce   :  { %1586 = vadd.xlane.f32.xlu2 %v1585_v58 }
 0x9d0   :  { %v1570_v51 = vpop.f32.mrf.mxu3 }
 0x9d1   :  { %v1571_v52 = vadd.f32 %v1977_v27, %v1570_v51 }
 0x9d3   :  { %v1576_v6 = vadd.f32 %v1571_v52, %v2665_v53 }
 0x9d5   :  { %v1588_v40 = vsel %vm198_vm3, %v1576_v6, 0.0 }
 0x9d6   :  { %1589 = vadd.xlane.f32.xlu0 %v1588_v40 }
 0xa06   :  { %v1581_v18 = vpop.xlane.xlu0 %1580 }
 0xa07   :  { %v1591_v43 = vmul.f32 %v1581_v18, %v2260_v34 }
 0xa09   :  { %v1595_v4 = vsub.f32 %v1573_v46, %v1591_v43 }
 0xa0b   :  { %v1599_v54 = vmul.f32 %v1595_v4, %v1595_v4 }
 0xa0d   :  { %v1603_v26 = vsel %vm198_vm3, %v1599_v54, 0.0 }
 0xa0e   :  { %v1584_v39 = vpop.xlane.xlu1 %1583  ;;  %1604 = vadd.xlane.f32.xlu1 %v1603_v26 }
 0xa0f   :  { %v1592_v57 = vmul.f32 %v1584_v39, %v2260_v34 }
 0xa11   :  { %v1596_v55 = vsub.f32 %v1574_v16, %v1592_v57 }
 0xa13   :  { %v1600_v15 = vmul.f32 %v1596_v55, %v1596_v55 }
 0xa15   :  { %v1606_v17 = vsel %vm198_vm3, %v1600_v15, 0.0 }
 0xa16   :  { %1607 = vadd.xlane.f32.xlu2 %v1606_v17 }
 0xa41   :  { %v1587_v53 = vpop.xlane.xlu2 %1586 }
 0xa42   :  { %v1593_v50 = vmul.f32 %v1587_v53, %v2260_v34 }
 0xa44   :  { %v2758_v3 = vsub.f32 %v1575_v10, %v1593_v50 }
 0xa46   :  { %v1601_v49 = vmul.f32 %v2758_v3, %v2758_v3 }
 0xa48   :  { %v1609_v22 = vsel %vm198_vm3, %v1601_v49, 0.0 }
 0xa49   :  { %1610 = vadd.xlane.f32.xlu0 %v1609_v22  ;;  %v1590_v61 = vpop.xlane.xlu0 %1589 }
 0xa4a   :  { %v1594_v5 = vmul.f32 %v1590_v61, %v2260_v34 }
 0xa4c   :  { %v2764_v20 = vsub.f32 %v1576_v6, %v1594_v5 }
 0xa4e   :  { %v1602_v7 = vmul.f32 %v2764_v20, %v2764_v20 }
 0xa50   :  { %v1612_v11 = vsel %vm198_vm3, %v1602_v7, 0.0 }
 0xa51   :  { %1613 = vadd.xlane.f32.xlu1 %v1612_v11 }
 0xa81   :  { %v1605_v47 = vpop.xlane.xlu1 %1604 }
 0xa82   :  { %v1615_v12 = vmul.f32 %v1605_v47, %v2260_v34 }
 0xa84   :  { %v1619_v14 = vadd.f32 1e-05, %v1615_v12 }
 0xa86   :  { %2078 = vrsqrt.f32 %v1619_v14  ;;  %vm1629_vm10 = vweird.f32 %v1619_v14 }
 0xa89   :  { %v1608_v56 = vpop.xlane.xlu2 %1607 }
 0xa8a   :  { %v1616_v19 = vmul.f32 %v1608_v56, %v2260_v34 }
 0xa8c   :  { %v2079_v0 = vpop.eup %2078  ;;  %v1620_v60 = vadd.f32 1e-05, %v1616_v19 }
 0xa8d   :  { %v1624_v9 = vmul.f32 %v2079_v0, %v1619_v14  ;;  %vm1630_vm2 = vweird.f32 %v2079_v0 }
 0xa8e   :  { %2080 = vrsqrt.f32 %v1620_v60  ;;  %vm1631_vm11 = vmor %vm1629_vm10, %vm1630_vm2  ;;  %vm1639_vm13 = vweird.f32 %v1620_v60  ;;  %vm1709_vm2 = vcmask 1042432  }
 0xa8f   :  { %v1625_v37 = vmul.f32 %v2079_v0, %v1624_v9 }
 0xa91   :  { %v1626_v24 = vmul.f32 0.5, %v1625_v37 }
 0xa93   :  { %v1627_v28 = vsub.f32 1.5, %v1626_v24 }
 0xa94   :  { %v2081_v63 = vpop.eup %2080 }
 0xa95   :  { %v1628_v59 = vmul.f32 %v2079_v0, %v1627_v28  ;;  %v1634_v30 = vmul.f32 %v2081_v63, %v1620_v60  ;;  %vm1640_vm12 = vweird.f32 %v2081_v63 }
 0xa96   :  { %vm1641_vm14 = vmor %vm1639_vm13, %vm1640_vm12 }
 0xa97   :  { %v1632_v31 = vsel %vm1631_vm11, %v2079_v0, %v1628_v59  ;;  %v1635_v62 = vmul.f32 %v2081_v63, %v1634_v30 }
 0xa98   :  { %v1663_v33 = vmul.f32 %v1632_v31, %v1595_v4 }
 0xa99   :  { %v1636_v13 = vmul.f32 0.5, %v1635_v62 }
 0xa9a   :  { %v1668_v21 = vmul.f32 %v1978_v29, %v1663_v33 }
 0xa9b   :  { %v1637_v38 = vsub.f32 1.5, %v1636_v13 }
 0xa9c   :  { %v1673_v41 = vadd.f32 %v1979_v36, %v1668_v21 }
 0xa9d   :  { %v1638_v2 = vmul.f32 %v2081_v63, %v1637_v38 }
 0xa9e   :  { %1677 = vst.msk [vmem:[#allocation2] sm:$0xff] %vm198_vm3, %v1673_v41 }
 0xa9f   :  { %v1642_v25 = vsel %vm1641_vm14, %v2081_v63, %v1638_v2 }
 0xaa0   :  { %v1664_v32 = vmul.f32 %v1642_v25, %v1596_v55 }
 0xaa2   :  { %v1669_v27 = vmul.f32 %v1978_v29, %v1664_v32 }
 0xaa4   :  { %v1674_v35 = vadd.f32 %v1979_v36, %v1669_v27 }
 0xaa6   :  { %1678 = vst.msk [vmem:[#allocation2 + $0x8] sm:$0xff] %vm198_vm3, %v1674_v35 }
 0xabc   :  { %v1611_v42 = vpop.xlane.xlu0 %1610 }
 0xabd   :  { %v1617_v46 = vmul.f32 %v1611_v42, %v2260_v34 }
 0xabf   :  { %v1621_v44 = vadd.f32 1e-05, %v1617_v46 }
 0xac1   :  { %2082 = vrsqrt.f32 %v1621_v44  ;;  %vm1649_vm0 = vweird.f32 %v1621_v44 }
 0xac4   :  { %v1614_v16 = vpop.xlane.xlu1 %1613 }
 0xac5   :  { %v1618_v48 = vmul.f32 %v1614_v16, %v2260_v34 }
 0xac7   :  { %v2083_v8 = vpop.eup %2082  ;;  %v1622_v23 = vadd.f32 1e-05, %v1618_v48 }
 0xac8   :  { %v1644_v10 = vmul.f32 %v2083_v8, %v1621_v44  ;;  %vm1650_vm15 = vweird.f32 %v2083_v8 }
 0xac9   :  { %2084 = vrsqrt.f32 %v1622_v23  ;;  %vm1651_vm4 = vmor %vm1649_vm0, %vm1650_vm15  ;;  %vm1659_vm6 = vweird.f32 %v1622_v23 }
 0xaca   :  { %v1645_v58 = vmul.f32 %v2083_v8, %v1644_v10 }
 0xacc   :  { %v1646_v51 = vmul.f32 0.5, %v1645_v58 }
 0xace   :  { %v1647_v52 = vsub.f32 1.5, %v1646_v51 }
 0xacf   :  { %v2085_v6 = vpop.eup %2084 }
 0xad0   :  { %v1648_v40 = vmul.f32 %v2083_v8, %v1647_v52  ;;  %v1654_v18 = vmul.f32 %v2085_v6, %v1622_v23  ;;  %vm1660_vm5 = vweird.f32 %v2085_v6 }
 0xad1   :  { %vm1661_vm7 = vmor %vm1659_vm6, %vm1660_vm5 }
 0xad2   :  { %v1652_v43 = vsel %vm1651_vm4, %v2083_v8, %v1648_v40  ;;  %v1655_v4 = vmul.f32 %v2085_v6, %v1654_v18 }
 0xad3   :  { %v1665_v54 = vmul.f32 %v1652_v43, %v2758_v3 }
 0xad4   :  { %v1656_v26 = vmul.f32 0.5, %v1655_v4 }
 0xad5   :  { %v1670_v34 = vmul.f32 %v1978_v29, %v1665_v54 }
 0xad6   :  { %v1657_v39 = vsub.f32 1.5, %v1656_v26 }
 0xad7   :  { %v1675_v57 = vadd.f32 %v1979_v36, %v1670_v34 }
 0xad8   :  { %v1658_v55 = vmul.f32 %v2085_v6, %v1657_v39 }
 0xad9   :  { %1679 = vst.msk [vmem:[#allocation2 + $0x10] sm:$0xff] %vm198_vm3, %v1675_v57 }
 0xada   :  { %v1662_v15 = vsel %vm1661_vm7, %v2085_v6, %v1658_v55 }
 0xadb   :  { %v1666_v17 = vmul.f32 %v1662_v15, %v2764_v20 }
 0xadd   :  { %v1671_v53 = vmul.f32 %v1978_v29, %v1666_v17 }
 0xadf   :  { %v1676_v50 = vadd.f32 %v1979_v36, %v1671_v53 }
 0xae1   :  { %1680 = vst.msk [vmem:[#allocation2 + $0x18] sm:$0xff] %vm198_vm3, %v1676_v50 }
 0xae8   :  { %v1892_v3 = vld [vmem:[%s1779_s16 + $0x8] sm:$0x1]  ;;  %v1894_v49 = vld [vmem:[%s1781_s17 + $0x10] sm:$0x1]  ;;  %v1896_v22 = vld [vmem:[%s1783_s18 + $0x18] sm:$0x1] }
 0xae9   :  { %v1697_v61 = vrot.slane %v1892_v3, 7  ;;  %v1700_v5 = vrot.slane %v1894_v49, 6  ;;  %v1683_v20 = vld [vmem:[%s1682_s19] sm:$0x1]  ;;  %v1703_v7 = vrot.slane %v1896_v22, 5 }
 0xaeb   :  { %v1706_v11 = vsel %vm1705_vm8, %v1683_v20, %v1697_v61 }
 0xaec   :  { %v1708_v47 = vsel %vm1707_vm9, %v1706_v11, %v1700_v5 }
 0xaed   :  { %v1710_v12 = vsel %vm1709_vm2, %v1708_v47, %v1703_v7 }
 0xaee   :  { %v1711_v14 = vpack.c.bf16 %v1710_v12, %v1710_v12 }
 0xaf0   :  { %1905 = vmatmul.msk.bf16.vlgmr.msrb.gmra.mxu0 %vm198_vm3, %v1711_v14 }
 0xb6d   :  { %v1740_v56 = vpop.f32.mrf.mxu0 }
 0xb6e   :  { %v1744_v19 = vmul.f32 %v1740_v56, %v1740_v56 }
 0xb70   :  { %v1745_v0 = vsel %vm42_vm1, %v1744_v19, 0.0 }
 0xb71   :  { %1746 = vadd.xlane.f32.xlu2 %v1745_v0 }
 0xb75   :  { %v1742_v60 = vpop.f32.mrf.mxu0 }
 0xbe4   :  { %v1747_v9 = vpop.xlane.xlu2 %1746 }
 0xbe5   :  { %v1748_v37 = vadd.f32 1e-12, %v1747_v9 }
 0xbe7   :  { %2086 = vrsqrt.f32 %v1748_v37  ;;  %vm1755_vm11 = vweird.f32 %v1748_v37 }
 0xbed   :  { %v2087_v24 = vpop.eup %2086 }
 0xbee   :  { %v1750_v28 = vmul.f32 %v2087_v24, %v1748_v37  ;;  %vm1756_vm10 = vweird.f32 %v2087_v24 }
 0xbef   :  { %vm1757_vm3 = vmor %vm1755_vm11, %vm1756_vm10 }
 0xbf0   :  { %v1751_v63 = vmul.f32 %v2087_v24, %v1750_v28 }
 0xbf2   :  { %v1752_v59 = vmul.f32 0.5, %v1751_v63 }
 0xbf4   :  { %v1753_v30 = vsub.f32 1.5, %v1752_v59 }
 0xbf6   :  { %v1754_v29 = vmul.f32 %v2087_v24, %v1753_v30 }
 0xbf8   :  { %v1758_v31 = vsel %vm1757_vm3, %v2087_v24, %v1754_v29 }
 0xbf9   :  { %v1759_v62 = vmul.f32 %v1758_v31, %v1740_v56 }
 0xbfb   :  { %1760 = vst.msk [vmem:[#allocation6] sm:$0xf] %vm42_vm1, %v1759_v62 }
 0xbfc   :  { %1771 = dma.vmem_to_hbm [thread:$0]  %s1767_s21, 64, %s1769_s24, [#allocation4]  }
 0xbfd   :  { %2126 = dma.done.wait [#allocation4], 64  }
 0xbfe   :  { %2127 = vsyncadd [#allocation4], 4294967232 }
 0xbff   :  { %1776 = vsyncpa [#allocation4], 1 }
 0xc00   :  { %1777 = vsyncpa [#allocation5], 1 }

// kernel: custom_clip_forward.2
= control target key start
LH: loop header
LB: loop body
LE: loop exit
PB: predicated region body
PF: predicated region fallthrough
CT: control target
= control target key end

     0   :  { %s3957_s0 = inlined_call_operand.vmem [shape: f32[34,48], index: 0, kind: input, shape index: {}]   ;;  %s3958_s1 = inlined_call_operand.vmem [shape: f32[50,128], index: 1, kind: input, shape index: {}]   ;;  %s3959_s2 = inlined_call_operand.vmem [shape: bf16[368,128], index: 2, kind: input, shape index: {}]   ;;  %s3960_s3 = inlined_call_operand.hbm [shape: f32[2,32], index: 3, kind: output, shape index: {0}]   ;;  %s3961_s4 = inlined_call_operand.vmem [shape: f32[2,17], index: 4, kind: output, shape index: {1}]   ;;  %s3962_s5 = inlined_call_operand.vmem [shape: f32[34,32], index: 5, kind: output, shape index: {2}]  }
   0x1   :  { %v2485_v0 = vld [vmem:[%s3959_s2 + $0x90] sm:$0xff]  ;;  %v2484_v1 = vld [vmem:[%s3959_s2 + $0x88] sm:$0xff]  ;;  %v2483_v2 = vld [vmem:[%s3959_s2 + $0x80] sm:$0xff] }
   0x2   :  { %71 = vmatpush.bf16.msra.mxu0 %v2485_v0  ;;  %2506 = vmatpush.bf16.msra.mxu2 %v2485_v0  ;;  %v19_v3 = vld [vmem:[%s3957_s0] sm:$0xff]  ;;  %v20_v4 = vld [vmem:[%s3957_s0 + $0x8] sm:$0xff]  ;;  %v21_v5 = vld [vmem:[%s3957_s0 + $0x10] sm:$0xff] }
   0x3   :  { %v22_v6 = vld [vmem:[%s3957_s0 + $0x18] sm:$0xff] }
   0x6   :  { %72 = vmatpush.bf16.msra.mxu0 %v2484_v1  ;;  %2507 = vmatpush.bf16.msra.mxu2 %v2484_v1 }
   0x7   :  { %11 = vsyncpa [#allocation3], 0  ;;  %v24_v7 = vpack.c.bf16 %v20_v4, %v19_v3  ;;  %v25_v8 = vpack.c.bf16 %v22_v6, %v21_v5  ;;  %vm56_vm0 = vcmask 392192   ;;  %v23_v9 = vld [vmem:[%s3957_s0 + $0x20] sm:$0x3]  ;;  %vm91_vm1 = vcmask 261120  }
   0x8   :  { %v26_v10 = vpack.c.bf16 %v23_v9, %v23_v9  ;;  %v33_v11 = vld [vmem:[%s3958_s1] sm:$0xff]  ;;  %v35_v15 = vld [vmem:[%s3958_s1 + $0x10] sm:$0xff]  ;;  %v34_v17 = vld [vmem:[%s3958_s1 + $0x8] sm:$0xff]  ;;  %vm104_vm2 = vcmask 254976   ;;  %v2743_v32 = vmov 32.0   ;;  %s2744_s7 = smov 96  }
   0x9   :  { %v36_v23 = vld [vmem:[%s3958_s1 + $0x18] sm:$0xff]  ;;  %v37_v27 = vld [vmem:[%s3958_s1 + $0x20] sm:$0x3]  ;;  %2577 = vrcp.f32 %v2743_v32  ;;  %s2745_s8 = smov 88   ;;  %s2746_s9 = smov 72  }
   0xa   :  { %73 = vmatpush.bf16.msra.mxu0 %v2483_v2  ;;  %2508 = vmatpush.bf16.msra.mxu2 %v2483_v2  ;;  %s2747_s10 = smov 120   ;;  %s2748_s11 = smov 80  }
   0xb   :  { %s2749_s12 = smov 112   ;;  %s2750_s13 = smov 104  }
   0xc   :  { %s2751_s14 = smov 64   ;;  %s2752_s0 = smov 40  }
   0xd   :  { %2327 = vmatmul.msk.bf16.vlgmr.msra.gmra.mxu0 %vm56_vm0, %v24_v7  ;;  %2328 = vmatmul.msk.bf16.vlgmr.msra.gmra.mxu2 %vm56_vm0, %v25_v8  ;;  %s2753_s15 = smov 48   ;;  %s2754_s16 = smov 56  }
   0xe   :  { %s2756_s17 = smov 8   ;;  %s2757_s18 = smov 24  }
   0xf   :  { %v2578_v33 = vpop.eup %2577  ;;  %s2758_s19 = smov 16  }
  0x10   :  { %v109_v34 = vmul.f32 32.0, %v2578_v33  ;;  %vm113_vm3 = vweird.f32 %v2578_v33 }
  0x12   :  { %v110_v35 = vsub.f32 1.0, %v109_v34 }
  0x14   :  { %v111_v36 = vmul.f32 %v2578_v33, %v110_v35 }
  0x16   :  { %v112_v37 = vadd.f32 %v2578_v33, %v111_v36 }
  0x18   :  { %v2836_v38 = vsel %vm113_vm3, %v2578_v33, %v112_v37 }
  0x1d   :  { %2329 = vmatmul.msk.bf16.gmra.mxu2 %vm56_vm0, %v26_v10 }
  0x8a   :  { %v75_v12 = vpop.f32.mrf.mxu0 }
  0x8b   :  { %v76_v13 = vadd.f32 %v75_v12, %v33_v11 }
  0x8d   :  { %v92_v14 = vsel %vm91_vm1, %v76_v13, 0.0 }
  0x8e   :  { %93 = vadd.xlane.f32.xlu0 %v92_v14 }
  0x90   :  { %v80_v16 = vpop.f32.mrf.mxu2 }
  0x91   :  { %v81_v18 = vadd.f32 %v80_v16, %v35_v15 }
  0x92   :  { %v77_v19 = vpop.f32.mrf.mxu0 }
  0x93   :  { %v78_v20 = vadd.f32 %v77_v19, %v34_v17  ;;  %v98_v21 = vsel %vm91_vm1, %v81_v18, 0.0 }
  0x94   :  { %99 = vadd.xlane.f32.xlu1 %v98_v21 }
  0x95   :  { %v95_v22 = vsel %vm91_vm1, %v78_v20, 0.0 }
  0x96   :  { %96 = vadd.xlane.f32.xlu0 %v95_v22 }
  0x98   :  { %v82_v24 = vpop.f32.mrf.mxu2 }
  0x99   :  { %v83_v25 = vadd.f32 %v82_v24, %v36_v23  ;;  %v2875_v23 = vld [vmem:[%s3958_s1 + $0x22] ss:$0 sm:$0xff] }
  0x9b   :  { %v101_v26 = vsel %vm91_vm1, %v83_v25, 0.0 }
  0x9c   :  { %102 = vadd.xlane.f32.xlu1 %v101_v26 }
  0xa0   :  { %v85_v28 = vpop.f32.mrf.mxu2 }
  0xa1   :  { %v86_v29 = vadd.f32 %v85_v28, %v37_v27 }
  0xa3   :  { %v105_v30 = vsel %vm104_vm2, %v86_v29, 0.0 }
  0xa4   :  { %106 = vadd.xlane.f32.xlu2 %v105_v30  ;;  %v2562_v30 = vld [vmem:[%s3958_s1 + $0x23] ss:$0 sm:$0xff] }
  0xa8   :  { %v87_v31 = vpop.f32.mrf.mxu2 }
 0x101   :  { %v94_v39 = vpop.xlane.xlu0 %93 }
 0x102   :  { %v115_v40 = vmul.f32 %v2836_v38, %v94_v39 }
 0x104   :  { %v2839_v41 = vsub.f32 %v76_v13, %v115_v40 }
 0x106   :  { %v125_v42 = vmul.f32 %v2839_v41, %v2839_v41 }
 0x107   :  { %v100_v43 = vpop.xlane.xlu1 %99 }
 0x108   :  { %v117_v44 = vmul.f32 %v2836_v38, %v100_v43  ;;  %v130_v45 = vsel %vm91_vm1, %v125_v42, 0.0 }
 0x109   :  { %131 = vadd.xlane.f32.xlu2 %v130_v45  ;;  %v97_v46 = vpop.xlane.xlu0 %96 }
 0x10a   :  { %v2845_v47 = vsub.f32 %v81_v18, %v117_v44  ;;  %v116_v48 = vmul.f32 %v2836_v38, %v97_v46 }
 0x10c   :  { %v2848_v49 = vsub.f32 %v78_v20, %v116_v48  ;;  %v127_v50 = vmul.f32 %v2845_v47, %v2845_v47 }
 0x10e   :  { %v136_v51 = vsel %vm91_vm1, %v127_v50, 0.0  ;;  %v126_v52 = vmul.f32 %v2848_v49, %v2848_v49 }
 0x10f   :  { %137 = vadd.xlane.f32.xlu1 %v136_v51  ;;  %v103_v53 = vpop.xlane.xlu1 %102 }
 0x110   :  { %v118_v54 = vmul.f32 %v2836_v38, %v103_v53  ;;  %v133_v55 = vsel %vm91_vm1, %v126_v52, 0.0 }
 0x111   :  { %134 = vadd.xlane.f32.xlu0 %v133_v55 }
 0x112   :  { %v2857_v56 = vsub.f32 %v83_v25, %v118_v54 }
 0x114   :  { %v128_v57 = vmul.f32 %v2857_v56, %v2857_v56 }
 0x116   :  { %v139_v58 = vsel %vm91_vm1, %v128_v57, 0.0 }
 0x117   :  { %v107_v59 = vpop.xlane.xlu2 %106  ;;  %140 = vadd.xlane.f32.xlu2 %v139_v58 }
 0x118   :  { %v119_v60 = vmul.f32 %v2836_v38, %v107_v59 }
 0x11a   :  { %v2863_v61 = vsub.f32 %v86_v29, %v119_v60 }
 0x11c   :  { %v129_v62 = vmul.f32 %v2863_v61, %v2863_v61 }
 0x11e   :  { %v142_v63 = vsel %vm104_vm2, %v129_v62, 0.0 }
 0x11f   :  { %143 = vadd.xlane.f32.xlu0 %v142_v63 }
 0x17c   :  { %v132_v0 = vpop.xlane.xlu2 %131 }
 0x17d   :  { %v145_v1 = vmul.f32 %v132_v0, %v2836_v38 }
 0x17f   :  { %v150_v2 = vadd.f32 1e-05, %v145_v1 }
 0x181   :  { %2579 = vrsqrt.f32 %v150_v2  ;;  %vm161_vm5 = vweird.f32 %v150_v2 }
 0x182   :  { %v138_v3 = vpop.xlane.xlu1 %137 }
 0x183   :  { %v147_v4 = vmul.f32 %v138_v3, %v2836_v38 }
 0x184   :  { %v135_v5 = vpop.xlane.xlu0 %134 }
 0x185   :  { %v152_v6 = vadd.f32 1e-05, %v147_v4  ;;  %v146_v7 = vmul.f32 %v135_v5, %v2836_v38 }
 0x187   :  { %v2580_v8 = vpop.eup %2579  ;;  %2581 = vrsqrt.f32 %v152_v6  ;;  %v151_v9 = vadd.f32 1e-05, %v146_v7  ;;  %vm181_vm8 = vweird.f32 %v152_v6 }
 0x188   :  { %v156_v10 = vmul.f32 %v2580_v8, %v150_v2  ;;  %vm162_vm4 = vweird.f32 %v2580_v8 }
 0x189   :  { %2583 = vrsqrt.f32 %v151_v9  ;;  %vm163_vm6 = vmor %vm161_vm5, %vm162_vm4  ;;  %vm171_vm11 = vweird.f32 %v151_v9 }
 0x18a   :  { %v157_v11 = vmul.f32 %v2580_v8, %v156_v10  ;;  %v141_v12 = vpop.xlane.xlu2 %140 }
 0x18b   :  { %v148_v13 = vmul.f32 %v141_v12, %v2836_v38 }
 0x18c   :  { %v158_v14 = vmul.f32 0.5, %v157_v11 }
 0x18d   :  { %v2582_v15 = vpop.eup %2581  ;;  %v153_v16 = vadd.f32 1e-05, %v148_v13 }
 0x18e   :  { %v159_v17 = vsub.f32 1.5, %v158_v14  ;;  %v176_v18 = vmul.f32 %v2582_v15, %v152_v6  ;;  %vm182_vm7 = vweird.f32 %v2582_v15 }
 0x18f   :  { %v2584_v19 = vpop.eup %2583  ;;  %2585 = vrsqrt.f32 %v153_v16  ;;  %vm183_vm10 = vmor %vm181_vm8, %vm182_vm7  ;;  %vm191_vm14 = vweird.f32 %v153_v16 }
 0x190   :  { %v160_v20 = vmul.f32 %v2580_v8, %v159_v17  ;;  %v177_v21 = vmul.f32 %v2582_v15, %v176_v18  ;;  %v166_v22 = vmul.f32 %v2584_v19, %v151_v9  ;;  %vm172_vm9 = vweird.f32 %v2584_v19 }
 0x191   :  { %vm173_vm12 = vmor %vm171_vm11, %vm172_vm9 }
 0x192   :  { %v164_v24 = vsel %vm163_vm6, %v2580_v8, %v160_v20  ;;  %v178_v25 = vmul.f32 0.5, %v177_v21  ;;  %v167_v26 = vmul.f32 %v2584_v19, %v166_v22  ;;  %v144_v27 = vpop.xlane.xlu0 %143 }
 0x193   :  { %v149_v28 = vmul.f32 %v144_v27, %v2836_v38  ;;  %v205_v29 = vmul.f32 %v164_v24, %v2839_v41 }
 0x194   :  { %v179_v31 = vsub.f32 1.5, %v178_v25  ;;  %v168_v32 = vmul.f32 0.5, %v167_v26 }
 0x195   :  { %v2586_v33 = vpop.eup %2585  ;;  %v154_v34 = vadd.f32 1e-05, %v149_v28  ;;  %v211_v35 = vmul.f32 %v2875_v23, %v205_v29 }
 0x196   :  { %v180_v36 = vmul.f32 %v2582_v15, %v179_v31  ;;  %v169_v37 = vsub.f32 1.5, %v168_v32  ;;  %v186_v39 = vmul.f32 %v2586_v33, %v153_v16  ;;  %vm192_vm13 = vweird.f32 %v2586_v33 }
 0x197   :  { %2587 = vrsqrt.f32 %v154_v34  ;;  %v2883_v40 = vadd.f32 %v2562_v30, %v211_v35  ;;  %vm193_vm15 = vmor %vm191_vm14, %vm192_vm13  ;;  %vm201_vm3 = vweird.f32 %v154_v34 }
 0x198   :  { %v184_v41 = vsel %vm183_vm10, %v2582_v15, %v180_v36  ;;  %v170_v42 = vmul.f32 %v2584_v19, %v169_v37  ;;  %v187_v43 = vmul.f32 %v2586_v33, %v186_v39  ;;  %v2486_v37 = vld [vmem:[%s3959_s2] sm:$0xff] }
 0x199   :  { %v296_v44 = vsel %vm91_vm1, %v2883_v40, 0.0  ;;  %v207_v45 = vmul.f32 %v184_v41, %v2845_v47 }
 0x19a   :  { %v174_v46 = vsel %vm173_vm12, %v2584_v19, %v170_v42  ;;  %v188_v48 = vmul.f32 0.5, %v187_v43  ;;  %297 = vadd.xlane.f32.xlu1 %v296_v44 }
 0x19b   :  { %v213_v50 = vmul.f32 %v2875_v23, %v207_v45  ;;  %v206_v51 = vmul.f32 %v174_v46, %v2848_v49 }
 0x19c   :  { %v189_v52 = vsub.f32 1.5, %v188_v48 }
 0x19d   :  { %v2588_v53 = vpop.eup %2587  ;;  %v2890_v54 = vadd.f32 %v2562_v30, %v213_v50  ;;  %v212_v55 = vmul.f32 %v2875_v23, %v206_v51 }
 0x19e   :  { %v190_v57 = vmul.f32 %v2586_v33, %v189_v52  ;;  %v196_v58 = vmul.f32 %v2588_v53, %v154_v34  ;;  %vm202_vm0 = vweird.f32 %v2588_v53  ;;  %v2487_v34 = vld [vmem:[%s3959_s2 + $0x8] sm:$0xff] }
 0x19f   :  { %v302_v47 = vsel %vm91_vm1, %v2890_v54, 0.0  ;;  %v2895_v59 = vadd.f32 %v2562_v30, %v212_v55  ;;  %vm203_vm4 = vmor %vm201_vm3, %vm202_vm0  ;;  %454 = vmatpush.bf16.msra.mxu1 %v2487_v34 }
 0x1a0   :  { %v194_v60 = vsel %vm193_vm15, %v2586_v33, %v190_v57  ;;  %v197_v62 = vmul.f32 %v2588_v53, %v196_v58  ;;  %303 = vadd.xlane.f32.xlu0 %v302_v47 }
 0x1a1   :  { %v299_v49 = vsel %vm91_vm1, %v2895_v59, 0.0  ;;  %v208_v63 = vmul.f32 %v194_v60, %v2857_v56 }
 0x1a2   :  { %v198_v0 = vmul.f32 0.5, %v197_v62  ;;  %300 = vadd.xlane.f32.xlu2 %v299_v49 }
 0x1a3   :  { %v214_v1 = vmul.f32 %v2875_v23, %v208_v63  ;;  %455 = vmatpush.bf16.msra.mxu1 %v2486_v37 }
 0x1a4   :  { %v199_v2 = vsub.f32 1.5, %v198_v0 }
 0x1a5   :  { %v2901_v3 = vadd.f32 %v2562_v30, %v214_v1 }
 0x1a6   :  { %v200_v4 = vmul.f32 %v2588_v53, %v199_v2 }
 0x1a7   :  { %v305_v5 = vsel %vm91_vm1, %v2901_v3, 0.0 }
 0x1a8   :  { %v204_v6 = vsel %vm203_vm4, %v2588_v53, %v200_v4  ;;  %306 = vadd.xlane.f32.xlu1 %v305_v5 }
 0x1a9   :  { %v209_v7 = vmul.f32 %v204_v6, %v2863_v61 }
 0x1ab   :  { %v215_v56 = vmul.f32 %v2875_v23, %v209_v7 }
 0x1ad   :  { %v2907_v8 = vadd.f32 %v2562_v30, %v215_v56 }
 0x1af   :  { %v308_v9 = vsel %vm104_vm2, %v2907_v8, 0.0 }
 0x1b0   :  { %309 = vadd.xlane.f32.xlu2 %v308_v9 }
 0x20d   :  { %v298_v10 = vpop.xlane.xlu1 %297 }
 0x20e   :  { %v311_v11 = vmul.f32 %v298_v10, %v2836_v38 }
 0x210   :  { %v2913_v12 = vsub.f32 %v2883_v40, %v311_v11 }
 0x212   :  { %v321_v13 = vmul.f32 %v2913_v12, %v2913_v12 }
 0x213   :  { %v304_v14 = vpop.xlane.xlu0 %303 }
 0x214   :  { %v313_v61 = vmul.f32 %v304_v14, %v2836_v38  ;;  %v326_v15 = vsel %vm91_vm1, %v321_v13, 0.0  ;;  %v2563_v13 = vld [vmem:[%s3958_s1 + $0x24] ss:$0 sm:$0xff] }
 0x215   :  { %327 = vadd.xlane.f32.xlu0 %v326_v15  ;;  %v301_v16 = vpop.xlane.xlu2 %300 }
 0x216   :  { %v2920_v17 = vsub.f32 %v2890_v54, %v313_v61  ;;  %v312_v18 = vmul.f32 %v301_v16, %v2836_v38 }
 0x218   :  { %v2924_v19 = vsub.f32 %v2895_v59, %v312_v18  ;;  %v323_v20 = vmul.f32 %v2920_v17, %v2920_v17 }
 0x21a   :  { %v332_v21 = vsel %vm91_vm1, %v323_v20, 0.0  ;;  %v322_v22 = vmul.f32 %v2924_v19, %v2924_v19 }
 0x21b   :  { %v307_v23 = vpop.xlane.xlu1 %306  ;;  %333 = vadd.xlane.f32.xlu2 %v332_v21 }
 0x21c   :  { %v314_v24 = vmul.f32 %v307_v23, %v2836_v38  ;;  %v329_v25 = vsel %vm91_vm1, %v322_v22, 0.0  ;;  %v2564_v22 = vld [vmem:[%s3958_s1 + $0x25] ss:$0 sm:$0xff] }
 0x21d   :  { %330 = vadd.xlane.f32.xlu1 %v329_v25 }
 0x21e   :  { %v2934_v26 = vsub.f32 %v2901_v3, %v314_v24 }
 0x220   :  { %v324_v27 = vmul.f32 %v2934_v26, %v2934_v26 }
 0x222   :  { %v335_v28 = vsel %vm91_vm1, %v324_v27, 0.0 }
 0x223   :  { %336 = vadd.xlane.f32.xlu0 %v335_v28  ;;  %v310_v29 = vpop.xlane.xlu2 %309 }
 0x224   :  { %v315_v30 = vmul.f32 %v310_v29, %v2836_v38 }
 0x226   :  { %v2941_v31 = vsub.f32 %v2907_v8, %v315_v30 }
 0x228   :  { %v325_v32 = vmul.f32 %v2941_v31, %v2941_v31 }
 0x22a   :  { %v338_v33 = vsel %vm104_vm2, %v325_v32, 0.0 }
 0x22b   :  { %339 = vadd.xlane.f32.xlu1 %v338_v33 }
 0x288   :  { %v328_v35 = vpop.xlane.xlu0 %327 }
 0x289   :  { %v341_v36 = vmul.f32 %v328_v35, %v2836_v38 }
 0x28b   :  { %v346_v39 = vadd.f32 1e-05, %v341_v36 }
 0x28d   :  { %2589 = vrsqrt.f32 %v346_v39  ;;  %vm357_vm6 = vweird.f32 %v346_v39 }
 0x28e   :  { %v334_v41 = vpop.xlane.xlu2 %333 }
 0x28f   :  { %v343_v42 = vmul.f32 %v334_v41, %v2836_v38 }
 0x290   :  { %v331_v43 = vpop.xlane.xlu1 %330 }
 0x291   :  { %v2954_v44 = vadd.f32 1e-05, %v343_v42  ;;  %v342_v45 = vmul.f32 %v331_v43, %v2836_v38 }
 0x293   :  { %v2590_v46 = vpop.eup %2589  ;;  %2591 = vrsqrt.f32 %v2954_v44  ;;  %v347_v48 = vadd.f32 1e-05, %v342_v45  ;;  %vm377_vm15 = vweird.f32 %v2954_v44 }
 0x294   :  { %v352_v50 = vmul.f32 %v2590_v46, %v346_v39  ;;  %vm358_vm5 = vweird.f32 %v2590_v46 }
 0x295   :  { %2593 = vrsqrt.f32 %v347_v48  ;;  %vm359_vm7 = vmor %vm357_vm6, %vm358_vm5  ;;  %vm367_vm9 = vweird.f32 %v347_v48  ;;  %vm486_vm6 = vcmask 64512  }
 0x296   :  { %v353_v51 = vmul.f32 %v2590_v46, %v352_v50  ;;  %v337_v52 = vpop.xlane.xlu0 %336 }
 0x297   :  { %v344_v53 = vmul.f32 %v337_v52, %v2836_v38 }
 0x298   :  { %v354_v55 = vmul.f32 0.5, %v353_v51 }
 0x299   :  { %v2592_v57 = vpop.eup %2591  ;;  %v349_v58 = vadd.f32 1e-05, %v344_v53 }
 0x29a   :  { %v355_v47 = vsub.f32 1.5, %v354_v55  ;;  %v372_v49 = vmul.f32 %v2592_v57, %v2954_v44  ;;  %vm378_vm12 = vweird.f32 %v2592_v57 }
 0x29b   :  { %v2594_v60 = vpop.eup %2593  ;;  %2595 = vrsqrt.f32 %v349_v58  ;;  %vm387_vm13 = vweird.f32 %v349_v58  ;;  %vm379_vm0 = vmor %vm377_vm15, %vm378_vm12 }
 0x29c   :  { %v356_v62 = vmul.f32 %v2590_v46, %v355_v47  ;;  %v362_v63 = vmul.f32 %v2594_v60, %v347_v48  ;;  %v373_v5 = vmul.f32 %v2592_v57, %v372_v49  ;;  %vm368_vm8 = vweird.f32 %v2594_v60 }
 0x29d   :  { %vm369_vm10 = vmor %vm367_vm9, %vm368_vm8 }
 0x29e   :  { %v363_v0 = vmul.f32 %v2594_v60, %v362_v63  ;;  %v340_v1 = vpop.xlane.xlu1 %339  ;;  %v360_v4 = vsel %vm359_vm7, %v2590_v46, %v356_v62  ;;  %v374_v14 = vmul.f32 0.5, %v373_v5  ;;  %vm675_vm7 = vcmask 1040384  }
 0x29f   :  { %v345_v2 = vmul.f32 %v340_v1, %v2836_v38  ;;  %v401_v11 = vmul.f32 %v360_v4, %v2913_v12 }
 0x2a0   :  { %v364_v6 = vmul.f32 0.5, %v363_v0  ;;  %v375_v12 = vsub.f32 1.5, %v374_v14 }
 0x2a1   :  { %v2596_v7 = vpop.eup %2595  ;;  %v350_v56 = vadd.f32 1e-05, %v345_v2  ;;  %v407_v21 = vmul.f32 %v2563_v13, %v401_v11 }
 0x2a2   :  { %v365_v9 = vsub.f32 1.5, %v364_v6  ;;  %v382_v10 = vmul.f32 %v2596_v7, %v349_v58  ;;  %vm388_vm11 = vweird.f32 %v2596_v7  ;;  %v376_v32 = vmul.f32 %v2592_v57, %v375_v12 }
 0x2a3   :  { %2597 = vrsqrt.f32 %v350_v56  ;;  %v413_v29 = vadd.f32 %v2564_v22, %v407_v21  ;;  %vm389_vm14 = vmor %vm387_vm13, %vm388_vm11  ;;  %vm397_vm4 = vweird.f32 %v350_v56  ;;  %vm549_vm11 = vcmask 277504  }
 0x2a4   :  { %v366_v61 = vmul.f32 %v2594_v60, %v365_v9  ;;  %v383_v15 = vmul.f32 %v2596_v7, %v382_v10  ;;  %v380_v35 = vsel %vm379_vm0, %v2592_v57, %v376_v32  ;;  %v2565_v57 = vld [vmem:[%s3958_s1 + $0x26] ss:$0 sm:$0xff] }
 0x2a5   :  { %v403_v39 = vmul.f32 %v380_v35, %v2920_v17 }
 0x2a6   :  { %v370_v16 = vsel %vm369_vm10, %v2594_v60, %v366_v61  ;;  %v384_v18 = vmul.f32 0.5, %v383_v15 }
 0x2a7   :  { %v402_v20 = vmul.f32 %v370_v16, %v2924_v19  ;;  %v409_v43 = vmul.f32 %v2563_v13, %v403_v39 }
 0x2a8   :  { %v385_v23 = vsub.f32 1.5, %v384_v18 }
 0x2a9   :  { %v2598_v24 = vpop.eup %2597  ;;  %v408_v25 = vmul.f32 %v2563_v13, %v402_v20  ;;  %v415_v48 = vadd.f32 %v2564_v22, %v409_v43 }
 0x2aa   :  { %v386_v27 = vmul.f32 %v2596_v7, %v385_v23  ;;  %v392_v28 = vmul.f32 %v2598_v24, %v350_v56  ;;  %vm398_vm3 = vweird.f32 %v2598_v24 }
 0x2ab   :  { %v414_v30 = vadd.f32 %v2564_v22, %v408_v25  ;;  %vm399_vm5 = vmor %vm397_vm4, %vm398_vm3 }
 0x2ac   :  { %v390_v19 = vsel %vm389_vm14, %v2596_v7, %v386_v27  ;;  %v393_v34 = vmul.f32 %v2598_v24, %v392_v28 }
 0x2ad   :  { %v418_v33 = vpack.c.bf16 %v414_v30, %v413_v29  ;;  %v404_v36 = vmul.f32 %v390_v19, %v2934_v26 }
 0x2ae   :  { %v394_v37 = vmul.f32 0.5, %v393_v34 }
 0x2af   :  { %2338 = vmatmul.msk.bf16.vlgmr.msra.gmra.mxu1 %vm91_vm1, %v418_v33  ;;  %v410_v41 = vmul.f32 %v2563_v13, %v404_v36 }
 0x2b0   :  { %v395_v42 = vsub.f32 1.5, %v394_v37 }
 0x2b1   :  { %v416_v45 = vadd.f32 %v2564_v22, %v410_v41 }
 0x2b2   :  { %v396_v46 = vmul.f32 %v2598_v24, %v395_v42 }
 0x2b3   :  { %v419_v44 = vpack.c.bf16 %v416_v45, %v415_v48 }
 0x2b4   :  { %v400_v50 = vsel %vm399_vm5, %v2598_v24, %v396_v46 }
 0x2b5   :  { %v405_v51 = vmul.f32 %v400_v50, %v2941_v31 }
 0x2b7   :  { %v411_v52 = vmul.f32 %v2563_v13, %v405_v51 }
 0x2b9   :  { %v417_v26 = vadd.f32 %v2564_v22, %v411_v52 }
 0x2bb   :  { %v420_v53 = vpack.c.bf16 %v417_v26, %v417_v26 }
 0x2bf   :  { %2339 = vmatmul.msk.bf16.gmra.mxu1 %vm91_vm1, %v419_v44 }
 0x2cf   :  { %2340 = vmatmul.msk.bf16.gmra.mxu1 %vm91_vm1, %v420_v53 }
 0x32c   :  { %v457_v17 = vpop.f32.mrf.mxu1 }
 0x32d   :  { %v2988_v63 = vadd.f32 %v2565_v57, %v457_v17 }
 0x334   :  { %v459_v55 = vpop.f32.mrf.mxu1 }
 0x335   :  { %v2993_v1 = vadd.f32 %v2565_v57, %v459_v55 }
 0x337   :  { %v3035_v6 = vpack.c.bf16 %v2993_v1, %v2988_v63 }
 0x33c   :  { %v462_v58 = vpop.f32.mrf.mxu1 }
 0x33d   :  { %v2979_v47 = vadd.f32 %v2565_v57, %v462_v58 }
 0x33f   :  { %480 = vrot.lane.b32.xlu1 %v2979_v47, %s2744_s7 }
 0x344   :  { %v464_v60 = vpop.f32.mrf.mxu1 }
 0x345   :  { %v2982_v62 = vadd.f32 %v2565_v57, %v464_v60 }
 0x347   :  { %482 = vrot.lane.b32.xlu0 %v2982_v62, %s2744_s7  ;;  %747 = vrot.lane.b32.xlu1 %v2982_v62, %s2745_s8  ;;  %v3025_v4 = vpack.c.bf16 %v2982_v62, %v2979_v47 }
 0x34c   :  { %v467_v31 = vpop.f32.mrf.mxu1 }
 0x34d   :  { %v2986_v49 = vadd.f32 %v2565_v57, %v467_v31 }
 0x34f   :  { %484 = vrot.lane.b32.xlu2 %v2986_v49, %s2744_s7  ;;  %749 = vrot.lane.b32.xlu0 %v2986_v49, %s2745_s8  ;;  %v684_v2 = vpack.c.bf16 %v2986_v49, %v2986_v49 }
 0x350   :  { %741 = vrot.lane.b32.xlu1 %v2988_v63, %s2745_s8 }
 0x354   :  { %v469_v0 = vpop.f32.mrf.mxu1 }
 0x357   :  { %478 = vrot.lane.b32.xlu2 %v2993_v1, %s2744_s7  ;;  %745 = vrot.lane.b32.xlu0 %v2979_v47, %s2745_s8 }
 0x358   :  { %1257 = vrot.lane.b32.xlu1 %v2982_v62, %s2746_s9 }
 0x35f   :  { %476 = vrot.lane.b32.xlu2 %v2988_v63, %s2744_s7  ;;  %731 = vrot.lane.b32.xlu0 %v2988_v63, %s2747_s10  ;;  %s2759_s7 = smov 111  }
 0x360   :  { %1004 = vrot.lane.b32.xlu1 %v2986_v49, %s2748_s11 }
 0x367   :  { %743 = vrot.lane.b32.xlu2 %v2993_v1, %s2745_s8  ;;  %735 = vrot.lane.b32.xlu0 %v2979_v47, %s2747_s10 }
 0x368   :  { %1259 = vrot.lane.b32.xlu1 %v2986_v49, %s2746_s9 }
 0x36f   :  { %733 = vrot.lane.b32.xlu2 %v2993_v1, %s2747_s10  ;;  %1000 = vrot.lane.b32.xlu0 %v2979_v47, %s2748_s11 }
 0x370   :  { %996 = vrot.lane.b32.xlu1 %v2988_v63, %s2748_s11 }
 0x377   :  { %1002 = vrot.lane.b32.xlu2 %v2982_v62, %s2748_s11  ;;  %998 = vrot.lane.b32.xlu0 %v2993_v1, %s2748_s11 }
 0x378   :  { %1253 = vrot.lane.b32.xlu1 %v2993_v1, %s2746_s9 }
 0x37f   :  { %737 = vrot.lane.b32.xlu2 %v2982_v62, %s2747_s10  ;;  %739 = vrot.lane.b32.xlu0 %v2986_v49, %s2747_s10 }
 0x380   :  { %988 = vrot.lane.b32.xlu1 %v2993_v1, %s2749_s12 }
 0x387   :  { %1255 = vrot.lane.b32.xlu2 %v2979_v47, %s2746_s9  ;;  %1251 = vrot.lane.b32.xlu0 %v2988_v63, %s2746_s9 }
 0x388   :  { %1245 = vrot.lane.b32.xlu1 %v2979_v47, %s2750_s13 }
 0x38f   :  { %986 = vrot.lane.b32.xlu2 %v2988_v63, %s2749_s12  ;;  %1243 = vrot.lane.b32.xlu0 %v2993_v1, %s2750_s13 }
 0x390   :  { %994 = vrot.lane.b32.xlu1 %v2986_v49, %s2749_s12 }
 0x397   :  { %1241 = vrot.lane.b32.xlu2 %v2988_v63, %s2750_s13  ;;  %992 = vrot.lane.b32.xlu0 %v2982_v62, %s2749_s12 }
 0x398   :  { %692 = vrot.lane.b32.xlu1 %v684_v2, %s2751_s14 }
 0x39f   :  { %990 = vrot.lane.b32.xlu2 %v2979_v47, %s2749_s12  ;;  %690 = vrot.lane.b32.xlu0 %v3025_v4, %s2751_s14 }
 0x3a0   :  { %1457 = vrot.lane.b32.xlu1 %v684_v2, %s2752_s0 }
 0x3a7   :  { %1247 = vrot.lane.b32.xlu2 %v2982_v62, %s2750_s13  ;;  %1249 = vrot.lane.b32.xlu0 %v2986_v49, %s2750_s13  ;;  %s2298_s13 = sshll.u32 %s3960_s3, 4  ;;  %s2299_s13 = int_to_ptr.hbm [resolvable:$true] %s2298_s13 }
 0x3a9   :  { %v485_v5 = vpop.permute.xlu2 %484 }
 0x3aa   :  { %2341 = vmatpush.xpose.msk.msrb.mxu2 %vm486_vm6, %v485_v5 }
 0x3af   :  { %688 = vrot.lane.b32.xlu2 %v3035_v6, %s2751_s14  ;;  %1202 = vrot.lane.b32.xlu0 %v684_v2, %s2753_s15 }
 0x3b1   :  { %v479_v7 = vpop.permute.xlu2 %478  ;;  %v481_v56 = vpop.permute.xlu1 %480 }
 0x3b7   :  { %1200 = vrot.lane.b32.xlu2 %v3025_v4, %s2753_s15  ;;  %947 = vrot.lane.b32.xlu0 %v684_v2, %s2754_s16  ;;  %v2755_v2 = vmov -1e+09  }
 0x3b9   :  { %v477_v9 = vpop.permute.xlu2 %476  ;;  %v483_v10 = vpop.permute.xlu0 %482 }
 0x3ba   :  { %v748_v11 = vpop.permute.xlu1 %747  ;;  %2342 = vmatpush.xpose.msk.msrb.mxu2 %vm486_vm6, %v483_v10 }
 0x3be   :  { %2343 = vmatpush.xpose.msk.msrb.mxu2 %vm486_vm6, %v481_v56 }
 0x3bf   :  { %1455 = vrot.lane.b32.xlu2 %v3025_v4, %s2752_s0 }
 0x3c1   :  { %v744_v13 = vpop.permute.xlu2 %743  ;;  %v750_v14 = vpop.permute.xlu0 %749 }
 0x3c2   :  { %v742_v61 = vpop.permute.xlu1 %741  ;;  %2344 = vmatpush.xpose.msk.msrb.mxu2 %vm486_vm6, %v479_v7  ;;  %2354 = vmatpush.xpose.msk.msrb.mxu1 %vm486_vm6, %v750_v14 }
 0x3c6   :  { %2345 = vmatpush.xpose.msk.msrb.mxu2 %vm486_vm6, %v477_v9  ;;  %2355 = vmatpush.xpose.msk.msrb.mxu1 %vm486_vm6, %v748_v11 }
 0x3c9   :  { %v734_v15 = vpop.permute.xlu2 %733  ;;  %v746_v16 = vpop.permute.xlu0 %745  ;;  %2346 = vmatmul.msk.f32.vlgmr.msrb.gmra.mxu2 %vm486_vm6, %v2988_v63 }
 0x3ca   :  { %v1258_v18 = vpop.permute.xlu1 %1257  ;;  %2356 = vmatpush.xpose.msk.msrb.mxu1 %vm486_vm6, %v746_v16 }
 0x3ce   :  { %2357 = vmatpush.xpose.msk.msrb.mxu1 %vm486_vm6, %v744_v13 }
 0x3d1   :  { %v1003_v20 = vpop.permute.xlu2 %1002  ;;  %v732_v21 = vpop.permute.xlu0 %731  ;;  %2347 = vmatmul.msk.f32.gmra.mxu2 %vm486_vm6, %v2993_v1 }
 0x3d2   :  { %v1005_v22 = vpop.permute.xlu1 %1004  ;;  %2358 = vmatpush.xpose.msk.msrb.mxu1 %vm486_vm6, %v742_v61 }
 0x3d3   :  { %2367 = vmatpush.xpose.msk.msra.mxu2 %vm486_vm6, %v1005_v22 }
 0x3d5   :  { %2359 = vmatmul.msk.f32.vlgmr.msrb.gmra.mxu1 %vm486_vm6, %v732_v21 }
 0x3d7   :  { %2368 = vmatpush.xpose.msk.msra.mxu2 %vm486_vm6, %v1003_v20 }
 0x3d9   :  { %v738_v12 = vpop.permute.xlu2 %737  ;;  %v736_v23 = vpop.permute.xlu0 %735  ;;  %2348 = vmatmul.msk.f32.gmra.mxu2 %vm486_vm6, %v2979_v47  ;;  %v222_v47 = vlaneseq }
 0x3da   :  { %v1260_v24 = vpop.permute.xlu1 %1259 }
 0x3db   :  { %2380 = vmatpush.xpose.msk.msra.mxu1 %vm486_vm6, %v1260_v24  ;;  %v229_v31 = vand.u32 127, %v222_v47 }
 0x3dd   :  { %2360 = vmatmul.msk.f32.gmra.mxu1 %vm486_vm6, %v734_v15  ;;  %vm251_vm8 = vcmp.lt.s32.totalorder %v229_v31, 17  ;;  %vm272_vm10 = vcmp.ge.s32.totalorder %v229_v31, 17  ;;  %vm278_vm14 = vcmp.lt.s32.totalorder %v229_v31, 34 }
 0x3de   :  { %v3093_v5 = vsel %vm251_vm8, 0.0, %v2755_v2  ;;  %vm282_vm5 = vmand %vm272_vm10, %vm278_vm14 }
 0x3df   :  { %2381 = vmatpush.xpose.msk.msra.mxu1 %vm486_vm6, %v1258_v18 }
 0x3e1   :  { %v1256_v25 = vpop.permute.xlu2 %1255  ;;  %v1001_v27 = vpop.permute.xlu0 %1000  ;;  %2349 = vmatmul.msk.f32.gmra.mxu2 %vm486_vm6, %v2982_v62  ;;  %v223_v62 = vshrl.u32 %v222_v47, 7 }
 0x3e2   :  { %v997_v28 = vpop.permute.xlu1 %996  ;;  %2369 = vmatpush.xpose.msk.msra.mxu2 %vm486_vm6, %v1001_v27 }
 0x3e3   :  { %2382 = vmatpush.xpose.msk.msra.mxu1 %vm486_vm6, %v1256_v25  ;;  %v227_v16 = vadd.s32 32, %v223_v62 }
 0x3e5   :  { %2361 = vmatmul.msk.f32.gmra.mxu1 %vm486_vm6, %v736_v23  ;;  %vm266_vm4 = vcmp.lt.s32.totalorder %v227_v16, 34 }
 0x3e9   :  { %v987_v29 = vpop.permute.xlu2 %986  ;;  %v999_v30 = vpop.permute.xlu0 %998  ;;  %2350 = vmatmul.msk.f32.gmra.mxu2 %vm486_vm6, %v2986_v49  ;;  %v225_v49 = vadd.s32 16, %v223_v62 }
 0x3ea   :  { %v1254_v32 = vpop.permute.xlu1 %1253  ;;  %2370 = vmatpush.xpose.msk.msra.mxu2 %vm486_vm6, %v999_v30 }
 0x3eb   :  { %2383 = vmatpush.xpose.msk.msra.mxu1 %vm486_vm6, %v1254_v32  ;;  %vm259_vm9 = vcmp.ge.s32.totalorder %v225_v49, 17  ;;  %vm237_vm12 = vcmp.lt.s32.totalorder %v225_v49, 17 }
 0x3ec   :  { %vm275_vm13 = vmand %vm259_vm9, %vm272_vm10 }
 0x3ed   :  { %2362 = vmatmul.msk.f32.gmra.mxu1 %vm486_vm6, %v738_v12  ;;  %vm3102_vm15 = vmand %vm237_vm12, %vm251_vm8 }
 0x3ee   :  { %2371 = vmatpush.xpose.msk.msra.mxu2 %vm486_vm6, %v997_v28  ;;  %vm281_vm0 = vmand %vm275_vm13, %vm278_vm14 }
 0x3ef   :  { %vm286_vm3 = vmor %vm3102_vm15, %vm281_vm0 }
 0x3f0   :  { %v3119_v12 = vsel %vm286_vm3, 0.0, %v2755_v2  ;;  %vm277_vm8 = vmand %vm266_vm4, %vm272_vm10  ;;  %vm562_vm10 = vcmask 271360  }
 0x3f1   :  { %v1242_v33 = vpop.permute.xlu2 %1241  ;;  %v740_v19 = vpop.permute.xlu0 %739  ;;  %2372 = vmatmul.msk.f32.vlgmr.msra.gmra.mxu2 %vm486_vm6, %v987_v29  ;;  %vm283_vm9 = vmand %vm277_vm8, %vm278_vm14 }
 0x3f2   :  { %v989_v34 = vpop.permute.xlu1 %988 }
 0x3f5   :  { %2363 = vmatmul.msk.f32.gmra.mxu1 %vm486_vm6, %v740_v19 }
 0x3f9   :  { %v991_v35 = vpop.permute.xlu2 %990  ;;  %v1252_v36 = vpop.permute.xlu0 %1251  ;;  %2373 = vmatmul.msk.f32.gmra.mxu2 %vm486_vm6, %v989_v34  ;;  %v292_v34 = vsel %vm282_vm5, 0.0, %v2755_v2 }
 0x3fa   :  { %v1246_v37 = vpop.permute.xlu1 %1245  ;;  %2384 = vmatpush.xpose.msk.msra.mxu1 %vm486_vm6, %v1252_v36 }
 0x3fd   :  { %2385 = vmatmul.msk.f32.vlgmr.msra.gmra.mxu1 %vm486_vm6, %v1242_v33 }
 0x401   :  { %v1248_v39 = vpop.permute.xlu2 %1247  ;;  %v1244_v41 = vpop.permute.xlu0 %1243  ;;  %2374 = vmatmul.msk.f32.gmra.mxu2 %vm486_vm6, %v991_v35 }
 0x402   :  { %v995_v42 = vpop.permute.xlu1 %994 }
 0x405   :  { %2386 = vmatmul.msk.f32.gmra.mxu1 %vm486_vm6, %v1244_v41  ;;  %v3142_v41 = vsel %vm283_vm9, 0.0, %v2755_v2 }
 0x409   :  { %v689_v43 = vpop.permute.xlu2 %688  ;;  %v993_v45 = vpop.permute.xlu0 %992 }
 0x40a   :  { %v693_v46 = vpop.permute.xlu1 %692  ;;  %2375 = vmatmul.msk.f32.gmra.mxu2 %vm486_vm6, %v993_v45 }
 0x40b   :  { %v706_v48 = vsel %vm675_vm7, %v693_v46, 0 }
 0x40c   :  { %713 = vmatpush.bf16.msrb.mxu0 %v706_v48  ;;  %2509 = vmatpush.bf16.msra.mxu3 %v706_v48 }
 0x40d   :  { %2387 = vmatmul.msk.f32.gmra.mxu1 %vm486_vm6, %v1246_v37 }
 0x411   :  { %v1201_v44 = vpop.permute.xlu2 %1200  ;;  %v691_v50 = vpop.permute.xlu0 %690 }
 0x412   :  { %v1458_v51 = vpop.permute.xlu1 %1457  ;;  %714 = vmatpush.bf16.msrb.mxu0 %v691_v50  ;;  %2510 = vmatpush.bf16.msra.mxu3 %v691_v50 }
 0x413   :  { %v1471_v52 = vsel %vm675_vm7, %v1458_v51, 0  ;;  %2376 = vmatmul.msk.f32.gmra.mxu2 %vm486_vm6, %v995_v42 }
 0x414   :  { %1478 = vmatpush.bf16.msrb.mxu2 %v1471_v52 }
 0x415   :  { %2388 = vmatmul.msk.f32.gmra.mxu1 %vm486_vm6, %v1248_v39 }
 0x416   :  { %715 = vmatpush.bf16.msrb.mxu0 %v689_v43  ;;  %2511 = vmatpush.bf16.msra.mxu3 %v689_v43 }
 0x419   :  { %v1456_v26 = vpop.permute.xlu2 %1455  ;;  %v1250_v53 = vpop.permute.xlu0 %1249 }
 0x41a   :  { %1479 = vmatpush.bf16.msrb.mxu2 %v1456_v26 }
 0x41d   :  { %2389 = vmatmul.msk.f32.gmra.mxu1 %vm486_vm6, %v1250_v53 }
 0x421   :  { %v1203_v17 = vpop.permute.xlu0 %1202 }
 0x422   :  { %v1216_v55 = vsel %vm675_vm7, %v1203_v17, 0 }
 0x423   :  { %1223 = vmatpush.bf16.msrb.mxu3 %v1216_v55 }
 0x427   :  { %1224 = vmatpush.bf16.msrb.mxu3 %v1201_v44 }
 0x429   :  { %v948_v57 = vpop.permute.xlu0 %947 }
 0x42a   :  { %v961_v58 = vsel %vm675_vm7, %v948_v57, 0 }
 0x42b   :  { %968 = vmatpush.bf16.msra.mxu0 %v961_v58 }
 0x44c   :  { %v524_v60 = vpop.f32.mrf.mxu2 }
 0x44d   :  { %v539_v56 = vmul.f32 0.35355338, %v524_v60 }
 0x44f   :  { %v3108_v14 = vadd.f32 %v539_v56, %v3093_v5 }
 0x451   :  { %v550_v22 = vsel %vm549_vm11, %v3108_v14, -inf }
 0x452   :  { %v788_v63 = vpop.f32.mrf.mxu1 }
 0x453   :  { %v803_v0 = vmul.f32 0.35355338, %v788_v63 }
 0x454   :  { %v527_v1 = vpop.f32.mrf.mxu2 }
 0x455   :  { %v3096_v7 = vadd.f32 %v803_v0, %v3093_v5  ;;  %v540_v18 = vmul.f32 0.35355338, %v527_v1 }
 0x457   :  { %v813_v9 = vsel %vm549_vm11, %v3096_v7, -inf  ;;  %v3122_v25 = vadd.f32 %v540_v18, %v3093_v5 }
 0x458   :  { %814 = vmax.xlane.f32.xlu2 %v813_v9 }
 0x459   :  { %v553_v32 = vsel %vm549_vm11, %v3122_v25, -inf }
 0x45a   :  { %v791_v11 = vpop.f32.mrf.mxu1 }
 0x45b   :  { %v804_v13 = vmul.f32 0.35355338, %v791_v11 }
 0x45c   :  { %v530_v61 = vpop.f32.mrf.mxu2 }
 0x45d   :  { %v3111_v15 = vadd.f32 %v804_v13, %v3093_v5  ;;  %v541_v20 = vmul.f32 0.35355338, %v530_v61 }
 0x45f   :  { %v816_v21 = vsel %vm549_vm11, %v3111_v15, -inf  ;;  %v3125_v27 = vadd.f32 %v541_v20, %v3119_v12 }
 0x460   :  { %817 = vmax.xlane.f32.xlu1 %v816_v21  ;;  %551 = vmax.xlane.f32.xlu2 %v550_v22 }
 0x461   :  { %v556_v33 = vsel %vm549_vm11, %v3125_v27, -inf }
 0x462   :  { %v794_v23 = vpop.f32.mrf.mxu1 }
 0x463   :  { %v805_v24 = vmul.f32 0.35355338, %v794_v23 }
 0x464   :  { %v533_v28 = vpop.f32.mrf.mxu2 }
 0x465   :  { %v3128_v29 = vadd.f32 %v805_v24, %v3119_v12  ;;  %v542_v30 = vmul.f32 0.35355338, %v533_v28 }
 0x467   :  { %v819_v19 = vsel %vm549_vm11, %v3128_v29, -inf  ;;  %v3140_v37 = vadd.f32 %v542_v30, %v292_v34 }
 0x468   :  { %554 = vmax.xlane.f32.xlu1 %v553_v32  ;;  %557 = vmax.xlane.f32.xlu2 %v556_v33 }
 0x469   :  { %820 = vmax.xlane.f32.xlu0 %v819_v19  ;;  %v559_v45 = vsel %vm549_vm11, %v3140_v37, -inf }
 0x46a   :  { %v797_v35 = vpop.f32.mrf.mxu1 }
 0x46b   :  { %v806_v36 = vmul.f32 0.35355338, %v797_v35 }
 0x46c   :  { %v536_v39 = vpop.f32.mrf.mxu2 }
 0x46d   :  { %v543_v42 = vmul.f32 0.35355338, %v536_v39  ;;  %v3144_v43 = vadd.f32 %v806_v36, %v292_v34 }
 0x46f   :  { %v822_v46 = vsel %vm549_vm11, %v3144_v43, -inf  ;;  %v3151_v48 = vadd.f32 %v543_v42, %v3142_v41 }
 0x470   :  { %560 = vmax.xlane.f32.xlu1 %v559_v45  ;;  %823 = vmax.xlane.f32.xlu2 %v822_v46 }
 0x471   :  { %v563_v44 = vsel %vm562_vm10, %v3151_v48, -inf }
 0x472   :  { %v800_v50 = vpop.f32.mrf.mxu1  ;;  %564 = vmax.xlane.f32.xlu0 %v563_v44 }
 0x473   :  { %v807_v51 = vmul.f32 0.35355338, %v800_v50 }
 0x474   :  { %v1043_v52 = vpop.f32.mrf.mxu2 }
 0x475   :  { %v1058_v26 = vmul.f32 0.35355338, %v1043_v52  ;;  %v3156_v53 = vadd.f32 %v807_v51, %v3142_v41 }
 0x477   :  { %v825_v17 = vsel %vm562_vm10, %v3156_v53, -inf  ;;  %v3161_v55 = vadd.f32 %v1058_v26, %v3093_v5 }
 0x478   :  { %826 = vmax.xlane.f32.xlu2 %v825_v17 }
 0x479   :  { %v1068_v57 = vsel %vm549_vm11, %v3161_v55, -inf }
 0x47a   :  { %v1298_v58 = vpop.f32.mrf.mxu1  ;;  %1069 = vmax.xlane.f32.xlu0 %v1068_v57 }
 0x47b   :  { %v1313_v47 = vmul.f32 0.35355338, %v1298_v58 }
 0x47c   :  { %v1046_v60 = vpop.f32.mrf.mxu2 }
 0x47d   :  { %v1059_v62 = vmul.f32 0.35355338, %v1046_v60  ;;  %v3166_v31 = vadd.f32 %v1313_v47, %v3093_v5 }
 0x47f   :  { %v1323_v49 = vsel %vm549_vm11, %v3166_v31, -inf  ;;  %v3171_v63 = vadd.f32 %v1059_v62, %v3093_v5 }
 0x480   :  { %1324 = vmax.xlane.f32.xlu1 %v1323_v49 }
 0x481   :  { %v1071_v0 = vsel %vm549_vm11, %v3171_v63, -inf }
 0x482   :  { %v1301_v1 = vpop.f32.mrf.mxu1  ;;  %1072 = vmax.xlane.f32.xlu2 %v1071_v0 }
 0x483   :  { %v1314_v2 = vmul.f32 0.35355338, %v1301_v1 }
 0x484   :  { %v1049_v56 = vpop.f32.mrf.mxu2 }
 0x485   :  { %v3176_v9 = vadd.f32 %v1314_v2, %v3093_v5  ;;  %v1060_v10 = vmul.f32 0.35355338, %v1049_v56 }
 0x487   :  { %v1326_v11 = vsel %vm549_vm11, %v3176_v9, -inf  ;;  %v3181_v16 = vadd.f32 %v1060_v10, %v3119_v12 }
 0x488   :  { %1327 = vmax.xlane.f32.xlu0 %v1326_v11 }
 0x489   :  { %v1074_v5 = vsel %vm549_vm11, %v3181_v16, -inf }
 0x48a   :  { %v1304_v13 = vpop.f32.mrf.mxu1 }
 0x48b   :  { %v1315_v61 = vmul.f32 0.35355338, %v1304_v13 }
 0x48d   :  { %v1052_v18 = vpop.f32.mrf.mxu2  ;;  %v3184_v20 = vadd.f32 %v1315_v61, %v3119_v12 }
 0x48e   :  { %v1061_v21 = vmul.f32 0.35355338, %v1052_v18 }
 0x48f   :  { %v1329_v22 = vsel %vm549_vm11, %v3184_v20, -inf }
 0x490   :  { %1330 = vmax.xlane.f32.xlu1 %v1329_v22  ;;  %1075 = vmax.xlane.f32.xlu0 %v1074_v5  ;;  %v3190_v23 = vadd.f32 %v1061_v21, %v292_v34 }
 0x492   :  { %v1307_v24 = vpop.f32.mrf.mxu1  ;;  %v1077_v28 = vsel %vm549_vm11, %v3190_v23, -inf }
 0x493   :  { %v1316_v30 = vmul.f32 0.35355338, %v1307_v24  ;;  %1078 = vmax.xlane.f32.xlu2 %v1077_v28 }
 0x495   :  { %v3194_v32 = vadd.f32 %v1316_v30, %v292_v34 }
 0x496   :  { %v1055_v35 = vpop.f32.mrf.mxu2 }
 0x497   :  { %v1332_v12 = vsel %vm549_vm11, %v3194_v32, -inf  ;;  %v1062_v39 = vmul.f32 0.35355338, %v1055_v35 }
 0x498   :  { %1333 = vmax.xlane.f32.xlu0 %v1332_v12 }
 0x499   :  { %v3204_v45 = vadd.f32 %v1062_v39, %v3142_v41 }
 0x49a   :  { %v1310_v33 = vpop.f32.mrf.mxu1 }
 0x49b   :  { %v1317_v19 = vmul.f32 0.35355338, %v1310_v33  ;;  %v1080_v34 = vsel %vm562_vm10, %v3204_v45, -inf }
 0x49d   :  { %v3199_v36 = vadd.f32 %v1317_v19, %v3142_v41 }
 0x49f   :  { %v1335_v42 = vsel %vm562_vm10, %v3199_v36, -inf }
 0x4a0   :  { %1336 = vmax.xlane.f32.xlu2 %v1335_v42 }
 0x4a8   :  { %1081 = vmax.xlane.f32.xlu2 %v1080_v34 }
 0x4cb   :  { %v815_v46 = vpop.xlane.xlu2 %814 }
 0x4cc   :  { %v828_v44 = vsub.f32 %v3096_v7, %v815_v46 }
 0x4ce   :  { %v833_v50 = vmul.f32 1.442695, %v828_v44 }
 0x4d0   :  { %2599 = vpow2.f32 %v833_v50 }
 0x4d3   :  { %v818_v51 = vpop.xlane.xlu1 %817  ;;  %v552_v52 = vpop.xlane.xlu2 %551 }
 0x4d4   :  { %v829_v26 = vsub.f32 %v3111_v15, %v818_v51  ;;  %v566_v17 = vsub.f32 %v3108_v14, %v552_v52 }
 0x4d6   :  { %v3211_v57 = vpop.eup %2599  ;;  %v835_v58 = vmul.f32 1.442695, %v829_v26  ;;  %v571_v41 = vmul.f32 1.442695, %v566_v17 }
 0x4d7   :  { %v843_v47 = vsel %vm549_vm11, %v3211_v57, 0.0 }
 0x4d8   :  { %2601 = vpow2.f32 %v835_v58  ;;  %844 = vadd.xlane.f32.xlu1 %v843_v47 }
 0x4d9   :  { %2603 = vpow2.f32 %v571_v41 }
 0x4db   :  { %v555_v60 = vpop.xlane.xlu1 %554  ;;  %v558_v7 = vpop.xlane.xlu2 %557 }
 0x4dc   :  { %v567_v62 = vsub.f32 %v3122_v25, %v555_v60  ;;  %v568_v49 = vsub.f32 %v3125_v27, %v558_v7  ;;  %v821_v21 = vpop.xlane.xlu0 %820 }
 0x4de   :  { %v3217_v0 = vpop.eup %2601  ;;  %v573_v15 = vmul.f32 1.442695, %v567_v62  ;;  %v575_v14 = vmul.f32 1.442695, %v568_v49 }
 0x4df   :  { %v3219_v1 = vpop.eup %2603  ;;  %v846_v2 = vsel %vm549_vm11, %v3217_v0, 0.0 }
 0x4e0   :  { %2605 = vpow2.f32 %v573_v15  ;;  %v581_v56 = vsel %vm549_vm11, %v3219_v1, 0.0  ;;  %847 = vadd.xlane.f32.xlu2 %v846_v2 }
 0x4e1   :  { %2607 = vpow2.f32 %v575_v14  ;;  %582 = vadd.xlane.f32.xlu0 %v581_v56 }
 0x4e3   :  { %v561_v10 = vpop.xlane.xlu1 %560  ;;  %v3240_v28 = vpop.xlane.xlu2 %823 }
 0x4e4   :  { %v569_v25 = vsub.f32 %v3140_v37, %v561_v10 }
 0x4e5   :  { %v565_v5 = vpop.xlane.xlu0 %564 }
 0x4e6   :  { %v3226_v27 = vpop.eup %2605  ;;  %v577_v11 = vmul.f32 1.442695, %v569_v25 }
 0x4e7   :  { %v3228_v13 = vpop.eup %2607  ;;  %v584_v61 = vsel %vm549_vm11, %v3226_v27, 0.0 }
 0x4e8   :  { %2609 = vpow2.f32 %v577_v11  ;;  %585 = vadd.xlane.f32.xlu1 %v584_v61  ;;  %v587_v18 = vsel %vm549_vm11, %v3228_v13, 0.0 }
 0x4e9   :  { %588 = vadd.xlane.f32.xlu2 %v587_v18 }
 0x4eb   :  { %v3246_v12 = vpop.xlane.xlu2 %826 }
 0x4ed   :  { %v1070_v24 = vpop.xlane.xlu0 %1069 }
 0x4ee   :  { %v3234_v22 = vpop.eup %2609  ;;  %v1083_v26 = vsub.f32 %v3161_v55, %v1070_v24 }
 0x4ef   :  { %v590_v37 = vsel %vm549_vm11, %v3234_v22, 0.0 }
 0x4f0   :  { %591 = vadd.xlane.f32.xlu1 %v590_v37  ;;  %v1088_v41 = vmul.f32 1.442695, %v1083_v26 }
 0x4f3   :  { %v1325_v52 = vpop.xlane.xlu1 %1324 }
 0x4f5   :  { %945 = vrot.lane.b32.xlu0 %v3025_v4, %s2754_s16  ;;  %v1073_v39 = vpop.xlane.xlu2 %1072  ;;  %v570_v4 = vsub.f32 %v3151_v48, %v565_v5 }
 0x4f6   :  { %v1084_v42 = vsub.f32 %v3171_v63, %v1073_v39  ;;  %v1338_v63 = vsub.f32 %v3166_v31, %v1325_v52 }
 0x4f7   :  { %v579_v50 = vmul.f32 1.442695, %v570_v4 }
 0x4f8   :  { %v1090_v34 = vmul.f32 1.442695, %v1084_v42  ;;  %v1343_v47 = vmul.f32 1.442695, %v1338_v63 }
 0x4fb   :  { %v1328_v30 = vpop.xlane.xlu0 %1327 }
 0x4fc   :  { %v1339_v33 = vsub.f32 %v3176_v9, %v1328_v30 }
 0x4fe   :  { %v1345_v35 = vmul.f32 1.442695, %v1339_v33 }
 0x500   :  { %2611 = vpow2.f32 %v1345_v35 }
 0x501   :  { %1453 = vrot.lane.b32.xlu2 %v3035_v6, %s2752_s0  ;;  %2613 = vpow2.f32 %v1090_v34 }
 0x502   :  { %2615 = vpow2.f32 %v579_v50 }
 0x503   :  { %v1076_v19 = vpop.xlane.xlu0 %1075  ;;  %v1331_v7 = vpop.xlane.xlu1 %1330 }
 0x504   :  { %v1340_v55 = vsub.f32 %v3184_v20, %v1331_v7  ;;  %v1085_v25 = vsub.f32 %v3181_v16, %v1076_v19  ;;  %v831_v16 = vsub.f32 %v3144_v43, %v3240_v28  ;;  %v832_v43 = vsub.f32 %v3156_v53, %v3246_v12 }
 0x506   :  { %v3251_v44 = vpop.eup %2611  ;;  %v1079_v48 = vpop.xlane.xlu2 %1078  ;;  %v1347_v14 = vmul.f32 1.442695, %v1340_v55  ;;  %v839_v35 = vmul.f32 1.442695, %v831_v16  ;;  %v841_v4 = vmul.f32 1.442695, %v832_v43 }
 0x507   :  { %v1356_v9 = vsel %vm549_vm11, %v3251_v44, 0.0  ;;  %v3258_v58 = vpop.eup %2613  ;;  %v1086_v60 = vsub.f32 %v3190_v23, %v1079_v48  ;;  %v830_v23 = vsub.f32 %v3128_v29, %v821_v21  ;;  %v1092_v21 = vmul.f32 1.442695, %v1085_v25 }
 0x508   :  { %v1101_v62 = vsel %vm549_vm11, %v3258_v58, 0.0 }
 0x509   :  { %1198 = vrot.lane.b32.xlu1 %v3035_v6, %s2753_s15  ;;  %v1094_v31 = vmul.f32 1.442695, %v1086_v60  ;;  %v837_v20 = vmul.f32 1.442695, %v830_v23 }
 0x50b   :  { %v1334_v46 = vpop.xlane.xlu0 %1333 }
 0x50c   :  { %v1341_v51 = vsub.f32 %v3194_v32, %v1334_v46  ;;  %v3261_v32 = vpop.eup %2615 }
 0x50d   :  { %v593_v49 = vsel %vm562_vm10, %v3261_v32, 0.0 }
 0x50e   :  { %v1349_v17 = vmul.f32 1.442695, %v1341_v51 }
 0x510   :  { %2617 = vpow2.f32 %v1349_v17 }
 0x511   :  { %2619 = vpow2.f32 %v1088_v41 }
 0x512   :  { %2621 = vpow2.f32 %v1343_v47 }
 0x513   :  { %2623 = vpow2.f32 %v1094_v31  ;;  %v1337_v61 = vpop.xlane.xlu2 %1336 }
 0x514   :  { %2625 = vpow2.f32 %v1347_v14  ;;  %v1342_v37 = vsub.f32 %v3199_v36, %v1337_v61 }
 0x515   :  { %2627 = vpow2.f32 %v837_v20 }
 0x516   :  { %v3268_v15 = vpop.eup %2617  ;;  %2629 = vpow2.f32 %v1092_v21  ;;  %v1351_v30 = vmul.f32 1.442695, %v1342_v37 }
 0x517   :  { %v3271_v2 = vpop.eup %2619  ;;  %v1362_v56 = vsel %vm549_vm11, %v3268_v15, 0.0 }
 0x518   :  { %v3275_v10 = vpop.eup %2621  ;;  %v1098_v11 = vsel %vm549_vm11, %v3271_v2, 0.0  ;;  %2631 = vpow2.f32 %v1351_v30 }
 0x519   :  { %v1353_v29 = vsel %vm549_vm11, %v3275_v10, 0.0  ;;  %v3282_v18 = vpop.eup %2623  ;;  %2633 = vpow2.f32 %v839_v35 }
 0x51a   :  { %v1107_v5 = vsel %vm549_vm11, %v3282_v18, 0.0  ;;  %v3287_v24 = vpop.eup %2625  ;;  %2635 = vpow2.f32 %v841_v4 }
 0x51b   :  { %v1359_v33 = vsel %vm549_vm11, %v3287_v24, 0.0  ;;  %v3293_v19 = vpop.eup %2627  ;;  %v1082_v12 = vpop.xlane.xlu2 %1081 }
 0x51c   :  { %v849_v36 = vsel %vm549_vm11, %v3293_v19, 0.0  ;;  %v3297_v39 = vpop.eup %2629  ;;  %v1087_v47 = vsub.f32 %v3204_v45, %v1082_v12 }
 0x51d   :  { %v1104_v28 = vsel %vm549_vm11, %v3297_v39, 0.0 }
 0x51e   :  { %v3303_v42 = vpop.eup %2631  ;;  %v1096_v23 = vmul.f32 1.442695, %v1087_v47 }
 0x51f   :  { %1357 = vadd.xlane.f32.xlu0 %v1356_v9  ;;  %v1365_v34 = vsel %vm562_vm10, %v3303_v42, 0.0  ;;  %v3307_v46 = vpop.eup %2633 }
 0x520   :  { %v852_v53 = vsel %vm549_vm11, %v3307_v46, 0.0  ;;  %v3313_v50 = vpop.eup %2635 }
 0x521   :  { %v855_v51 = vsel %vm562_vm10, %v3313_v50, 0.0 }
 0x527   :  { %1102 = vadd.xlane.f32.xlu0 %v1101_v62 }
 0x52a   :  { %594 = vadd.xlane.f32.xlu2 %v593_v49 }
 0x52f   :  { %1363 = vadd.xlane.f32.xlu0 %v1362_v56 }
 0x532   :  { %1099 = vadd.xlane.f32.xlu2 %v1098_v11 }
 0x533   :  { %1354 = vadd.xlane.f32.xlu1 %v1353_v29 }
 0x537   :  { %1108 = vadd.xlane.f32.xlu0 %v1107_v5 }
 0x53b   :  { %1360 = vadd.xlane.f32.xlu1 %v1359_v33 }
 0x53f   :  { %850 = vadd.xlane.f32.xlu0 %v849_v36 }
 0x543   :  { %1105 = vadd.xlane.f32.xlu1 %v1104_v28 }
 0x547   :  { %1366 = vadd.xlane.f32.xlu0 %v1365_v34 }
 0x54a   :  { %943 = vrot.lane.b32.xlu2 %v3035_v6, %s2754_s16 }
 0x54b   :  { %853 = vadd.xlane.f32.xlu1 %v852_v53  ;;  %v3317_v52 = vpop.xlane.xlu1 %844 }
 0x553   :  { %v3319_v9 = vpop.xlane.xlu2 %847  ;;  %856 = vadd.xlane.f32.xlu1 %v855_v51 }
 0x554   :  { %v583_v26 = vpop.xlane.xlu0 %582 }
 0x555   :  { %2637 = vrcp.f32 %v583_v26  ;;  %v607_v14 = vand.u32 2147483648, %v583_v26  ;;  %vm601_vm13 = vweird.f32 %v583_v26  ;;  %v605_v20 = vand.u32 2147483647, %v583_v26 }
 0x557   :  { %v608_v30 = vor.u32 1.1754944e-38, %v607_v14  ;;  %vm606_vm0 = vcmp.eq.f32.partialorder %v605_v20, 8.507059e+37 }
 0x55b   :  { %v2638_v63 = vpop.eup %2637  ;;  %v586_v17 = vpop.xlane.xlu1 %585 }
 0x55c   :  { %v597_v6 = vmul.f32 %v2638_v63, %v583_v26  ;;  %2639 = vrcp.f32 %v586_v17  ;;  %v589_v48 = vpop.xlane.xlu2 %588  ;;  %vm602_vm12 = vweird.f32 %v2638_v63  ;;  %v619_v45 = vand.u32 2147483647, %v586_v17 }
 0x55d   :  { %2641 = vrcp.f32 %v589_v48  ;;  %vm3322_vm14 = vmor %vm601_vm13, %vm602_vm12  ;;  %v621_v29 = vand.u32 2147483648, %v586_v17  ;;  %vm615_vm3 = vweird.f32 %v586_v17  ;;  %vm629_vm9 = vweird.f32 %v589_v48 }
 0x55e   :  { %v598_v41 = vsub.f32 1.0, %v597_v6  ;;  %vm620_vm5 = vcmp.eq.f32.partialorder %v619_v45, 8.507059e+37  ;;  %v635_v12 = vand.u32 2147483648, %v589_v48  ;;  %v633_v26 = vand.u32 2147483647, %v589_v48 }
 0x55f   :  { %v622_v43 = vor.u32 1.1754944e-38, %v621_v29 }
 0x560   :  { %v599_v60 = vmul.f32 %v2638_v63, %v598_v41 }
 0x562   :  { %v2640_v7 = vpop.eup %2639  ;;  %v600_v62 = vadd.f32 %v2638_v63, %v599_v60 }
 0x563   :  { %v611_v55 = vmul.f32 %v2640_v7, %v586_v17  ;;  %v592_v31 = vpop.xlane.xlu1 %591  ;;  %v2642_v49 = vpop.eup %2641  ;;  %vm616_vm15 = vweird.f32 %v2640_v7 }
 0x564   :  { %2643 = vrcp.f32 %v592_v31  ;;  %v1454_v56 = vpop.permute.xlu2 %1453  ;;  %v625_v11 = vmul.f32 %v2642_v49, %v589_v48  ;;  %v604_v21 = vsel %vm3322_vm14, %v2638_v63, %v600_v62  ;;  %vm617_vm4 = vmor %vm615_vm3, %vm616_vm15  ;;  %vm630_vm8 = vweird.f32 %v2642_v49 }
 0x565   :  { %v612_v25 = vsub.f32 1.0, %v611_v55  ;;  %1480 = vmatpush.bf16.msrb.mxu2 %v1454_v56  ;;  %2645 = vpow2.f32 %v1096_v23  ;;  %v609_v28 = vsel %vm606_vm0, %v608_v30, %v604_v21  ;;  %vm3334_vm12 = vmor %vm629_vm9, %vm630_vm8  ;;  %v647_v60 = vand.u32 2147483647, %v592_v31 }
 0x566   :  { %v626_v5 = vsub.f32 1.0, %v625_v11  ;;  %v3329_v6 = vmul.f32 %v3219_v1, %v609_v28  ;;  %v636_v23 = vor.u32 1.1754944e-38, %v635_v12  ;;  %vm634_vm14 = vcmp.eq.f32.partialorder %v633_v26, 8.507059e+37 }
 0x567   :  { %v613_v37 = vmul.f32 %v2640_v7, %v612_v25  ;;  %v946_v16 = vpop.permute.xlu0 %945  ;;  %vm643_vm15 = vweird.f32 %v592_v31  ;;  %vm648_vm3 = vcmp.eq.f32.partialorder %v647_v60, 8.507059e+37  ;;  %2647 = vrcp.f32 %v3319_v9 }
 0x568   :  { %969 = vmatpush.bf16.msra.mxu0 %v946_v16  ;;  %v627_v35 = vmul.f32 %v2642_v49, %v626_v5  ;;  %2649 = vrcp.f32 %v3317_v52  ;;  %v883_v28 = vand.u32 2147483648, %v3319_v9  ;;  %v869_v12 = vand.u32 2147483648, %v3317_v52 }
 0x569   :  { %v614_v33 = vadd.f32 %v2640_v7, %v613_v37  ;;  %vm863_vm9 = vweird.f32 %v3317_v52 }
 0x56a   :  { %v2644_v36 = vpop.eup %2643  ;;  %v628_v34 = vadd.f32 %v2642_v49, %v627_v35 }
 0x56b   :  { %v618_v4 = vsel %vm617_vm4, %v2640_v7, %v614_v33  ;;  %v639_v53 = vmul.f32 %v2644_v36, %v592_v31  ;;  %v3332_v41 = vpop.eup %2645  ;;  %v649_v7 = vand.u32 2147483648, %v592_v31  ;;  %vm644_vm13 = vweird.f32 %v2644_v36 }
 0x56c   :  { %v623_v51 = vsel %vm620_vm5, %v622_v43, %v618_v4  ;;  %v632_v48 = vsel %vm3334_vm12, %v2642_v49, %v628_v34  ;;  %vm645_vm0 = vmor %vm643_vm15, %vm644_vm13  ;;  %v1110_v14 = vsel %vm562_vm10, %v3332_v41, 0.0  ;;  %vm877_vm5 = vweird.f32 %v3319_v9 }
 0x56d   :  { %v640_v63 = vsub.f32 1.0, %v639_v53  ;;  %v667_v17 = vmul.f32 %v3226_v27, %v623_v51  ;;  %v650_v27 = vor.u32 1.1754944e-38, %v649_v7  ;;  %v637_v56 = vsel %vm634_vm14, %v636_v23, %v632_v48  ;;  %v2648_v45 = vpop.eup %2647 }
 0x56e   :  { %v3345_v11 = vmul.f32 %v3228_v13, %v637_v56  ;;  %v2650_v29 = vpop.eup %2649  ;;  %v873_v37 = vmul.f32 %v2648_v45, %v3319_v9  ;;  %vm878_vm10 = vweird.f32 %v2648_v45  ;;  %v881_v53 = vand.u32 2147483647, %v3319_v9 }
 0x56f   :  { %v641_v62 = vmul.f32 %v2644_v36, %v640_v63  ;;  %v679_v55 = vpack.c.bf16 %v667_v17, %v3329_v6  ;;  %v859_v13 = vmul.f32 %v2650_v29, %v3317_v52  ;;  %vm864_vm4 = vweird.f32 %v2650_v29  ;;  %vm3370_vm8 = vmor %vm877_vm5, %vm878_vm10 }
 0x570   :  { %v874_v5 = vsub.f32 1.0, %v873_v37  ;;  %v867_v63 = vand.u32 2147483647, %v3317_v52  ;;  %vm865_vm12 = vmor %vm863_vm9, %vm864_vm4  ;;  %v884_v9 = vor.u32 1.1754944e-38, %v883_v28  ;;  %vm882_vm13 = vcmp.eq.f32.partialorder %v881_v53, 8.507059e+37 }
 0x571   :  { %v642_v1 = vadd.f32 %v2644_v36, %v641_v62  ;;  %2351 = vmatmul.msk.bf16.vlgmr.msrb.gmra.mxu0 %vm549_vm11, %v679_v55  ;;  %v870_v48 = vor.u32 1.1754944e-38, %v869_v12 }
 0x572   :  { %v875_v30 = vmul.f32 %v2648_v45, %v874_v5  ;;  %vm868_vm14 = vcmp.eq.f32.partialorder %v867_v63, 8.507059e+37 }
 0x573   :  { %1111 = vadd.xlane.f32.xlu2 %v1110_v14  ;;  %v646_v20 = vsel %vm645_vm0, %v2644_v36, %v642_v1 }
 0x574   :  { %v651_v25 = vsel %vm648_vm3, %v650_v27, %v646_v20  ;;  %v876_v43 = vadd.f32 %v2648_v45, %v875_v30 }
 0x575   :  { %v669_v49 = vmul.f32 %v3234_v22, %v651_v25  ;;  %v860_v22 = vsub.f32 1.0, %v859_v13 }
 0x576   :  { %v880_v17 = vsel %vm3370_vm8, %v2648_v45, %v876_v43 }
 0x577   :  { %v680_v61 = vpack.c.bf16 %v669_v49, %v3345_v11  ;;  %v861_v35 = vmul.f32 %v2650_v29, %v860_v22  ;;  %v885_v23 = vsel %vm882_vm13, %v884_v9, %v880_v17 }
 0x578   :  { %v929_v20 = vmul.f32 %v3217_v0, %v885_v23 }
 0x579   :  { %2352 = vmatmul.msk.bf16.vlgmr.msra.gmra.mxu3 %vm549_vm11, %v680_v61  ;;  %v862_v34 = vadd.f32 %v2650_v29, %v861_v35 }
 0x57b   :  { %v1199_v31 = vpop.permute.xlu1 %1198  ;;  %v866_v7 = vsel %vm865_vm12, %v2650_v29, %v862_v34 }
 0x57c   :  { %1225 = vmatpush.bf16.msrb.mxu3 %v1199_v31  ;;  %v871_v27 = vsel %vm868_vm14, %v870_v48, %v866_v7 }
 0x57d   :  { %v3398_v45 = vmul.f32 %v3211_v57, %v871_v27 }
 0x57f   :  { %v940_v43 = vpack.c.bf16 %v929_v20, %v3398_v45 }
 0x592   :  { %v3352_v21 = vpop.xlane.xlu0 %1357 }
 0x593   :  { %2651 = vrcp.f32 %v3352_v21  ;;  %v1391_v49 = vand.u32 2147483647, %v3352_v21  ;;  %v1393_v61 = vand.u32 2147483648, %v3352_v21  ;;  %vm1387_vm3 = vweird.f32 %v3352_v21 }
 0x595   :  { %vm3416_vm4 = vcmp.eq.f32.partialorder %v1391_v49, 8.507059e+37  ;;  %v1394_v34 = vor.u32 1.1754944e-38, %v1393_v61 }
 0x599   :  { %v3359_v33 = vpop.eup %2651 }
 0x59a   :  { %v3357_v16 = vpop.xlane.xlu0 %1102  ;;  %v1383_v4 = vmul.f32 %v3359_v33, %v3352_v21  ;;  %vm1388_vm15 = vweird.f32 %v3359_v33 }
 0x59b   :  { %vm3412_vm10 = vmor %vm1387_vm3, %vm1388_vm15  ;;  %v1138_v51 = vand.u32 2147483648, %v3357_v16  ;;  %vm1132_vm12 = vweird.f32 %v3357_v16 }
 0x59c   :  { %v1384_v60 = vsub.f32 1.0, %v1383_v4 }
 0x59d   :  { %v3361_v36 = vpop.xlane.xlu2 %594 }
 0x59e   :  { %2653 = vrcp.f32 %v3361_v36  ;;  %v1385_v14 = vmul.f32 %v3359_v33, %v1384_v60  ;;  %v663_v29 = vand.u32 2147483648, %v3361_v36  ;;  %v661_v37 = vand.u32 2147483647, %v3361_v36 }
 0x59f   :  { %2655 = vrcp.f32 %v3357_v16  ;;  %vm657_vm5 = vweird.f32 %v3361_v36 }
 0x5a0   :  { %v1386_v0 = vadd.f32 %v3359_v33, %v1385_v14  ;;  %v664_v63 = vor.u32 1.1754944e-38, %v663_v29  ;;  %vm662_vm9 = vcmp.eq.f32.partialorder %v661_v37, 8.507059e+37  ;;  %v3443_v14 = vor.u32 1.1754944e-38, %v1138_v51 }
 0x5a2   :  { %v3374_v26 = vpop.xlane.xlu0 %1363  ;;  %v1390_v17 = vsel %vm3412_vm10, %v3359_v33, %v1386_v0 }
 0x5a3   :  { %v1395_v29 = vsel %vm3416_vm4, %v1394_v34, %v1390_v17  ;;  %v1419_v37 = vand.u32 2147483647, %v3374_v26  ;;  %vm1415_vm4 = vweird.f32 %v3374_v26 }
 0x5a4   :  { %v2654_v47 = vpop.eup %2653 }
 0x5a5   :  { %v653_v62 = vmul.f32 %v2654_v47, %v3361_v36  ;;  %v3382_v55 = vpop.xlane.xlu2 %1099  ;;  %v3389_v56 = vpop.eup %2655  ;;  %vm658_vm0 = vweird.f32 %v2654_v47 }
 0x5a6   :  { %2657 = vrcp.f32 %v3382_v55  ;;  %v3385_v52 = vpop.xlane.xlu1 %1354  ;;  %v1128_v5 = vmul.f32 %v3389_v56, %v3357_v16  ;;  %vm659_vm8 = vmor %vm657_vm5, %vm658_vm0  ;;  %vm1133_vm14 = vweird.f32 %v3389_v56 }
 0x5a7   :  { %v654_v1 = vsub.f32 1.0, %v653_v62  ;;  %2659 = vrcp.f32 %v3385_v52  ;;  %v1377_v62 = vand.u32 2147483647, %v3385_v52  ;;  %v1379_v48 = vand.u32 2147483648, %v3385_v52 }
 0x5a8   :  { %2661 = vrcp.f32 %v3374_v26  ;;  %v1129_v36 = vsub.f32 1.0, %v1128_v5  ;;  %vm1373_vm15 = vweird.f32 %v3385_v52 }
 0x5a9   :  { %v655_v25 = vmul.f32 %v2654_v47, %v654_v1  ;;  %v1380_v5 = vor.u32 1.1754944e-38, %v1379_v48  ;;  %vm1378_vm3 = vcmp.eq.f32.partialorder %v1377_v62, 8.507059e+37 }
 0x5aa   :  { %v3395_v31 = vpop.xlane.xlu0 %1108  ;;  %v1130_v20 = vmul.f32 %v3389_v56, %v1129_v36  ;;  %v1421_v36 = vand.u32 2147483648, %v3374_v26 }
 0x5ab   :  { %v656_v22 = vadd.f32 %v2654_v47, %v655_v25 }
 0x5ac   :  { %v3403_v13 = vpop.eup %2657 }
 0x5ad   :  { %v2660_v30 = vpop.eup %2659  ;;  %v1114_v57 = vmul.f32 %v3403_v13, %v3382_v55  ;;  %v944_v35 = vpop.permute.xlu2 %943  ;;  %v660_v60 = vsel %vm659_vm8, %v2654_v47, %v656_v22  ;;  %v1136_v47 = vand.u32 2147483647, %v3357_v16  ;;  %vm1119_vm5 = vweird.f32 %v3403_v13  ;;  %vm3491_vm8 = vmor %vm1132_vm12, %vm1133_vm14 }
 0x5ae   :  { %v1369_v53 = vmul.f32 %v2660_v30, %v3385_v52  ;;  %970 = vmatpush.bf16.msra.mxu0 %v944_v35  ;;  %v3422_v21 = vpop.xlane.xlu1 %1360  ;;  %v3424_v12 = vpop.eup %2661  ;;  %v665_v23 = vsel %vm662_vm9, %v664_v63, %v660_v60  ;;  %vm1374_vm13 = vweird.f32 %v2660_v30  ;;  %vm1118_vm9 = vweird.f32 %v3382_v55 }
 0x5af   :  { %2663 = vrcp.f32 %v3422_v21  ;;  %v1115_v7 = vsub.f32 1.0, %v1114_v57  ;;  %v1411_v1 = vmul.f32 %v3424_v12, %v3374_v26  ;;  %v670_v49 = vmul.f32 %v3261_v32, %v665_v23  ;;  %vm1375_vm0 = vmor %vm1373_vm15, %vm1374_vm13 }
 0x5b0   :  { %v1370_v9 = vsub.f32 1.0, %v1369_v53  ;;  %2665 = vrcp.f32 %v3395_v31  ;;  %vm3460_vm10 = vcmp.eq.f32.partialorder %v1136_v47, 8.507059e+37  ;;  %v1131_v53 = vadd.f32 %v3389_v56, %v1130_v20  ;;  %vm3505_vm15 = vmor %vm1118_vm9, %vm1119_vm5 }
 0x5b1   :  { %2364 = vmatmul.msk.bf16.vlgmr.msra.gmra.mxu0 %vm549_vm11, %v940_v43  ;;  %v1116_v0 = vmul.f32 %v3403_v13, %v1115_v7  ;;  %v1412_v22 = vsub.f32 1.0, %v1411_v1  ;;  %v1124_v43 = vand.u32 2147483648, %v3382_v55  ;;  %v681_v4 = vpack.c.bf16 %v670_v49, %v670_v49 }
 0x5b2   :  { %v1371_v27 = vmul.f32 %v2660_v30, %v1370_v9  ;;  %v3439_v33 = vpop.xlane.xlu0 %850  ;;  %v1122_v23 = vand.u32 2147483647, %v3382_v55  ;;  %vm3501_vm13 = vcmp.eq.f32.partialorder %v1419_v37, 8.507059e+37  ;;  %vm1416_vm14 = vweird.f32 %v3424_v12 }
 0x5b3   :  { %2667 = vrcp.f32 %v3439_v33  ;;  %v1117_v9 = vadd.f32 %v3403_v13, %v1116_v0  ;;  %2353 = vmatmul.msk.bf16.gmra.mxu3 %vm549_vm11, %v681_v4  ;;  %v1125_v1 = vor.u32 1.1754944e-38, %v1124_v43  ;;  %v1407_v49 = vand.u32 2147483648, %v3422_v21 }
 0x5b4   :  { %v1372_v25 = vadd.f32 %v2660_v30, %v1371_v27  ;;  %v1135_v27 = vsel %vm3491_vm8, %v3389_v56, %v1131_v53  ;;  %v1405_v0 = vand.u32 2147483647, %v3422_v21  ;;  %vm3548_vm8 = vmor %vm1415_vm4, %vm1416_vm14  ;;  %vm1160_vm9 = vweird.f32 %v3395_v31 }
 0x5b5   :  { %v3449_v61 = vpop.eup %2663  ;;  %v1121_v56 = vsel %vm3505_vm15, %v3403_v13, %v1117_v9  ;;  %v895_v9 = vand.u32 2147483647, %v3439_v33 }
 0x5b6   :  { %v1376_v57 = vsel %vm1375_vm0, %v2660_v30, %v1372_v25  ;;  %v1397_v52 = vmul.f32 %v3449_v61, %v3422_v21  ;;  %v3458_v35 = vpop.xlane.xlu1 %1105  ;;  %v3466_v34 = vpop.eup %2665  ;;  %v1439_v30 = vmul.f32 %v3251_v44, %v1395_v29  ;;  %v1413_v44 = vmul.f32 %v3424_v12, %v1412_v22 }
 0x5b7   :  { %v1381_v28 = vsel %vm1378_vm3, %v1380_v5, %v1376_v57  ;;  %2669 = vrcp.f32 %v3458_v35  ;;  %v1156_v20 = vmul.f32 %v3466_v34, %v3395_v31  ;;  %vm1402_vm12 = vweird.f32 %v3449_v61 }
 0x5b8   :  { %v3471_v51 = vmul.f32 %v3275_v10, %v1381_v28  ;;  %v1398_v63 = vsub.f32 1.0, %v1397_v52  ;;  %v1414_v37 = vadd.f32 %v3424_v12, %v1413_v44  ;;  %vm1401_vm0 = vweird.f32 %v3422_v21 }
 0x5b9   :  { %v3473_v17 = vpop.eup %2667  ;;  %v1422_v57 = vor.u32 1.1754944e-38, %v1421_v36  ;;  %vm1123_vm3 = vcmp.eq.f32.partialorder %v1122_v23, 8.507059e+37  ;;  %v1166_v52 = vand.u32 2147483648, %v3395_v31  ;;  %vm3531_vm5 = vmor %vm1401_vm0, %vm1402_vm12  ;;  %v1157_v43 = vsub.f32 1.0, %v1156_v20 }
 0x5ba   :  { %v1399_v60 = vmul.f32 %v3449_v61, %v1398_v63  ;;  %v887_v10 = vmul.f32 %v3473_v17, %v3439_v33  ;;  %v3484_v7 = vpop.xlane.xlu0 %1366  ;;  %v1450_v62 = vpack.c.bf16 %v1439_v30, %v3471_v51  ;;  %v1126_v28 = vsel %vm1123_vm3, %v1125_v1, %v1121_v56 }
 0x5bb   :  { %2671 = vrcp.f32 %v3484_v7  ;;  %v1140_v21 = vsel %vm3460_vm10, %v3443_v14, %v1135_v27  ;;  %v1164_v63 = vand.u32 2147483647, %v3395_v31  ;;  %v1408_v36 = vor.u32 1.1754944e-38, %v1407_v49 }
 0x5bc   :  { %v1400_v55 = vadd.f32 %v3449_v61, %v1399_v60  ;;  %2390 = vmatmul.msk.bf16.vlgmr.msrb.gmra.mxu2 %vm549_vm11, %v1450_v62  ;;  %v888_v29 = vsub.f32 1.0, %v887_v10  ;;  %vm1406_vm10 = vcmp.eq.f32.partialorder %v1405_v0, 8.507059e+37  ;;  %v1418_v26 = vsel %vm3548_vm8, %v3424_v12, %v1414_v37 }
 0x5bd   :  { %v3514_v25 = vpop.eup %2669  ;;  %v897_v44 = vand.u32 2147483648, %v3439_v33  ;;  %v3562_v60 = vmul.f32 %v3271_v2, %v1126_v28  ;;  %v1184_v10 = vmul.f32 %v3258_v58, %v1140_v21  ;;  %v1158_v48 = vmul.f32 %v3466_v34, %v1157_v43 }
 0x5be   :  { %v1142_v5 = vmul.f32 %v3514_v25, %v3458_v35  ;;  %v3526_v22 = vpop.xlane.xlu1 %853  ;;  %v1404_v4 = vsel %vm3531_vm5, %v3449_v61, %v1400_v55  ;;  %v889_v32 = vmul.f32 %v3473_v17, %v888_v29  ;;  %vm1161_vm4 = vweird.f32 %v3466_v34 }
 0x5bf   :  { %2673 = vrcp.f32 %v3526_v22  ;;  %v1409_v62 = vsel %vm1406_vm10, %v1408_v36, %v1404_v4  ;;  %v3567_v23 = vor.u32 1.1754944e-38, %v1166_v52  ;;  %vm892_vm15 = vweird.f32 %v3473_v17 }
 0x5c0   :  { %v1143_v14 = vsub.f32 1.0, %v1142_v5  ;;  %v890_v12 = vadd.f32 %v3473_v17, %v889_v32  ;;  %v1423_v58 = vsel %vm3501_vm13, %v1422_v57, %v1418_v26  ;;  %vm891_vm12 = vweird.f32 %v3439_v33 }
 0x5c1   :  { %v3542_v30 = vpop.eup %2671  ;;  %vm3576_vm14 = vcmp.eq.f32.partialorder %v895_v9, 8.507059e+37  ;;  %v3584_v56 = vmul.f32 %v3287_v24, %v1409_v62  ;;  %v898_v49 = vor.u32 1.1754944e-38, %v897_v44  ;;  %v1152_v29 = vand.u32 2147483648, %v3458_v35  ;;  %vm3590_vm13 = vmor %vm891_vm12, %vm892_vm15 }
 0x5c2   :  { %v1425_v61 = vmul.f32 %v3542_v30, %v3484_v7  ;;  %v1144_v2 = vmul.f32 %v3514_v25, %v1143_v14  ;;  %v1195_v37 = vpack.c.bf16 %v1184_v10, %v3562_v60  ;;  %v1159_v33 = vadd.f32 %v3466_v34, %v1158_v48 }
 0x5c3   :  { %v1441_v57 = vmul.f32 %v3268_v15, %v1423_v58  ;;  %vm1147_vm0 = vweird.f32 %v3514_v25  ;;  %v911_v52 = vand.u32 2147483648, %v3526_v22  ;;  %v894_v13 = vsel %vm3590_vm13, %v3473_v17, %v890_v12 }
 0x5c4   :  { %v1426_v1 = vsub.f32 1.0, %v1425_v61  ;;  %v1145_v24 = vadd.f32 %v3514_v25, %v1144_v2  ;;  %2377 = vmatmul.msk.bf16.vlgmr.msrb.gmra.mxu3 %vm549_vm11, %v1195_v37  ;;  %v909_v28 = vand.u32 2147483647, %v3526_v22  ;;  %vm1146_vm5 = vweird.f32 %v3458_v35 }
 0x5c5   :  { %v2674_v27 = vpop.eup %2673  ;;  %v1451_v21 = vpack.c.bf16 %v1441_v57, %v3584_v56  ;;  %v1150_v15 = vand.u32 2147483647, %v3458_v35  ;;  %v1153_v4 = vor.u32 1.1754944e-38, %v1152_v29  ;;  %vm905_vm8 = vweird.f32 %v3526_v22  ;;  %vm3608_vm10 = vmor %vm1146_vm5, %vm1147_vm0 }
 0x5c6   :  { %v901_v20 = vmul.f32 %v2674_v27, %v3526_v22  ;;  %v3581_v55 = vpop.xlane.xlu1 %856  ;;  %v1427_v0 = vmul.f32 %v3542_v30, %v1426_v1  ;;  %vm906_vm3 = vweird.f32 %v2674_v27  ;;  %vm1430_vm15 = vweird.f32 %v3542_v30  ;;  %vm3627_vm0 = vmor %vm1160_vm9, %vm1161_vm4 }
 0x5c7   :  { %2675 = vrcp.f32 %v3581_v55  ;;  %v899_v36 = vsel %vm3576_vm14, %v898_v49, %v894_v13  ;;  %vm1429_vm12 = vweird.f32 %v3484_v7  ;;  %v1435_v35 = vand.u32 2147483648, %v3484_v7  ;;  %vm907_vm13 = vmor %vm905_vm8, %vm906_vm3 }
 0x5c8   :  { %v902_v5 = vsub.f32 1.0, %v901_v20  ;;  %v1428_v32 = vadd.f32 %v3542_v30, %v1427_v0  ;;  %v912_v22 = vor.u32 1.1754944e-38, %v911_v52  ;;  %v1149_v9 = vsel %vm3608_vm10, %v3514_v25, %v1145_v24  ;;  %vm3635_vm5 = vmor %vm1429_vm12, %vm1430_vm15 }
 0x5c9   :  { %vm910_vm14 = vcmp.eq.f32.partialorder %v909_v28, 8.507059e+37  ;;  %v1433_v10 = vand.u32 2147483647, %v3484_v7  ;;  %vm1151_vm3 = vcmp.eq.f32.partialorder %v1150_v15, 8.507059e+37  ;;  %v1163_v25 = vsel %vm3627_vm0, %v3466_v34, %v1159_v33 }
 0x5ca   :  { %v903_v43 = vmul.f32 %v2674_v27, %v902_v5  ;;  %v3643_v1 = vmul.f32 %v3293_v19, %v899_v36  ;;  %v1154_v2 = vsel %vm1151_vm3, %v1153_v4, %v1149_v9  ;;  %v1432_v7 = vsel %vm3635_vm5, %v3542_v30, %v1428_v32 }
 0x5cb   :  { %vm1165_vm4 = vcmp.eq.f32.partialorder %v1164_v63, 8.507059e+37  ;;  %v1436_v58 = vor.u32 1.1754944e-38, %v1435_v35  ;;  %vm1434_vm9 = vcmp.eq.f32.partialorder %v1433_v10, 8.507059e+37  ;;  %v3654_v19 = vmul.f32 %v3297_v39, %v1154_v2 }
 0x5cc   :  { %v904_v17 = vadd.f32 %v2674_v27, %v903_v43  ;;  %2391 = vmatmul.msk.bf16.gmra.mxu2 %vm549_vm11, %v1451_v21  ;;  %v1168_v20 = vsel %vm1165_vm4, %v3567_v23, %v1163_v25  ;;  %v925_v30 = vand.u32 2147483648, %v3581_v55  ;;  %vm919_vm10 = vweird.f32 %v3581_v55 }
 0x5cd   :  { %v2676_v14 = vpop.eup %2675  ;;  %v1437_v49 = vsel %vm1434_vm9, %v1436_v58, %v1432_v7  ;;  %v1186_v31 = vmul.f32 %v3282_v18, %v1168_v20  ;;  %v923_v23 = vand.u32 2147483647, %v3581_v55  ;;  %vm1567_vm5 = vcmask 195584  }
 0x5ce   :  { %v915_v26 = vmul.f32 %v2676_v14, %v3581_v55  ;;  %v908_v44 = vsel %vm907_vm13, %v2674_v27, %v904_v17  ;;  %vm920_vm8 = vweird.f32 %v2676_v14  ;;  %v1442_v63 = vmul.f32 %v3303_v42, %v1437_v49 }
 0x5cf   :  { %v913_v48 = vsel %vm910_vm14, %v912_v22, %v908_v44  ;;  %vm921_vm15 = vmor %vm919_vm10, %vm920_vm8  ;;  %v1196_v29 = vpack.c.bf16 %v1186_v31, %v3654_v19  ;;  %v926_v37 = vor.u32 1.1754944e-38, %v925_v30  ;;  %vm924_vm12 = vcmp.eq.f32.partialorder %v923_v23, 8.507059e+37 }
 0x5d0   :  { %v916_v12 = vsub.f32 1.0, %v915_v26  ;;  %v931_v27 = vmul.f32 %v3307_v46, %v913_v48  ;;  %v1452_v33 = vpack.c.bf16 %v1442_v63, %v1442_v63 }
 0x5d2   :  { %v917_v16 = vmul.f32 %v2676_v14, %v916_v12  ;;  %v941_v34 = vpack.c.bf16 %v931_v27, %v3643_v1 }
 0x5d4   :  { %2365 = vmatmul.msk.bf16.gmra.mxu0 %vm549_vm11, %v941_v34  ;;  %v918_v46 = vadd.f32 %v2676_v14, %v917_v16  ;;  %2378 = vmatmul.msk.bf16.gmra.mxu3 %vm549_vm11, %v1196_v29  ;;  %v2489_v29 = vld [vmem:[%s3959_s2 + $0x18] sm:$0xff] }
 0x5d5   :  { %1607 = vmatpush.bf16.msrb.mxu0 %v2489_v29 }
 0x5d6   :  { %v922_v39 = vsel %vm921_vm15, %v2676_v14, %v918_v46 }
 0x5d7   :  { %v927_v47 = vsel %vm924_vm12, %v926_v37, %v922_v39  ;;  %v2488_v39 = vld [vmem:[%s3959_s2 + $0x10] sm:$0xff] }
 0x5d8   :  { %v932_v18 = vmul.f32 %v3313_v50, %v927_v47 }
 0x5d9   :  { %1608 = vmatpush.bf16.msrb.mxu0 %v2488_v39 }
 0x5da   :  { %v942_v0 = vpack.c.bf16 %v932_v18, %v932_v18 }
 0x5dc   :  { %2392 = vmatmul.msk.bf16.gmra.mxu2 %vm549_vm11, %v1452_v33 }
 0x5e4   :  { %2366 = vmatmul.msk.bf16.gmra.mxu0 %vm549_vm11, %v942_v0 }
 0x5e6   :  { %v1112_v42 = vpop.xlane.xlu2 %1111 }
 0x5e7   :  { %2677 = vrcp.f32 %v1112_v42  ;;  %v1180_v24 = vand.u32 2147483648, %v1112_v42  ;;  %v1178_v13 = vand.u32 2147483647, %v1112_v42  ;;  %vm1174_vm0 = vweird.f32 %v1112_v42 }
 0x5e9   :  { %v1181_v28 = vor.u32 1.1754944e-38, %v1180_v24  ;;  %vm1179_vm3 = vcmp.eq.f32.partialorder %v1178_v13, 8.507059e+37 }
 0x5ed   :  { %v2678_v55 = vpop.eup %2677 }
 0x5ee   :  { %v1170_v5 = vmul.f32 %v2678_v55, %v1112_v42  ;;  %vm1175_vm13 = vweird.f32 %v2678_v55  ;;  %v717_v53 = vpop.f32.mrf.mxu0 }
 0x5ef   :  { %vm1176_vm14 = vmor %vm1174_vm0, %vm1175_vm13 }
 0x5f0   :  { %v1171_v57 = vsub.f32 1.0, %v1170_v5 }
 0x5f2   :  { %v1172_v52 = vmul.f32 %v2678_v55, %v1171_v57 }
 0x5f4   :  { %v1173_v43 = vadd.f32 %v2678_v55, %v1172_v52 }
 0x5f6   :  { %v1177_v21 = vsel %vm1176_vm14, %v2678_v55, %v1173_v43  ;;  %v719_v17 = vpop.f32.mrf.mxu0 }
 0x5f7   :  { %v1182_v15 = vsel %vm1179_vm3, %v1181_v28, %v1177_v21 }
 0x5f8   :  { %v1187_v50 = vmul.f32 %v3332_v41, %v1182_v15 }
 0x5fa   :  { %v1197_v4 = vpack.c.bf16 %v1187_v50, %v1187_v50 }
 0x5fc   :  { %2379 = vmatmul.msk.bf16.gmra.mxu3 %vm549_vm11, %v1197_v4  ;;  %v3669_v36 = vpop.f32.mrf.mxu3  ;;  %vm1561_vm11 = vcmask 130048  }
 0x604   :  { %v3671_v14 = vpop.f32.mrf.mxu3 }
 0x62e   :  { %v972_v32 = vpop.f32.mrf.mxu0 }
 0x636   :  { %v974_v35 = vpop.f32.mrf.mxu0  ;;  %v3673_v9 = vpop.f32.mrf.mxu3 }
 0x637   :  { %v2531_v22 = vpack.i.bf16 %v974_v35, %v972_v32 }
 0x639   :  { %2532 = vrot.lane.b32.xlu0 %v2531_v22, %s2756_s17 }
 0x63e   :  { %v729_v26 = vpop.f32.mrf.mxu3 }
 0x63f   :  { %v1482_v61 = vpop.f32.mrf.mxu2 }
 0x647   :  { %v1484_v44 = vpop.f32.mrf.mxu2  ;;  %v1227_v10 = vpop.f32.mrf.mxu3 }
 0x648   :  { %v2541_v41 = vpack.i.bf16 %v1484_v44, %v1482_v61 }
 0x64a   :  { %2542 = vrot.lane.b32.xlu0 %v2541_v41, %s2757_s18 }
 0x64f   :  { %v1487_v62 = vpop.f32.mrf.mxu2  ;;  %v1229_v48 = vpop.f32.mrf.mxu3 }
 0x650   :  { %v2536_v12 = vpack.i.bf16 %v1229_v48, %v1227_v10 }
 0x651   :  { %v977_v25 = vpop.f32.mrf.mxu0 }
 0x652   :  { %2537 = vrot.lane.b32.xlu1 %v2536_v12, %s2758_s19 }
 0x657   :  { %v1489_v2 = vpop.f32.mrf.mxu2  ;;  %v1232_v16 = vpop.f32.mrf.mxu3 }
 0x658   :  { %v2556_v58 = vpack.i.bf16 %v1489_v2, %v1487_v62 }
 0x659   :  { %v979_v27 = vpop.f32.mrf.mxu0 }
 0x65a   :  { %v2546_v7 = vpack.i.bf16 %v979_v27, %v977_v25  ;;  %2557 = vrot.lane.b32.xlu1 %v2556_v58, %s2757_s18 }
 0x65c   :  { %2547 = vrot.lane.b32.xlu2 %v2546_v7, %s2756_s17 }
 0x65f   :  { %v1492_v20 = vpop.f32.mrf.mxu2  ;;  %v1234_v49 = vpop.f32.mrf.mxu3 }
 0x660   :  { %v2551_v46 = vpack.i.bf16 %v1234_v49, %v1232_v16 }
 0x661   :  { %v982_v34 = vpop.f32.mrf.mxu0 }
 0x662   :  { %2552 = vrot.lane.b32.xlu0 %v2551_v46, %s2758_s19 }
 0x667   :  { %v1494_v30 = vpop.f32.mrf.mxu2 }
 0x669   :  { %v984_v31 = vpop.f32.mrf.mxu0 }
 0x66a   :  { %1509 = vrot.lane.b32.xlu0 %v982_v34, %s2756_s17 }
 0x672   :  { %1549 = vrot.lane.b32.xlu0 %v1492_v20, %s2757_s18  ;;  %v2566_v20 = vld [vmem:[%s3958_s1 + $0x27] ss:$0 sm:$0xff] }
 0x67f   :  { %v1237_v63 = vpop.f32.mrf.mxu3 }
 0x680   :  { %1529 = vrot.lane.b32.xlu1 %v1237_v63, %s2758_s19 }
 0x687   :  { %v1239_v23 = vpop.f32.mrf.mxu3 }
 0x6ab   :  { %v2533_v37 = vpop.permute.xlu0 %2532 }
 0x6ac   :  { %v2535_v33 = vunpack.i.h.bf16 %v2533_v37  ;;  %v2534_v47 = vunpack.i.l.bf16 %v2533_v37 }
 0x6ae   :  { %v1557_v5 = vsel %vm486_vm6, %v719_v17, %v2535_v33  ;;  %v1556_v57 = vsel %vm486_vm6, %v717_v53, %v2534_v47 }
 0x6b6   :  { %v2548_v50 = vpop.permute.xlu2 %2547 }
 0x6b7   :  { %v2550_v4 = vunpack.i.h.bf16 %v2548_v50  ;;  %v2549_v32 = vunpack.i.l.bf16 %v2548_v50 }
 0x6b9   :  { %v1559_v61 = vsel %vm486_vm6, %v3671_v14, %v2550_v4  ;;  %v1558_v26 = vsel %vm486_vm6, %v3669_v36, %v2549_v32 }
 0x6bc   :  { %v2543_v18 = vpop.permute.xlu0 %2542 }
 0x6bd   :  { %v2545_v24 = vunpack.i.h.bf16 %v2543_v18  ;;  %v2544_v52 = vunpack.i.l.bf16 %v2543_v18 }
 0x6c4   :  { %v2538_v0 = vpop.permute.xlu1 %2537 }
 0x6c5   :  { %v2540_v42 = vunpack.i.h.bf16 %v2538_v0  ;;  %v2539_v55 = vunpack.i.l.bf16 %v2538_v0 }
 0x6c7   :  { %v1562_v13 = vsel %vm1561_vm11, %v1556_v57, %v2539_v55  ;;  %v1563_v43 = vsel %vm1561_vm11, %v1557_v5, %v2540_v42 }
 0x6c8   :  { %v1568_v28 = vsel %vm1567_vm5, %v1562_v13, %v2544_v52  ;;  %v1569_v21 = vsel %vm1567_vm5, %v1563_v43, %v2545_v24 }
 0x6c9   :  { %v1573_v15 = vpack.c.bf16 %v1569_v21, %v1568_v28 }
 0x6cb   :  { %2401 = vmatmul.msk.bf16.vlgmr.msrb.gmra.mxu0 %vm91_vm1, %v1573_v15 }
 0x6cc   :  { %v2558_v35 = vpop.permute.xlu1 %2557 }
 0x6cd   :  { %v2560_v44 = vunpack.i.h.bf16 %v2558_v35  ;;  %v2559_v41 = vunpack.i.l.bf16 %v2558_v35 }
 0x6d4   :  { %v2553_v17 = vpop.permute.xlu0 %2552 }
 0x6d5   :  { %v2555_v22 = vunpack.i.h.bf16 %v2553_v17  ;;  %v2554_v53 = vunpack.i.l.bf16 %v2553_v17 }
 0x6d7   :  { %v1565_v10 = vsel %vm1561_vm11, %v1559_v61, %v2555_v22  ;;  %v1564_v62 = vsel %vm1561_vm11, %v1558_v26, %v2554_v53 }
 0x6d8   :  { %v1570_v25 = vsel %vm1567_vm5, %v1564_v62, %v2559_v41  ;;  %v1571_v48 = vsel %vm1567_vm5, %v1565_v10, %v2560_v44 }
 0x6d9   :  { %v1574_v12 = vpack.c.bf16 %v1571_v48, %v1570_v25 }
 0x6db   :  { %2402 = vmatmul.msk.bf16.gmra.mxu0 %vm91_vm1, %v1574_v12 }
 0x6dc   :  { %v1510_v2 = vpop.permute.xlu0 %1509 }
 0x6dd   :  { %v1560_v14 = vsel %vm486_vm6, %v3673_v9, %v1510_v2 }
 0x6e4   :  { %v1550_v7 = vpop.permute.xlu0 %1549 }
 0x6f2   :  { %v1530_v27 = vpop.permute.xlu1 %1529 }
 0x6f3   :  { %v1566_v36 = vsel %vm1561_vm11, %v1560_v14, %v1530_v27  ;;  %v2491_v14 = vld [vmem:[%s3959_s2 + $0x28] sm:$0xff] }
 0x6f4   :  { %v1572_v58 = vsel %vm1567_vm5, %v1566_v36, %v1550_v7  ;;  %1796 = vmatpush.bf16.msra.mxu3 %v2491_v14  ;;  %v2490_v7 = vld [vmem:[%s3959_s2 + $0x20] sm:$0xff] }
 0x6f5   :  { %v1575_v16 = vpack.c.bf16 %v1572_v58, %v1572_v58 }
 0x6f7   :  { %2403 = vmatmul.msk.bf16.gmra.mxu0 %vm91_vm1, %v1575_v16 }
 0x6f8   :  { %1797 = vmatpush.bf16.msra.mxu3 %v2490_v7 }
 0x748   :  { %v1610_v34 = vpop.f32.mrf.mxu0 }
 0x749   :  { %v1624_v49 = vadd.f32 %v1610_v34, %v2883_v40 }
 0x74b   :  { %v3706_v46 = vadd.f32 %v2566_v20, %v1624_v49 }
 0x74d   :  { %v1638_v9 = vsel %vm91_vm1, %v3706_v46, 0.0 }
 0x74e   :  { %1639 = vadd.xlane.f32.xlu2 %v1638_v9 }
 0x750   :  { %v1612_v30 = vpop.f32.mrf.mxu0 }
 0x751   :  { %v1625_v31 = vadd.f32 %v1612_v30, %v2895_v59 }
 0x753   :  { %v3711_v63 = vadd.f32 %v2566_v20, %v1625_v31 }
 0x755   :  { %v1641_v23 = vsel %vm91_vm1, %v3711_v63, 0.0 }
 0x756   :  { %1642 = vadd.xlane.f32.xlu1 %v1641_v23 }
 0x758   :  { %v1615_v29 = vpop.f32.mrf.mxu0 }
 0x759   :  { %v1626_v39 = vadd.f32 %v1615_v29, %v2890_v54 }
 0x75b   :  { %v3716_v37 = vadd.f32 %v2566_v20, %v1626_v39 }
 0x75d   :  { %v1644_v40 = vsel %vm91_vm1, %v3716_v37, 0.0 }
 0x75e   :  { %1645 = vadd.xlane.f32.xlu0 %v1644_v40 }
 0x760   :  { %v1617_v33 = vpop.f32.mrf.mxu0 }
 0x761   :  { %v1627_v47 = vadd.f32 %v1617_v33, %v2901_v3 }
 0x763   :  { %v3721_v18 = vadd.f32 %v2566_v20, %v1627_v47 }
 0x765   :  { %v1647_v59 = vsel %vm91_vm1, %v3721_v18, 0.0 }
 0x766   :  { %1648 = vadd.xlane.f32.xlu2 %v1647_v59 }
 0x774   :  { %v1620_v0 = vpop.f32.mrf.mxu0 }
 0x775   :  { %v1628_v42 = vadd.f32 %v1620_v0, %v2907_v8 }
 0x777   :  { %v3726_v55 = vadd.f32 %v2566_v20, %v1628_v42 }
 0x779   :  { %v1650_v54 = vsel %vm104_vm2, %v3726_v55, 0.0 }
 0x77a   :  { %1651 = vadd.xlane.f32.xlu0 %v1650_v54 }
 0x77c   :  { %v1622_v5 = vpop.f32.mrf.mxu0 }
 0x7c1   :  { %v1640_v57 = vpop.xlane.xlu2 %1639 }
 0x7c2   :  { %v1653_v24 = vmul.f32 %v1640_v57, %v2836_v38 }
 0x7c4   :  { %v3732_v3 = vsub.f32 %v3706_v46, %v1653_v24  ;;  %v2567_v24 = vld [vmem:[%s3958_s1 + $0x28] ss:$0 sm:$0xff] }
 0x7c6   :  { %v1663_v52 = vmul.f32 %v3732_v3, %v3732_v3 }
 0x7c8   :  { %v1668_v13 = vsel %vm91_vm1, %v1663_v52, 0.0 }
 0x7c9   :  { %1669 = vadd.xlane.f32.xlu1 %v1668_v13  ;;  %v1643_v8 = vpop.xlane.xlu1 %1642 }
 0x7ca   :  { %v1654_v43 = vmul.f32 %v1643_v8, %v2836_v38 }
 0x7cc   :  { %v3739_v28 = vsub.f32 %v3711_v63, %v1654_v43 }
 0x7ce   :  { %v1664_v21 = vmul.f32 %v3739_v28, %v3739_v28 }
 0x7d0   :  { %v1671_v15 = vsel %vm91_vm1, %v1664_v21, 0.0 }
 0x7d1   :  { %v1646_v50 = vpop.xlane.xlu0 %1645  ;;  %1672 = vadd.xlane.f32.xlu2 %v1671_v15 }
 0x7d2   :  { %v1655_v4 = vmul.f32 %v1646_v50, %v2836_v38  ;;  %v2568_v50 = vld [vmem:[%s3958_s1 + $0x29] ss:$0 sm:$0xff] }
 0x7d4   :  { %v3746_v32 = vsub.f32 %v3716_v37, %v1655_v4 }
 0x7d6   :  { %v1665_v35 = vmul.f32 %v3746_v32, %v3746_v32 }
 0x7d8   :  { %v1674_v17 = vsel %vm91_vm1, %v1665_v35, 0.0 }
 0x7d9   :  { %1675 = vadd.xlane.f32.xlu1 %v1674_v17  ;;  %v1649_v22 = vpop.xlane.xlu2 %1648 }
 0x7da   :  { %v1656_v53 = vmul.f32 %v1649_v22, %v2836_v38 }
 0x7dc   :  { %v3753_v61 = vsub.f32 %v3721_v18, %v1656_v53 }
 0x7de   :  { %v1666_v26 = vmul.f32 %v3753_v61, %v3753_v61 }
 0x7e0   :  { %v1677_v44 = vsel %vm91_vm1, %v1666_v26, 0.0 }
 0x7e1   :  { %1678 = vadd.xlane.f32.xlu2 %v1677_v44 }
 0x7ed   :  { %v1652_v41 = vpop.xlane.xlu0 %1651 }
 0x7ee   :  { %v1657_v10 = vmul.f32 %v1652_v41, %v2836_v38 }
 0x7f0   :  { %v3760_v62 = vsub.f32 %v3726_v55, %v1657_v10 }
 0x7f2   :  { %v1667_v25 = vmul.f32 %v3760_v62, %v3760_v62 }
 0x7f4   :  { %v1680_v48 = vsel %vm104_vm2, %v1667_v25, 0.0 }
 0x7f5   :  { %1681 = vadd.xlane.f32.xlu0 %v1680_v48 }
 0x83c   :  { %v1670_v12 = vpop.xlane.xlu1 %1669 }
 0x83d   :  { %v1683_v2 = vmul.f32 %v1670_v12, %v2836_v38 }
 0x83f   :  { %v1688_v27 = vadd.f32 1e-05, %v1683_v2 }
 0x841   :  { %2679 = vrsqrt.f32 %v1688_v27  ;;  %vm1699_vm4 = vweird.f32 %v1688_v27 }
 0x844   :  { %v1673_v36 = vpop.xlane.xlu2 %1672 }
 0x845   :  { %v1684_v58 = vmul.f32 %v1673_v36, %v2836_v38 }
 0x847   :  { %v2680_v16 = vpop.eup %2679  ;;  %v1689_v20 = vadd.f32 1e-05, %v1684_v58 }
 0x848   :  { %v1694_v34 = vmul.f32 %v2680_v16, %v1688_v27  ;;  %vm1700_vm6 = vweird.f32 %v2680_v16 }
 0x849   :  { %2681 = vrsqrt.f32 %v1689_v20  ;;  %vm1701_vm9 = vmor %vm1699_vm4, %vm1700_vm6  ;;  %vm1709_vm10 = vweird.f32 %v1689_v20 }
 0x84a   :  { %v1695_v49 = vmul.f32 %v2680_v16, %v1694_v34 }
 0x84c   :  { %v1696_v9 = vmul.f32 0.5, %v1695_v49  ;;  %v1676_v30 = vpop.xlane.xlu1 %1675 }
 0x84d   :  { %v1685_v31 = vmul.f32 %v1676_v30, %v2836_v38 }
 0x84e   :  { %v1697_v23 = vsub.f32 1.5, %v1696_v9 }
 0x84f   :  { %v2682_v29 = vpop.eup %2681  ;;  %v1690_v39 = vadd.f32 1e-05, %v1685_v31 }
 0x850   :  { %v1698_v40 = vmul.f32 %v2680_v16, %v1697_v23  ;;  %v1704_v33 = vmul.f32 %v2682_v29, %v1689_v20  ;;  %vm1710_vm8 = vweird.f32 %v2682_v29 }
 0x851   :  { %2683 = vrsqrt.f32 %v1690_v39  ;;  %vm1711_vm15 = vmor %vm1709_vm10, %vm1710_vm8  ;;  %vm1719_vm13 = vweird.f32 %v1690_v39 }
 0x852   :  { %v1705_v47 = vmul.f32 %v2682_v29, %v1704_v33  ;;  %v1702_v59 = vsel %vm1701_vm9, %v2680_v16, %v1698_v40 }
 0x853   :  { %v1743_v52 = vmul.f32 %v1702_v59, %v3732_v3 }
 0x854   :  { %v1706_v0 = vmul.f32 0.5, %v1705_v47  ;;  %v1679_v42 = vpop.xlane.xlu2 %1678 }
 0x855   :  { %v1686_v54 = vmul.f32 %v1679_v42, %v2836_v38  ;;  %v1749_v4 = vmul.f32 %v2567_v24, %v1743_v52  ;;  %v2495_v52 = vld [vmem:[%s3959_s2 + $0x48] sm:$0xff] }
 0x856   :  { %v1707_v5 = vsub.f32 1.5, %v1706_v0 }
 0x857   :  { %v2684_v57 = vpop.eup %2683  ;;  %v1691_v13 = vadd.f32 1e-05, %v1686_v54  ;;  %v1755_v3 = vadd.f32 %v2568_v50, %v1749_v4  ;;  %v2499_v54 = vld [vmem:[%s3959_s2 + $0x68] sm:$0xff] }
 0x858   :  { %v1708_v8 = vmul.f32 %v2682_v29, %v1707_v5  ;;  %v1714_v43 = vmul.f32 %v2684_v57, %v1690_v39  ;;  %vm1720_vm12 = vweird.f32 %v2684_v57  ;;  %1987 = vmatpush.bf16.msrb.mxu1 %v2499_v54  ;;  %v2498_v5 = vld [vmem:[%s3959_s2 + $0x60] sm:$0xff] }
 0x859   :  { %2685 = vrsqrt.f32 %v1691_v13  ;;  %vm1721_vm0 = vmor %vm1719_vm13, %vm1720_vm12  ;;  %vm1729_vm3 = vweird.f32 %v1691_v13 }
 0x85a   :  { %v1712_v21 = vsel %vm1711_vm15, %v2682_v29, %v1708_v8  ;;  %v1715_v15 = vmul.f32 %v2684_v57, %v1714_v43 }
 0x85b   :  { %v1744_v35 = vmul.f32 %v1712_v21, %v3739_v28  ;;  %v2494_v21 = vld [vmem:[%s3959_s2 + $0x40] sm:$0xff] }
 0x85c   :  { %v1716_v17 = vmul.f32 0.5, %v1715_v15  ;;  %1988 = vmatpush.bf16.msrb.mxu1 %v2498_v5 }
 0x85d   :  { %v1750_v22 = vmul.f32 %v2567_v24, %v1744_v35 }
 0x85e   :  { %v1717_v53 = vsub.f32 1.5, %v1716_v17 }
 0x85f   :  { %v2686_v26 = vpop.eup %2685  ;;  %v1756_v44 = vadd.f32 %v2568_v50, %v1750_v22  ;;  %v2492_v22 = vld [vmem:[%s3959_s2 + $0x30] sm:$0xff] }
 0x860   :  { %v1718_v41 = vmul.f32 %v2684_v57, %v1717_v53  ;;  %v1724_v10 = vmul.f32 %v2686_v26, %v1691_v13  ;;  %vm1730_vm14 = vweird.f32 %v2686_v26 }
 0x861   :  { %v1760_v25 = vpack.c.bf16 %v1756_v44, %v1755_v3  ;;  %vm1731_vm11 = vmor %vm1729_vm3, %vm1730_vm14 }
 0x862   :  { %v1725_v48 = vmul.f32 %v2686_v26, %v1724_v10  ;;  %v1722_v2 = vsel %vm1721_vm0, %v2684_v57, %v1718_v41  ;;  %v2497_v57 = vld [vmem:[%s3959_s2 + $0x58] sm:$0xff] }
 0x863   :  { %2412 = vmatmul.msk.bf16.vlgmr.msra.gmra.mxu3 %vm91_vm1, %v1760_v25  ;;  %v1745_v36 = vmul.f32 %v1722_v2, %v3746_v32  ;;  %1989 = vmatpush.bf16.msrb.mxu1 %v2497_v57 }
 0x864   :  { %v1726_v14 = vmul.f32 0.5, %v1725_v48 }
 0x865   :  { %v1751_v34 = vmul.f32 %v2567_v24, %v1745_v36 }
 0x866   :  { %v1727_v27 = vsub.f32 1.5, %v1726_v14 }
 0x867   :  { %v1757_v31 = vadd.f32 %v2568_v50, %v1751_v34 }
 0x868   :  { %v1682_v12 = vpop.xlane.xlu0 %1681  ;;  %v1728_v58 = vmul.f32 %v2686_v26, %v1727_v27 }
 0x869   :  { %v1687_v28 = vmul.f32 %v1682_v12, %v2836_v38 }
 0x86a   :  { %v1732_v16 = vsel %vm1731_vm11, %v2686_v26, %v1728_v58 }
 0x86b   :  { %v1692_v7 = vadd.f32 1e-05, %v1687_v28  ;;  %v1746_v20 = vmul.f32 %v1732_v16, %v3753_v61 }
 0x86d   :  { %2687 = vrsqrt.f32 %v1692_v7  ;;  %v1752_v49 = vmul.f32 %v2567_v24, %v1746_v20  ;;  %vm1739_vm6 = vweird.f32 %v1692_v7 }
 0x86f   :  { %v1758_v23 = vadd.f32 %v2568_v50, %v1752_v49 }
 0x871   :  { %v1761_v39 = vpack.c.bf16 %v1758_v23, %v1757_v31 }
 0x873   :  { %v2688_v9 = vpop.eup %2687  ;;  %2413 = vmatmul.msk.bf16.gmra.mxu3 %vm91_vm1, %v1761_v39 }
 0x874   :  { %v1734_v30 = vmul.f32 %v2688_v9, %v1692_v7  ;;  %vm1740_vm5 = vweird.f32 %v2688_v9 }
 0x875   :  { %vm1741_vm4 = vmor %vm1739_vm6, %vm1740_vm5 }
 0x876   :  { %v1735_v29 = vmul.f32 %v2688_v9, %v1734_v30 }
 0x878   :  { %v1736_v40 = vmul.f32 0.5, %v1735_v29 }
 0x87a   :  { %v1737_v33 = vsub.f32 1.5, %v1736_v40 }
 0x87c   :  { %v1738_v32 = vmul.f32 %v2688_v9, %v1737_v33 }
 0x87e   :  { %v1742_v47 = vsel %vm1741_vm4, %v2688_v9, %v1738_v32 }
 0x87f   :  { %v1747_v59 = vmul.f32 %v1742_v47, %v3760_v62  ;;  %v2496_v62 = vld [vmem:[%s3959_s2 + $0x50] sm:$0xff] }
 0x880   :  { %1990 = vmatpush.bf16.msrb.mxu1 %v2496_v62 }
 0x881   :  { %v1753_v61 = vmul.f32 %v2567_v24, %v1747_v59  ;;  %v2569_v24 = vld [vmem:[%s3958_s1 + $0x2a] ss:$0 sm:$0xff] }
 0x883   :  { %v1759_v0 = vadd.f32 %v2568_v50, %v1753_v61  ;;  %v2493_v50 = vld [vmem:[%s3959_s2 + $0x38] sm:$0xff] }
 0x884   :  { %1991 = vmatpush.bf16.msrb.mxu1 %v2495_v52 }
 0x885   :  { %v1762_v42 = vpack.c.bf16 %v1759_v0, %v1759_v0 }
 0x887   :  { %2414 = vmatmul.msk.bf16.gmra.mxu3 %vm91_vm1, %v1762_v42 }
 0x888   :  { %1992 = vmatpush.bf16.msrb.mxu1 %v2494_v21 }
 0x88c   :  { %1993 = vmatpush.bf16.msrb.mxu1 %v2493_v50 }
 0x890   :  { %1994 = vmatpush.bf16.msrb.mxu1 %v2492_v22 }
 0x8e6   :  { %v1799_v13 = vpop.f32.mrf.mxu3 }
 0x8e7   :  { %v3808_v8 = vadd.f32 %v2569_v24, %v1799_v13 }
 0x8e9   :  { %v2415_v43 = vmul.f32 -1.702, %v3808_v8 }
 0x8eb   :  { %v1823_v15 = vmul.f32 1.442695, %v2415_v43 }
 0x8ed   :  { %2689 = vpow2.f32 %v1823_v15 }
 0x8ee   :  { %v1801_v4 = vpop.f32.mrf.mxu3 }
 0x8ef   :  { %v3817_v35 = vadd.f32 %v2569_v24, %v1801_v4 }
 0x8f1   :  { %v2416_v17 = vmul.f32 -1.702, %v3817_v35 }
 0x8f3   :  { %v2690_v53 = vpop.eup %2689  ;;  %v1825_v26 = vmul.f32 1.442695, %v2416_v17 }
 0x8f4   :  { %v1833_v3 = vadd.f32 1.0, %v2690_v53 }
 0x8f5   :  { %2691 = vpow2.f32 %v1825_v26 }
 0x8f6   :  { %2693 = vrcp.f32 %v1833_v3  ;;  %v1804_v44 = vpop.f32.mrf.mxu3  ;;  %v1849_v31 = vand.u32 2147483648, %v1833_v3  ;;  %vm1843_vm8 = vweird.f32 %v1833_v3  ;;  %v1847_v29 = vand.u32 2147483647, %v1833_v3 }
 0x8f7   :  { %v3823_v41 = vadd.f32 %v2569_v24, %v1804_v44 }
 0x8f8   :  { %v1850_v0 = vor.u32 1.1754944e-38, %v1849_v31  ;;  %vm1848_vm12 = vcmp.eq.f32.partialorder %v1847_v29, 8.507059e+37 }
 0x8f9   :  { %v2417_v10 = vmul.f32 -1.702, %v3823_v41 }
 0x8fb   :  { %v2692_v25 = vpop.eup %2691  ;;  %v1827_v48 = vmul.f32 1.442695, %v2417_v10 }
 0x8fc   :  { %v2694_v12 = vpop.eup %2693  ;;  %v1834_v2 = vadd.f32 1.0, %v2692_v25 }
 0x8fd   :  { %v1839_v14 = vmul.f32 %v2694_v12, %v1833_v3  ;;  %2695 = vpow2.f32 %v1827_v48  ;;  %vm1844_vm9 = vweird.f32 %v2694_v12 }
 0x8fe   :  { %2697 = vrcp.f32 %v1834_v2  ;;  %v1806_v28 = vpop.f32.mrf.mxu3  ;;  %vm1845_vm10 = vmor %vm1843_vm8, %vm1844_vm9  ;;  %v1862_v33 = vand.u32 2147483647, %v1834_v2  ;;  %v1864_v32 = vand.u32 2147483648, %v1834_v2  ;;  %vm1858_vm13 = vweird.f32 %v1834_v2 }
 0x8ff   :  { %v1840_v27 = vsub.f32 1.0, %v1839_v14  ;;  %v3826_v7 = vadd.f32 %v2569_v24, %v1806_v28 }
 0x900   :  { %v1865_v52 = vor.u32 1.1754944e-38, %v1864_v32  ;;  %vm1863_vm14 = vcmp.eq.f32.partialorder %v1862_v33, 8.507059e+37 }
 0x901   :  { %v1841_v36 = vmul.f32 %v2694_v12, %v1840_v27  ;;  %v2418_v58 = vmul.f32 -1.702, %v3826_v7 }
 0x903   :  { %v2696_v16 = vpop.eup %2695  ;;  %v1829_v20 = vmul.f32 1.442695, %v2418_v58  ;;  %v1842_v9 = vadd.f32 %v2694_v12, %v1841_v36 }
 0x904   :  { %v2698_v34 = vpop.eup %2697  ;;  %v1835_v49 = vadd.f32 1.0, %v2696_v16 }
 0x905   :  { %v1854_v30 = vmul.f32 %v2698_v34, %v1834_v2  ;;  %2699 = vpow2.f32 %v1829_v20  ;;  %v1846_v47 = vsel %vm1845_vm10, %v2694_v12, %v1842_v9  ;;  %vm1859_vm15 = vweird.f32 %v2698_v34 }
 0x906   :  { %2701 = vrcp.f32 %v1835_v49  ;;  %v1851_v62 = vsel %vm1848_vm12, %v1850_v0, %v1846_v47  ;;  %vm1860_vm0 = vmor %vm1858_vm13, %vm1859_vm15  ;;  %v1879_v48 = vand.u32 2147483648, %v1835_v49  ;;  %vm1873_vm11 = vweird.f32 %v1835_v49 }
 0x907   :  { %v1855_v39 = vsub.f32 1.0, %v1854_v30  ;;  %v1913_v50 = vmul.f32 %v1851_v62, %v3808_v8  ;;  %v1877_v12 = vand.u32 2147483647, %v1835_v49 }
 0x908   :  { %v1880_v27 = vor.u32 1.1754944e-38, %v1879_v48 }
 0x909   :  { %v1856_v59 = vmul.f32 %v2698_v34, %v1855_v39  ;;  %vm1878_vm4 = vcmp.eq.f32.partialorder %v1877_v12, 8.507059e+37 }
 0x90a   :  { %v1809_v23 = vpop.f32.mrf.mxu3 }
 0x90b   :  { %v3829_v40 = vadd.f32 %v2569_v24, %v1809_v23  ;;  %v2700_v42 = vpop.eup %2699  ;;  %v1857_v54 = vadd.f32 %v2698_v34, %v1856_v59 }
 0x90c   :  { %v2702_v57 = vpop.eup %2701  ;;  %v1836_v24 = vadd.f32 1.0, %v2700_v42 }
 0x90d   :  { %v2419_v61 = vmul.f32 -1.702, %v3829_v40  ;;  %v1861_v13 = vsel %vm1860_vm0, %v2698_v34, %v1857_v54  ;;  %v1869_v43 = vmul.f32 %v2702_v57, %v1835_v49  ;;  %vm1874_vm3 = vweird.f32 %v2702_v57 }
 0x90e   :  { %v1866_v21 = vsel %vm1863_vm14, %v1865_v52, %v1861_v13  ;;  %vm1875_vm5 = vmor %vm1873_vm11, %vm1874_vm3  ;;  %v1894_v14 = vand.u32 2147483648, %v1836_v24  ;;  %vm1888_vm9 = vweird.f32 %v1836_v24 }
 0x90f   :  { %v1831_v5 = vmul.f32 1.442695, %v2419_v61  ;;  %v1914_v4 = vmul.f32 %v1866_v21, %v3817_v35  ;;  %v1870_v17 = vsub.f32 1.0, %v1869_v43  ;;  %v1892_v35 = vand.u32 2147483647, %v1836_v24 }
 0x910   :  { %v1895_v20 = vor.u32 1.1754944e-38, %v1894_v14 }
 0x911   :  { %2703 = vpow2.f32 %v1831_v5  ;;  %v1918_v22 = vpack.c.bf16 %v1914_v4, %v1913_v50  ;;  %v1871_v53 = vmul.f32 %v2702_v57, %v1870_v17  ;;  %vm1893_vm10 = vcmp.eq.f32.partialorder %v1892_v35, 8.507059e+37 }
 0x912   :  { %2705 = vrcp.f32 %v1836_v24  ;;  %v1811_v15 = vpop.f32.mrf.mxu3 }
 0x913   :  { %1995 = vmatmul.bf16.vlgmr.msrb.gmra.mxu1 %v1918_v22  ;;  %v1872_v10 = vadd.f32 %v2702_v57, %v1871_v53 }
 0x915   :  { %v1876_v8 = vsel %vm1875_vm5, %v2702_v57, %v1872_v10  ;;  %v2570_v57 = vld [vmem:[%s3958_s1 + $0x2b] ss:$0 sm:$0xff] }
 0x916   :  { %v1881_v16 = vsel %vm1878_vm4, %v1880_v27, %v1876_v8 }
 0x917   :  { %v2704_v26 = vpop.eup %2703  ;;  %v1915_v49 = vmul.f32 %v1881_v16, %v3823_v41  ;;  %v2503_v41 = vld [vmem:[%s3959_s2 + $0xa0] sm:$0xff] }
 0x918   :  { %v2706_v3 = vpop.eup %2705  ;;  %v1837_v44 = vadd.f32 1.0, %v2704_v26  ;;  %2132 = vmatpush.bf16.msra.mxu0 %v2503_v41 }
 0x919   :  { %v1884_v25 = vmul.f32 %v2706_v3, %v1836_v24  ;;  %vm1889_vm6 = vweird.f32 %v2706_v3 }
 0x91a   :  { %2707 = vrcp.f32 %v1837_v44  ;;  %vm1890_vm8 = vmor %vm1888_vm9, %vm1889_vm6  ;;  %v1909_v32 = vand.u32 2147483648, %v1837_v44  ;;  %vm1903_vm12 = vweird.f32 %v1837_v44  ;;  %v1907_v47 = vand.u32 2147483647, %v1837_v44 }
 0x91b   :  { %v1885_v2 = vsub.f32 1.0, %v1884_v25 }
 0x91c   :  { %v1910_v61 = vor.u32 1.1754944e-38, %v1909_v32  ;;  %vm1908_vm0 = vcmp.eq.f32.partialorder %v1907_v47, 8.507059e+37 }
 0x91d   :  { %v1886_v28 = vmul.f32 %v2706_v3, %v1885_v2 }
 0x91f   :  { %v1887_v36 = vadd.f32 %v2706_v3, %v1886_v28  ;;  %v2760_v28 = vmov 34.0  }
 0x920   :  { %v2708_v58 = vpop.eup %2707  ;;  %2709 = vrcp.f32 %v2760_v28 }
 0x921   :  { %v1891_v34 = vsel %vm1890_vm8, %v2706_v3, %v1887_v36  ;;  %v1899_v9 = vmul.f32 %v2708_v58, %v1837_v44  ;;  %vm1904_vm15 = vweird.f32 %v2708_v58 }
 0x922   :  { %v1896_v30 = vsel %vm1893_vm10, %v1895_v20, %v1891_v34  ;;  %vm1905_vm13 = vmor %vm1903_vm12, %vm1904_vm15  ;;  %vm2015_vm15 = vcmask 132096  }
 0x923   :  { %v1916_v31 = vmul.f32 %v1896_v30, %v3826_v7  ;;  %v1900_v23 = vsub.f32 1.0, %v1899_v9  ;;  %v2502_v7 = vld [vmem:[%s3959_s2 + $0x98] sm:$0xff] }
 0x924   :  { %2133 = vmatpush.bf16.msra.mxu0 %v2502_v7 }
 0x925   :  { %v1919_v29 = vpack.c.bf16 %v1916_v31, %v1915_v49  ;;  %v1901_v39 = vmul.f32 %v2708_v58, %v1900_v23 }
 0x926   :  { %v2710_v20 = vpop.eup %2709 }
 0x927   :  { %2000 = vmatmul.bf16.gmra.mxu1 %v1919_v29  ;;  %v1902_v33 = vadd.f32 %v2708_v58, %v1901_v39  ;;  %v2165_v31 = vmul.f32 34.0, %v2710_v20  ;;  %vm2169_vm14 = vweird.f32 %v2710_v20 }
 0x929   :  { %v1906_v59 = vsel %vm1905_vm13, %v2708_v58, %v1902_v33  ;;  %v2166_v47 = vsub.f32 1.0, %v2165_v31 }
 0x92a   :  { %v1911_v0 = vsel %vm1908_vm0, %v1910_v61, %v1906_v59 }
 0x92b   :  { %v1917_v42 = vmul.f32 %v1911_v0, %v3829_v40  ;;  %v2167_v0 = vmul.f32 %v2710_v20, %v2166_v47 }
 0x92d   :  { %v1920_v54 = vpack.c.bf16 %v1917_v42, %v1917_v42  ;;  %v2168_v7 = vadd.f32 %v2710_v20, %v2167_v0 }
 0x937   :  { %2005 = vmatmul.bf16.gmra.mxu1 %v1920_v54 }
 0x990   :  { %v1996_v5 = vpop.f32.mrf.mxu1 }
 0x991   :  { %v1997_v62 = vadd.f32 %v2570_v57, %v1996_v5 }
 0x993   :  { %v2010_v24 = vadd.f32 %v1997_v62, %v3706_v46 }
 0x998   :  { %v1998_v52 = vpop.f32.mrf.mxu1 }
 0x999   :  { %v1999_v40 = vadd.f32 %v2570_v57, %v1998_v52 }
 0x99b   :  { %v2011_v13 = vadd.f32 %v1999_v40, %v3711_v63 }
 0x99d   :  { %v2096_v43 = vpack.c.bf16 %v2011_v13, %v2010_v24 }
 0x99f   :  { %2469 = vmatmul.msk.bf16.vlgmr.msra.gmra.mxu0 %vm91_vm1, %v2096_v43 }
 0x9a4   :  { %v2001_v21 = vpop.f32.mrf.mxu1 }
 0x9a5   :  { %v2002_v15 = vadd.f32 %v2570_v57, %v2001_v21 }
 0x9a7   :  { %v2012_v50 = vadd.f32 %v2002_v15, %v3716_v37 }
 0x9a9   :  { %v2017_v4 = vsel %vm675_vm7, %v2010_v24, %v2012_v50 }
 0x9aa   :  { %v2020_v17 = vsel %vm104_vm2, %v2017_v4, 0.0 }
 0x9ab   :  { %2021 = vadd.xlane.f32.xlu1 %v2020_v17 }
 0x9ac   :  { %v2003_v22 = vpop.f32.mrf.mxu1 }
 0x9ad   :  { %v2004_v53 = vadd.f32 %v2570_v57, %v2003_v22 }
 0x9af   :  { %v2013_v26 = vadd.f32 %v2004_v53, %v3721_v18 }
 0x9b1   :  { %v2097_v3 = vpack.c.bf16 %v2013_v26, %v2012_v50 }
 0x9b3   :  { %2470 = vmatmul.msk.bf16.gmra.mxu0 %vm91_vm1, %v2097_v3 }
 0x9b4   :  { %v2006_v46 = vpop.f32.mrf.mxu1 }
 0x9b5   :  { %v2007_v63 = vadd.f32 %v2570_v57, %v2006_v46  ;;  %v2170_v57 = vsel %vm2169_vm14, %v2710_v20, %v2168_v7  ;;  %v2501_v7 = vld [vmem:[%s3959_s2 + $0x78] sm:$0xff] }
 0x9b6   :  { %2072 = vmatpush.bf16.msra.mxu2 %v2501_v7 }
 0x9b7   :  { %v2014_v10 = vadd.f32 %v2007_v63, %v3726_v55 }
 0x9b9   :  { %v2098_v25 = vpack.c.bf16 %v2014_v10, %v2014_v10 }
 0x9bc   :  { %v2008_v44 = vpop.f32.mrf.mxu1 }
 0x9c3   :  { %2471 = vmatmul.msk.bf16.gmra.mxu0 %vm91_vm1, %v2098_v25 }
 0x9c4   :  { %672 = vrot.lane.b32.xlu1 %v3345_v11, %s2759_s7  ;;  %v2571_v11 = vld [vmem:[%s3958_s1 + $0x2e] ss:$0 sm:$0xff] }
 0x9cc   :  { %1444 = vrot.lane.b32.xlu1 %v3584_v56, %s2759_s7 }
 0xa1c   :  { %v2135_v48 = vpop.f32.mrf.mxu0 }
 0xa1d   :  { %v2136_v27 = vadd.f32 %v2571_v11, %v2135_v48 }
 0xa1e   :  { %v2022_v37 = vpop.xlane.xlu1 %2021 }
 0xa1f   :  { %v2023_v18 = vmul.f32 %v2022_v37, %v2836_v38  ;;  %v2149_v34 = vsel %vm91_vm1, %v2136_v27, 0.0 }
 0xa21   :  { %v3861_v12 = vsub.f32 %v2017_v4, %v2023_v18 }
 0xa23   :  { %v2025_v2 = vmul.f32 %v3861_v12, %v3861_v12 }
 0xa24   :  { %v2137_v14 = vpop.f32.mrf.mxu0 }
 0xa25   :  { %v2026_v55 = vsel %vm104_vm2, %v2025_v2, 0.0  ;;  %v2138_v56 = vadd.f32 %v2571_v11, %v2137_v14 }
 0xa26   :  { %2027 = vadd.xlane.f32.xlu2 %v2026_v55  ;;  %v2505_v55 = vld [vmem:[%s3959_s2 + $0xb0] sm:$0xff] }
 0xa27   :  { %v2150_v58 = vsel %vm91_vm1, %v2138_v56, 0.0  ;;  %2269 = vmatpush.bf16.msrb.mxu3 %v2505_v55 }
 0xa28   :  { %v2151_v30 = vadd.f32 %v2150_v58, %v2149_v34 }
 0xa30   :  { %v2140_v8 = vpop.f32.mrf.mxu0 }
 0xa31   :  { %v2141_v36 = vadd.f32 %v2571_v11, %v2140_v8  ;;  %v2504_v8 = vld [vmem:[%s3959_s2 + $0xa8] sm:$0xff] }
 0xa32   :  { %2270 = vmatpush.bf16.msrb.mxu3 %v2504_v8 }
 0xa33   :  { %v2152_v9 = vsel %vm91_vm1, %v2141_v36, 0.0 }
 0xa34   :  { %v2153_v23 = vadd.f32 %v2152_v9, %v2151_v30  ;;  %v2572_v9 = vld [vmem:[%s3958_s1 + $0x2f] ss:$0 sm:$0xff] }
 0xa38   :  { %v2142_v35 = vpop.f32.mrf.mxu0 }
 0xa39   :  { %v2143_v16 = vadd.f32 %v2571_v11, %v2142_v35 }
 0xa3b   :  { %v2154_v49 = vsel %vm91_vm1, %v2143_v16, 0.0 }
 0xa3c   :  { %v2155_v33 = vadd.f32 %v2154_v49, %v2153_v23  ;;  %v2573_v23 = vld [vmem:[%s3958_s1 + $0x30] ss:$0 sm:$0xff] }
 0xa3e   :  { %934 = vrot.lane.b32.xlu2 %v3643_v1, %s2759_s7 }
 0xa40   :  { %v2145_v29 = vpop.f32.mrf.mxu0 }
 0xa41   :  { %v2146_v39 = vadd.f32 %v2571_v11, %v2145_v29 }
 0xa43   :  { %v2156_v32 = vsel %vm104_vm2, %v2146_v39, 0.0 }
 0xa44   :  { %v2157_v59 = vadd.f32 %v2156_v32, %v2155_v33 }
 0xa46   :  { %v2158_v61 = vrot.slane %v2157_v59, 4 }
 0xa48   :  { %v2159_v42 = vadd.f32 %v2158_v61, %v2157_v59  ;;  %v2147_v54 = vpop.f32.mrf.mxu0 }
 0xa4a   :  { %v2160_v41 = vrot.slane %v2159_v42, 2 }
 0xa4c   :  { %v2161_v5 = vadd.f32 %v2160_v41, %v2159_v42 }
 0xa4e   :  { %v2162_v1 = vrot.slane %v2161_v5, 1 }
 0xa50   :  { %v2163_v62 = vadd.f32 %v2162_v1, %v2161_v5 }
 0xa52   :  { %v2171_v52 = vmul.f32 %v2170_v57, %v2163_v62 }
 0xa54   :  { %v2172_v40 = vsub.f32 %v2136_v27, %v2171_v52  ;;  %v2173_v24 = vsub.f32 %v2138_v56, %v2171_v52  ;;  %v2174_v13 = vsub.f32 %v2141_v36, %v2171_v52  ;;  %v2175_v43 = vsub.f32 %v2143_v16, %v2171_v52 }
 0xa55   :  { %v3876_v21 = vsub.f32 %v2146_v39, %v2171_v52 }
 0xa56   :  { %v2177_v15 = vmul.f32 %v2172_v40, %v2172_v40  ;;  %v2178_v50 = vmul.f32 %v2173_v24, %v2173_v24  ;;  %v2179_v4 = vmul.f32 %v2174_v13, %v2174_v13  ;;  %v2180_v17 = vmul.f32 %v2175_v43, %v2175_v43 }
 0xa57   :  { %v2181_v3 = vmul.f32 %v3876_v21, %v3876_v21 }
 0xa58   :  { %v2182_v22 = vsel %vm91_vm1, %v2177_v15, 0.0  ;;  %v2183_v53 = vsel %vm91_vm1, %v2178_v50, 0.0  ;;  %v2185_v46 = vsel %vm91_vm1, %v2179_v4, 0.0  ;;  %v2187_v44 = vsel %vm91_vm1, %v2180_v17, 0.0 }
 0xa59   :  { %v2184_v26 = vadd.f32 %v2183_v53, %v2182_v22  ;;  %v2189_v25 = vsel %vm104_vm2, %v2181_v3, 0.0 }
 0xa5b   :  { %v2186_v63 = vadd.f32 %v2185_v46, %v2184_v26 }
 0xa5d   :  { %v2188_v10 = vadd.f32 %v2187_v44, %v2186_v63 }
 0xa5f   :  { %v2190_v37 = vadd.f32 %v2189_v25, %v2188_v10  ;;  %v2575_v25 = vld [vmem:[%s3958_s1 + $0x2d] ss:$0 sm:$0xff] }
 0xa61   :  { %v2191_v18 = vrot.slane %v2190_v37, 4 }
 0xa63   :  { %v2192_v48 = vadd.f32 %v2191_v18, %v2190_v37 }
 0xa65   :  { %v2193_v2 = vrot.slane %v2192_v48, 2 }
 0xa67   :  { %v2194_v14 = vadd.f32 %v2193_v2, %v2192_v48  ;;  %v2576_v2 = vld [vmem:[%s3958_s1 + $0x31] ss:$0 sm:$0xff] }
 0xa69   :  { %v2195_v11 = vrot.slane %v2194_v14, 1 }
 0xa6b   :  { %v2196_v28 = vadd.f32 %v2195_v11, %v2194_v14 }
 0xa6d   :  { %v2197_v56 = vmul.f32 %v2196_v28, %v2170_v57  ;;  %v2500_v57 = vld [vmem:[%s3959_s2 + $0x70] sm:$0xff] }
 0xa6e   :  { %2073 = vmatpush.bf16.msra.mxu2 %v2500_v57 }
 0xa6f   :  { %v2198_v35 = vadd.f32 1e-05, %v2197_v56 }
 0xa71   :  { %2711 = vrsqrt.f32 %v2198_v35  ;;  %vm2205_vm11 = vweird.f32 %v2198_v35 }
 0xa77   :  { %v2712_v27 = vpop.eup %2711 }
 0xa78   :  { %v2200_v36 = vmul.f32 %v2712_v27, %v2198_v35  ;;  %vm2206_vm3 = vweird.f32 %v2712_v27 }
 0xa79   :  { %vm2207_vm5 = vmor %vm2205_vm11, %vm2206_vm3 }
 0xa7a   :  { %v2201_v58 = vmul.f32 %v2712_v27, %v2200_v36 }
 0xa7c   :  { %v2202_v16 = vmul.f32 0.5, %v2201_v58 }
 0xa7e   :  { %v2203_v20 = vsub.f32 1.5, %v2202_v16 }
 0xa80   :  { %v2204_v34 = vmul.f32 %v2712_v27, %v2203_v20 }
 0xa82   :  { %v2208_v30 = vsel %vm2207_vm5, %v2712_v27, %v2204_v34 }
 0xa83   :  { %v2209_v49 = vmul.f32 %v2208_v30, %v2172_v40  ;;  %v2210_v31 = vmul.f32 %v2208_v30, %v2173_v24  ;;  %v2211_v0 = vmul.f32 %v2208_v30, %v2174_v13  ;;  %v2212_v42 = vmul.f32 %v2208_v30, %v2175_v43 }
 0xa84   :  { %v2213_v13 = vmul.f32 %v2208_v30, %v3876_v21 }
 0xa85   :  { %v2216_v29 = vmul.f32 %v2572_v9, %v2209_v49  ;;  %v2217_v39 = vmul.f32 %v2572_v9, %v2210_v31  ;;  %v2218_v54 = vmul.f32 %v2572_v9, %v2211_v0  ;;  %v2219_v41 = vmul.f32 %v2572_v9, %v2212_v42  ;;  %v673_v31 = vpop.permute.xlu1 %672 }
 0xa86   :  { %v2220_v50 = vmul.f32 %v2572_v9, %v2213_v13 }
 0xa87   :  { %v2223_v33 = vadd.f32 %v2573_v23, %v2216_v29  ;;  %v2224_v32 = vadd.f32 %v2573_v23, %v2217_v39  ;;  %v2225_v5 = vadd.f32 %v2573_v23, %v2218_v54  ;;  %v2226_v1 = vadd.f32 %v2573_v23, %v2219_v41 }
 0xa88   :  { %v2227_v4 = vadd.f32 %v2573_v23, %v2220_v50 }
 0xa89   :  { %v2228_v47 = vmax.f32 %v2223_v33, 0.0  ;;  %v2229_v59 = vmax.f32 %v2224_v32, 0.0  ;;  %v2230_v62 = vmax.f32 %v2225_v5, 0.0  ;;  %v2231_v52 = vmax.f32 %v2226_v1, 0.0 }
 0xa8a   :  { %v2232_v26 = vmax.f32 %v2227_v4, 0.0 }
 0xa8b   :  { %v2233_v61 = vpack.c.bf16 %v2229_v59, %v2228_v47  ;;  %v2234_v43 = vpack.c.bf16 %v2231_v52, %v2230_v62  ;;  %v676_v59 = vsel %vm675_vm7, %v3329_v6, %v673_v31 }
 0xa8c   :  { %v2235_v63 = vpack.c.bf16 %v2232_v26, %v2232_v26  ;;  %v677_v54 = vmul.f32 0.25, %v676_v59 }
 0xa8d   :  { %2480 = vmatmul.msk.bf16.vlgmr.msrb.gmra.mxu3 %vm91_vm1, %v2233_v61  ;;  %v1445_v0 = vpop.permute.xlu1 %1444 }
 0xa99   :  { %v2028_v40 = vpop.xlane.xlu2 %2027 }
 0xa9a   :  { %v2029_v24 = vmul.f32 %v2028_v40, %v2836_v38  ;;  %v2574_v38 = vld [vmem:[%s3958_s1 + $0x2c] ss:$0 sm:$0xff] }
 0xa9c   :  { %v2030_v15 = vadd.f32 1e-05, %v2029_v24 }
 0xa9d   :  { %2481 = vmatmul.msk.bf16.gmra.mxu3 %vm91_vm1, %v2234_v43 }
 0xa9e   :  { %2713 = vrsqrt.f32 %v2030_v15  ;;  %vm2037_vm4 = vweird.f32 %v2030_v15 }
 0xaa1   :  { %v935_v39 = vpop.permute.xlu2 %934 }
 0xaa2   :  { %v937_v32 = vsel %vm675_vm7, %v3398_v45, %v935_v39  ;;  %v1447_v45 = vsel %vm675_vm7, %v3471_v51, %v1445_v0 }
 0xaa3   :  { %v938_v42 = vmul.f32 0.25, %v937_v32  ;;  %v1448_v62 = vmul.f32 0.25, %v1447_v45 }
 0xaa4   :  { %v2714_v17 = vpop.eup %2713 }
 0xaa5   :  { %v2032_v22 = vmul.f32 %v2714_v17, %v2030_v15  ;;  %vm2038_vm6 = vweird.f32 %v2714_v17  ;;  %v939_v5 = vadd.f32 %v938_v42, %v677_v54 }
 0xaa6   :  { %vm2039_vm9 = vmor %vm2037_vm4, %vm2038_vm6 }
 0xaa7   :  { %v2033_v53 = vmul.f32 %v2714_v17, %v2032_v22 }
 0xaa9   :  { %v2034_v3 = vmul.f32 0.5, %v2033_v53 }
 0xaab   :  { %v2035_v46 = vsub.f32 1.5, %v2034_v3 }
 0xaad   :  { %v2036_v44 = vmul.f32 %v2714_v17, %v2035_v46  ;;  %2482 = vmatmul.msk.bf16.gmra.mxu3 %vm91_vm1, %v2235_v63 }
 0xaaf   :  { %v2040_v21 = vsel %vm2039_vm9, %v2714_v17, %v2036_v44 }
 0xab0   :  { %v2041_v10 = vmul.f32 %v2040_v21, %v3861_v12 }
 0xab2   :  { %v2043_v37 = vmul.f32 %v2574_v38, %v2041_v10 }
 0xab4   :  { %v2045_v18 = vadd.f32 %v2575_v25, %v2043_v37 }
 0xab6   :  { %v2046_v48 = vpack.c.bf16 %v2045_v18, %v2045_v18 }
 0xab8   :  { %2460 = vmatmul.msk.bf16.vlgmr.msra.gmra.mxu2 %vm91_vm1, %v2046_v48 }
 0xb10   :  { %v2272_v55 = vpop.f32.mrf.mxu3 }
 0xb11   :  { %v2273_v14 = vadd.f32 %v2576_v2, %v2272_v55 }
 0xb13   :  { %2286 = vst.msk [vmem:[%s3962_s5] sm:$0xff] %vm91_vm1, %v2273_v14 }
 0xb18   :  { %v2274_v12 = vpop.f32.mrf.mxu3 }
 0xb19   :  { %v2275_v8 = vadd.f32 %v2576_v2, %v2274_v12 }
 0xb1b   :  { %2287 = vst.msk [vmem:[%s3962_s5 + $0x8] sm:$0xff] %vm91_vm1, %v2275_v8 }
 0xb20   :  { %v2277_v11 = vpop.f32.mrf.mxu3 }
 0xb21   :  { %v2278_v28 = vadd.f32 %v2576_v2, %v2277_v11 }
 0xb23   :  { %2288 = vst.msk [vmem:[%s3962_s5 + $0x10] sm:$0xff] %vm91_vm1, %v2278_v28 }
 0xb28   :  { %v2279_v56 = vpop.f32.mrf.mxu3 }
 0xb29   :  { %v2280_v35 = vadd.f32 %v2576_v2, %v2279_v56 }
 0xb2b   :  { %2289 = vst.msk [vmem:[%s3962_s5 + $0x18] sm:$0xff] %vm91_vm1, %v2280_v35 }
 0xb30   :  { %v2282_v27 = vpop.f32.mrf.mxu3 }
 0xb31   :  { %v2283_v36 = vadd.f32 %v2576_v2, %v2282_v27 }
 0xb33   :  { %2290 = vst.msk [vmem:[%s3962_s5 + $0x20] sm:$0x3] %vm104_vm2, %v2283_v36  ;;  %s2761_s5 = smov [#allocation2]  }
 0xb38   :  { %v2284_v58 = vpop.f32.mrf.mxu3 }
 0xb3b   :  { %v2075_v16 = vpop.f32.mrf.mxu2 }
 0xb3c   :  { %v2079_v20 = vmul.f32 %v2075_v16, %v2075_v16 }
 0xb3e   :  { %v2080_v34 = vsel %vm104_vm2, %v2079_v20, 0.0 }
 0xb3f   :  { %2081 = vadd.xlane.f32.xlu0 %v2080_v34 }
 0xb43   :  { %v2077_v9 = vpop.f32.mrf.mxu2 }
 0xb53   :  { %1189 = vrot.lane.b32.xlu0 %v3654_v19, %s2759_s7  ;;  %s2296_s7 = sshll.u32 %s2761_s5, 4  ;;  %s2297_s7 = int_to_ptr.vmem [resolvable:$true] %s2296_s7 }
 0xbb2   :  { %v2082_v30 = vpop.xlane.xlu0 %2081 }
 0xbb3   :  { %v2083_v49 = vadd.f32 1e-12, %v2082_v30 }
 0xbb5   :  { %2715 = vrsqrt.f32 %v2083_v49  ;;  %vm2090_vm8 = vweird.f32 %v2083_v49 }
 0xbbb   :  { %v2716_v23 = vpop.eup %2715 }
 0xbbc   :  { %v2085_v29 = vmul.f32 %v2716_v23, %v2083_v49  ;;  %vm2091_vm1 = vweird.f32 %v2716_v23 }
 0xbbd   :  { %vm2092_vm10 = vmor %vm2090_vm8, %vm2091_vm1 }
 0xbbe   :  { %v2086_v33 = vmul.f32 %v2716_v23, %v2085_v29 }
 0xbc0   :  { %v2087_v47 = vmul.f32 0.5, %v2086_v33 }
 0xbc2   :  { %v2088_v61 = vsub.f32 1.5, %v2087_v47 }
 0xbc4   :  { %v2089_v19 = vmul.f32 %v2716_v23, %v2088_v61 }
 0xbc5   :  { %v1190_v41 = vpop.permute.xlu0 %1189 }
 0xbc6   :  { %v1192_v6 = vsel %vm675_vm7, %v3562_v60, %v1190_v41  ;;  %v2093_v7 = vsel %vm2092_vm10, %v2716_v23, %v2089_v19 }
 0xbc7   :  { %v1193_v1 = vmul.f32 0.25, %v1192_v6  ;;  %v2094_v57 = vmul.f32 %v2093_v7, %v2075_v16 }
 0xbc9   :  { %v1194_v52 = vadd.f32 %v1193_v1, %v939_v5  ;;  %2095 = vst.msk [vmem:[#allocation2] sm:$0x3] %vm104_vm2, %v2094_v57 }
 0xbca   :  { %2301 = dma.vmem_to_hbm [thread:$0]  %s2297_s7, 32, %s2299_s13, [#allocation3]  }
 0xbcb   :  { %v1449_v40 = vadd.f32 %v1448_v62, %v1194_v52 }
 0xbcd   :  { %2016 = vst.msk [vmem:[%s3961_s4] sm:$0x3] %vm2015_vm15, %v1449_v40 }
 0xbce   :  { %2741 = dma.done.wait [#allocation3], 32  }
 0xbcf   :  { %2742 = vsyncadd [#allocation3], 4294967264 }
 0xbd0   :  { %2314 = vsyncpa [#allocation3], 1 }

</bundles_post_ra>
